<compile_context>
chip_gen: v6e
topology: v6e:2x2x1
jax: 0.10.0
libtpu: 0.0.40
codegen_flags: <defaults>
</compile_context>

<pallas_src>
import math
import functools

import jax
import jax.numpy as jnp
from jax import lax
from jax.experimental import pallas as pl
from jax.experimental.pallas import tpu as pltpu


# -----------------------------------------------------------------------------
# Fused decoder-layer kernel: one grid step == `block_b` batch elements.
# -----------------------------------------------------------------------------
def _decoder_layer_kernel(
    trg_ref, enc_ref, tmask_ref, smask_ref,
    wqkv1_ref, bqkv1_ref, ln1g_ref, ln1b_ref,
    wq2_ref, bq2_ref, wkv2_ref, bkv2_ref, ln2g_ref, ln2b_ref,
    fc1w_ref, fc1b_ref, fc2w_ref, fc2b_ref, ln3g_ref, ln3b_ref,
    o_ref,
    attn_ref,                              # VMEM scratch (block_b*S_trg, D) f32
    *, head_num, k_dim, mm_dtype):
    Bt, S_trg, D = trg_ref.shape
    S_src = enc_ref.shape[1]
    hk = head_num * k_dim
    dv = D // head_num

    def dot(a, b):
        # Operands in mm_dtype (bf16 by default -> full MXU rate); f32 accumulation.
        return jnp.dot(a.astype(mm_dtype), b.astype(mm_dtype),
                       preferred_element_type=jnp.float32)

    def layer_norm(h, g_ref, b_ref):
        mu = jnp.mean(h, axis=-1, keepdims=True)
        var = jnp.mean((h - mu) ** 2, axis=-1, keepdims=True)
        return (h - mu) * lax.rsqrt(var + 1e-5) * g_ref[...] + b_ref[...]

    def attention(q, k, v, mask_i8, row0):
        # q:(Sq,hk)  k:(Sk,hk)  v:(Sk,D)  mask:(Sq,Sk) int8, nonzero => masked.
        masked = mask_i8 != 0
        sq = q.shape[0]
        for h in range(head_num):                       # static unroll over heads
            qh = q[:, h * k_dim:(h + 1) * k_dim]
            kh = k[:, h * k_dim:(h + 1) * k_dim]
            vh = v[:, h * dv:(h + 1) * dv]
            # contract over the last axis of both operands (no in-kernel transpose)
            s = lax.dot_general(qh.astype(mm_dtype), kh.astype(mm_dtype),
                                (((1,), (1,)), ((), ())),
                                preferred_element_type=jnp.float32)   # (Sq, Sk)
            # 1/sqrt(k_dim) already folded into the fused Q weight.
            # PyTorch reference: masked_fill(mask, 1e-10) (NOT -inf) — kept as-is.
            s = jnp.where(masked, jnp.float32(1e-10), s)
            m = jnp.max(s, axis=-1, keepdims=True)
            e = jnp.exp(s - m)
            p = e * pl.reciprocal(jnp.sum(e, axis=-1, keepdims=True), approx=True)
            # write this head's output directly into its lane slice of the scratch
            # (no per-head concat, live ranges bounded to one head).
            attn_ref[row0:row0 + sq, h * dv:(h + 1) * dv] = dot(p, vh)

    # Flatten (block_b, S, D) -> (block_b*S, D): big M panel keeps the MXU fed.
    x = trg_ref[...].reshape(Bt * S_trg, D)
    y = enc_ref[...].reshape(Bt * S_src, D)
    tmask = tmask_ref[...]                                  # (Bt, S_trg, S_trg) i8
    smask = smask_ref[...]                                  # (Bt, S_trg, S_src) i8

    # ---- masked multi-head self-attention + residual + LN1 -------------------
    qkv = dot(x, wqkv1_ref[...]) + bqkv1_ref[...]           # (Bt*S_trg, 2*hk + D)
    for b in range(Bt):
        r = slice(b * S_trg, (b + 1) * S_trg)
        attention(qkv[r, :hk], qkv[r, hk:2 * hk], qkv[r, 2 * hk:],
                  tmask[b], b * S_trg)
    h1 = layer_norm(x + attn_ref[...], ln1g_ref, ln1b_ref)

    # ---- decoder-encoder attention + residual + LN2 ---------------------------
    q2 = dot(h1, wq2_ref[...]) + bq2_ref[...]               # (Bt*S_trg, hk)
    kv2 = dot(y, wkv2_ref[...]) + bkv2_ref[...]             # (Bt*S_src, hk + D)
    for b in range(Bt):
        qr = slice(b * S_trg, (b + 1) * S_trg)
        kr = slice(b * S_src, (b + 1) * S_src)
        attention(q2[qr], kv2[kr, :hk], kv2[kr, hk:], smask[b], b * S_trg)
    h2 = layer_norm(h1 + attn_ref[...], ln2g_ref, ln2b_ref)

    # ---- position-wise FFN + residual + LN3 -----------------------------------
    ff = jnp.maximum(dot(h2, fc1w_ref[...]) + fc1b_ref[...], 0.0)
    ff = dot(ff, fc2w_ref[...]) + fc2b_ref[...]
    o_ref[...] = layer_norm(ff + h2, ln3g_ref, ln3b_ref).reshape(Bt, S_trg, D)


# -----------------------------------------------------------------------------
# VMEM budget helper (scoped limit computed from the actual block sizes)
# -----------------------------------------------------------------------------
def _vmem_limit_bytes(block_b, S_trg, S_src, D, d_ff, hk, weights):
    f32 = 4
    act_blocks = block_b * (2 * S_trg * D + S_src * D) * f32       # trg, out, enc
    mask_blocks = block_b * S_trg * (S_trg + S_src)                # int8
    pipelined = 2 * (act_blocks + mask_blocks)                     # double-buffered
    weight_bytes = 2 * sum(int(w.size) * w.dtype.itemsize for w in weights)
    scratch = block_b * S_trg * D * f32
    live = block_b * (S_trg * (2 * hk + D) + S_trg * hk + S_src * (hk + D)
                      + S_trg * d_ff + S_trg * max(S_trg, S_src)) * f32
    need = pipelined + weight_bytes + scratch + live
    try:
        phys = pltpu.get_tpu_info().vmem_capacity_bytes
    except Exception:
        phys = 64 * 1024 * 1024
    return int(max(32 * 1024 * 1024, min(int(phys * 0.9), 2 * need)))


# -----------------------------------------------------------------------------
# Wrapper
# -----------------------------------------------------------------------------
def decoder_layer(trg, encoder_output, trg_mask, src_mask, fused,
                  head_num, k_dim, mm_dtype=jnp.bfloat16, block_b=None):
    """trg: (B,S_trg,D), encoder_output: (B,S_src,D),
    trg_mask: (B,1,S_trg,S_trg), src_mask: (B,1,S_trg,S_src); nonzero = masked."""
    B, S_trg, D = trg.shape
    S_src = encoder_output.shape[1]
    hk = fused["w_q2"].shape[1]
    d_ff = fused["fc1_w"].shape[1]
    assert hk == head_num * k_dim and D % head_num == 0

    # masks as int8 (4x less DMA / VMEM than f32); comparison happens in-kernel.
    tmask = (trg_mask.reshape(B, S_trg, S_trg) != 0).astype(jnp.int8)
    smask = (src_mask.reshape(B, S_trg, S_src) != 0).astype(jnp.int8)

    if block_b is None:
        # feed ~256 rows per projection matmul (v6e/v7x MXU) while keeping >=2
        # grid steps when B >= 2 so the parallel axis can use both TensorCores.
        block_b = max(1, min(max(B // 2, 1), -(-256 // S_trg)))
    while B % block_b:
        block_b -= 1
    grid = (B // block_b,)

    weights = [
        fused["w_qkv1"], fused["b_qkv1"], fused["ln1_g"], fused["ln1_b"],
        fused["w_q2"], fused["b_q2"], fused["w_kv2"], fused["b_kv2"],
        fused["ln2_g"], fused["ln2_b"],
        fused["fc1_w"], fused["fc1_b"], fused["fc2_w"], fused["fc2_b"],
        fused["ln3_g"], fused["ln3_b"],
    ]

    def bspec(s_len, width):
        return pl.BlockSpec((block_b, s_len, width), lambda i: (i, 0, 0))

    def wspec(arr):
        # constant block index -> Pallas DMAs the weight once (no re-fetch).
        return pl.BlockSpec(arr.shape, lambda i: (0, 0))

    kernel = functools.partial(_decoder_layer_kernel,
                               head_num=head_num, k_dim=k_dim, mm_dtype=mm_dtype)

    # advisory cost estimate so XLA schedules surrounding ops sensibly
    dv = D // head_num
    flops = 2 * B * (S_trg * D * (2 * hk + D)                    # fused self QKV
                     + S_trg * D * hk + S_src * D * (hk + D)     # cross Q / fused KV
                     + head_num * S_trg * (S_trg + S_src) * (k_dim + dv)  # QK^T + PV
                     + 2 * S_trg * D * d_ff)                     # FFN
    transcendentals = B * head_num * S_trg * (S_trg + S_src) + 3 * B * S_trg
    bytes_accessed = int(4 * (trg.size + encoder_output.size + B * S_trg * D)
                         + tmask.size + smask.size
                         + sum(int(w.size) * w.dtype.itemsize for w in weights))

    return pl.pallas_call(
        kernel,
        out_shape=jax.ShapeDtypeStruct((B, S_trg, D), jnp.float32),
        grid=grid,
        in_specs=[
            bspec(S_trg, D),              # trg block
            bspec(S_src, D),              # encoder_output block
            bspec(S_trg, S_trg),          # trg_mask block (int8)
            bspec(S_trg, S_src),          # src_mask block (int8)
        ] + [wspec(w) for w in weights],
        out_specs=bspec(S_trg, D),
        scratch_shapes=[pltpu.VMEM((block_b * S_trg, D), jnp.float32)],
        compiler_params=pltpu.CompilerParams(
            dimension_semantics=("parallel",),
            vmem_limit_bytes=_vmem_limit_bytes(block_b, S_trg, S_src, D, d_ff,
                                               hk, weights)),
        cost_estimate=pl.CostEstimate(flops=flops,
                                      transcendentals=transcendentals,
                                      bytes_accessed=bytes_accessed),
    )(trg, encoder_output, tmask, smask, *weights)


# -----------------------------------------------------------------------------
# Parameter init (mirrors the PyTorch module) + one-time weight folding
# -----------------------------------------------------------------------------
def _init_mha_params(key, d_model, head_num, k_dim):
    ks = jax.random.split(key, 12)
    hk = head_num * k_dim
    w = lambda k, fi, fo: 0.05 * jax.random.normal(k, (fi, fo), jnp.float32)
    b = lambda k, fo: 0.02 * jax.random.normal(k, (fo,), jnp.float32)
    return {
        "q_w": w(ks[0], d_model, d_model), "q_b": b(ks[1], d_model),
        "k_w": w(ks[2], d_model, d_model), "k_b": b(ks[3], d_model),
        "v_w": w(ks[4], d_model, d_model), "v_b": b(ks[5], d_model),
        "qm_w": w(ks[6], d_model, hk), "qm_b": b(ks[7], hk),
        "km_w": w(ks[8], d_model, hk), "km_b": b(ks[9], hk),
        "vm_w": w(ks[10], d_model, d_model), "vm_b": b(ks[11], d_model),
    }


def init_decoder_params(key, d_model, d_ff, head_num, k_dim):
    ks = jax.random.split(key, 12)
    g = lambda k, n: 1.0 + 0.1 * jax.random.normal(k, (n,), jnp.float32)
    z = lambda k, n: 0.05 * jax.random.normal(k, (n,), jnp.float32)
    return {
        "mha1": _init_mha_params(ks[0], d_model, head_num, k_dim),
        "mha2": _init_mha_params(ks[1], d_model, head_num, k_dim),
        "ln1_g": g(ks[2], d_model), "ln1_b": z(ks[3], d_model),
        "ln2_g": g(ks[4], d_model), "ln2_b": z(ks[5], d_model),
        "ln3_g": g(ks[6], d_model), "ln3_b": z(ks[7], d_model),
        "fc1_w": 0.05 * jax.random.normal(ks[8], (d_model, d_ff), jnp.float32),
        "fc1_b": 0.02 * jax.random.normal(ks[9], (d_ff,), jnp.float32),
        "fc2_w": 0.05 * jax.random.normal(ks[10], (d_ff, d_model), jnp.float32),
        "fc2_b": 0.02 * jax.random.normal(ks[11], (d_model,), jnp.float32),
    }


def fuse_decoder_params(p, head_num, k_dim, weight_dtype=jnp.bfloat16):
    """Fold chained projections (q_w->qm_w etc.), concatenate QKV / KV weights,
    fold the 1/sqrt(k_dim) scale into Q, and cast weight MATRICES to bf16 once.
    Biases and LayerNorm affine parameters stay f32 (added in the f32 domain)."""
    scale = 1.0 / math.sqrt(k_dim)

    def fuse_mha(m):
        wq = (m["q_w"] @ m["qm_w"]) * scale
        bq = (m["q_b"] @ m["qm_w"] + m["qm_b"]) * scale
        wk = m["k_w"] @ m["km_w"]
        bk = m["k_b"] @ m["km_w"] + m["km_b"]
        wv = m["v_w"] @ m["vm_w"]
        bv = m["v_b"] @ m["vm_w"] + m["vm_b"]
        return wq, bq, wk, bk, wv, bv

    wq1, bq1, wk1, bk1, wv1, bv1 = fuse_mha(p["mha1"])
    wq2, bq2, wk2, bk2, wv2, bv2 = fuse_mha(p["mha2"])
    wc = lambda w: w.astype(weight_dtype)

    return {
        "w_qkv1": wc(jnp.concatenate([wq1, wk1, wv1], axis=1)),
        "b_qkv1": jnp.concatenate([bq1, bk1, bv1])[None, :],
        "w_q2": wc(wq2), "b_q2": bq2[None, :],
        "w_kv2": wc(jnp.concatenate([wk2, wv2], axis=1)),
        "b_kv2": jnp.concatenate([bk2, bv2])[None, :],
        "ln1_g": p["ln1_g"][None, :], "ln1_b": p["ln1_b"][None, :],
        "ln2_g": p["ln2_g"][None, :], "ln2_b": p["ln2_b"][None, :],
        "ln3_g": p["ln3_g"][None, :], "ln3_b": p["ln3_b"][None, :],
        "fc1_w": wc(p["fc1_w"]), "fc1_b": p["fc1_b"][None, :],
        "fc2_w": wc(p["fc2_w"]), "fc2_b": p["fc2_b"][None, :],
    }


# -----------------------------------------------------------------------------
# Pure-JAX f32 reference (mirrors the PyTorch forward exactly, raw params)
# -----------------------------------------------------------------------------
def _mha_reference(x, y, mask, m, head_num, k_dim):
    q = (x @ m["q_w"] + m["q_b"]) @ m["qm_w"] + m["qm_b"]
    k = (y @ m["k_w"] + m["k_b"]) @ m["km_w"] + m["km_b"]
    v = (y @ m["v_w"] + m["v_b"]) @ m["vm_w"] + m["vm_b"]
    B, Sq, _ = q.shape
    Sk = k.shape[1]
    dv = v.shape[-1] // head_num
    q = q.reshape(B, Sq, head_num, k_dim).transpose(0, 2, 1, 3)
    k = k.reshape(B, Sk, head_num, k_dim).transpose(0, 2, 1, 3)
    v = v.reshape(B, Sk, head_num, dv).transpose(0, 2, 1, 3)
    s = jnp.einsum("bhqd,bhkd->bhqk", q, k) / math.sqrt(k_dim)
    if mask is not None:
        s = jnp.where(mask, jnp.float32(1e-10), s)      # masked_fill(mask, 1e-10)
    p = jax.nn.softmax(s, axis=-1)
    o = jnp.einsum("bhqk,bhkd->bhqd", p, v)
    return o.transpose(0, 2, 1, 3).reshape(B, Sq, -1)


def decoder_layer_reference(trg, enc, trg_mask, src_mask, p, head_num, k_dim):
    def ln(h, g, b):
        mu = h.mean(-1, keepdims=True)
        var = ((h - mu) ** 2).mean(-1, keepdims=True)
        return (h - mu) / jnp.sqrt(var + 1e-5) * g + b

    a1 = _mha_reference(trg, trg, trg_mask, p["mha1"], head_num, k_dim)
    h1 = ln(trg + a1, p["ln1_g"], p["ln1_b"])
    a2 = _mha_reference(h1, enc, src_mask, p["mha2"], head_num, k_dim)
    h2 = ln(h1 + a2, p["ln2_g"], p["ln2_b"])
    ff = jnp.maximum(h2 @ p["fc1_w"] + p["fc1_b"], 0.0) @ p["fc2_w"] + p["fc2_b"]
    return ln(ff + h2, p["ln3_g"], p["ln3_b"])


# -----------------------------------------------------------------------------
if __name__ == "__main__":
    # config: d_model=128 (lane-dense output), head_num=4, k_dim=32, d_ff=256
    B, S_TRG, S_SRC = 4, 8, 8
    D_MODEL, HEAD_NUM, K_DIM, D_FF = 128, 4, 32, 256

    root = jax.random.PRNGKey(0)
    k_params, k_trg, k_enc = jax.random.split(root, 3)

    raw_params = init_decoder_params(k_params, D_MODEL, D_FF, HEAD_NUM, K_DIM)
    fused_params = fuse_decoder_params(raw_params, HEAD_NUM, K_DIM)   # bf16 weights

    trg = jax.random.normal(k_trg, (B, S_TRG, D_MODEL), jnp.float32)
    encoder_output = jax.random.normal(k_enc, (B, S_SRC, D_MODEL), jnp.float32)

    # masks: True / nonzero -> masked position (PyTorch masked_fill(mask, 1e-10))
    causal = jnp.arange(S_TRG)[None, :] > jnp.arange(S_TRG)[:, None]
    trg_mask = jnp.broadcast_to(causal[None, None], (B, 1, S_TRG, S_TRG))
    src_mask = jnp.zeros((B, 1, S_TRG, S_SRC), dtype=bool)            # no masking

    out = decoder_layer(trg, encoder_output, trg_mask, src_mask,
                        fused_params, HEAD_NUM, K_DIM)                # bf16 MXU ops
    out = jax.block_until_ready(out)

    with jax.default_matmul_precision("highest"):
        ref = decoder_layer_reference(trg, encoder_output, trg_mask, src_mask,
                                      raw_params, HEAD_NUM, K_DIM)

    assert out.shape == (B, S_TRG, D_MODEL)
    assert bool(jnp.all(jnp.isfinite(out)))
    # loose tolerance: kernel uses bf16 matmul operands + approx reciprocal vs. the
    # exact-f32 reference (errors are ~1e-2 on O(1) LayerNorm outputs).
    max_err = float(jnp.max(jnp.abs(out - ref)))
    assert max_err < 1.5e-1, f"max abs err {max_err}"
    print("KERNEL_OK")
</pallas_src>

<mosaic_0001>
module attributes {stable_mosaic.version = 11 : i64} {
  func.func @_decoder_layer_kernel(%arg0: i32, %arg1: memref<2x8x128xf32, #tpu.memory_space<vmem>>, %arg2: memref<2x8x128xf32, #tpu.memory_space<vmem>>, %arg3: memref<2x8x8xi8, #tpu.memory_space<vmem>>, %arg4: memref<2x8x8xi8, #tpu.memory_space<vmem>>, %arg5: memref<128x384xbf16, #tpu.memory_space<vmem>>, %arg6: memref<1x384xf32, #tpu.memory_space<vmem>>, %arg7: memref<1x128xf32, #tpu.memory_space<vmem>>, %arg8: memref<1x128xf32, #tpu.memory_space<vmem>>, %arg9: memref<128x128xbf16, #tpu.memory_space<vmem>>, %arg10: memref<1x128xf32, #tpu.memory_space<vmem>>, %arg11: memref<128x256xbf16, #tpu.memory_space<vmem>>, %arg12: memref<1x256xf32, #tpu.memory_space<vmem>>, %arg13: memref<1x128xf32, #tpu.memory_space<vmem>>, %arg14: memref<1x128xf32, #tpu.memory_space<vmem>>, %arg15: memref<128x256xbf16, #tpu.memory_space<vmem>>, %arg16: memref<1x256xf32, #tpu.memory_space<vmem>>, %arg17: memref<256x128xbf16, #tpu.memory_space<vmem>>, %arg18: memref<1x128xf32, #tpu.memory_space<vmem>>, %arg19: memref<1x128xf32, #tpu.memory_space<vmem>>, %arg20: memref<1x128xf32, #tpu.memory_space<vmem>>, %arg21: memref<2x8x128xf32, #tpu.memory_space<vmem>>, %arg22: memref<16x128xf32, #tpu.memory_space<vmem>>) attributes {dimension_semantics = [#tpu.dimension_semantics<parallel>], iteration_bounds = array<i64: 2>, scalar_prefetch = 0 : i64, scratch_operands = 1 : i64, tpu.core_type = #tpu.core_type<tc>, window_params = [{transform_indices = @transform_0, window_bounds = array<i64: 2, 8, 128>}, {transform_indices = @transform_1, window_bounds = array<i64: 2, 8, 128>}, {transform_indices = @transform_2, window_bounds = array<i64: 2, 8, 8>}, {transform_indices = @transform_3, window_bounds = array<i64: 2, 8, 8>}, {pipeline_mode = #tpu.pipeline_mode<synchronous>, transform_indices = @transform_4, window_bounds = array<i64: 128, 384>}, {pipeline_mode = #tpu.pipeline_mode<synchronous>, transform_indices = @transform_5, window_bounds = array<i64: 1, 384>}, {pipeline_mode = #tpu.pipeline_mode<synchronous>, transform_indices = @transform_6, window_bounds = array<i64: 1, 128>}, {pipeline_mode = #tpu.pipeline_mode<synchronous>, transform_indices = @transform_7, window_bounds = array<i64: 1, 128>}, {pipeline_mode = #tpu.pipeline_mode<synchronous>, transform_indices = @transform_8, window_bounds = array<i64: 128, 128>}, {pipeline_mode = #tpu.pipeline_mode<synchronous>, transform_indices = @transform_9, window_bounds = array<i64: 1, 128>}, {pipeline_mode = #tpu.pipeline_mode<synchronous>, transform_indices = @transform_10, window_bounds = array<i64: 128, 256>}, {pipeline_mode = #tpu.pipeline_mode<synchronous>, transform_indices = @transform_11, window_bounds = array<i64: 1, 256>}, {pipeline_mode = #tpu.pipeline_mode<synchronous>, transform_indices = @transform_12, window_bounds = array<i64: 1, 128>}, {pipeline_mode = #tpu.pipeline_mode<synchronous>, transform_indices = @transform_13, window_bounds = array<i64: 1, 128>}, {pipeline_mode = #tpu.pipeline_mode<synchronous>, transform_indices = @transform_14, window_bounds = array<i64: 128, 256>}, {pipeline_mode = #tpu.pipeline_mode<synchronous>, transform_indices = @transform_15, window_bounds = array<i64: 1, 256>}, {pipeline_mode = #tpu.pipeline_mode<synchronous>, transform_indices = @transform_16, window_bounds = array<i64: 256, 128>}, {pipeline_mode = #tpu.pipeline_mode<synchronous>, transform_indices = @transform_17, window_bounds = array<i64: 1, 128>}, {pipeline_mode = #tpu.pipeline_mode<synchronous>, transform_indices = @transform_18, window_bounds = array<i64: 1, 128>}, {pipeline_mode = #tpu.pipeline_mode<synchronous>, transform_indices = @transform_19, window_bounds = array<i64: 1, 128>}, {transform_indices = @transform_20, window_bounds = array<i64: 2, 8, 128>}]} {
    %c0 = arith.constant 0 : index
    %c0_0 = arith.constant 0 : index
    %c0_1 = arith.constant 0 : index
    %0 = vector.load %arg1[%c0, %c0_0, %c0_1] : memref<2x8x128xf32, #tpu.memory_space<vmem>>, vector<2x8x128xf32>
    %1 = vector.shape_cast %0 : vector<2x8x128xf32> to vector<16x128xf32>
    %c0_2 = arith.constant 0 : index
    %c0_3 = arith.constant 0 : index
    %c0_4 = arith.constant 0 : index
    %2 = vector.load %arg2[%c0_2, %c0_3, %c0_4] : memref<2x8x128xf32, #tpu.memory_space<vmem>>, vector<2x8x128xf32>
    %3 = vector.shape_cast %2 : vector<2x8x128xf32> to vector<16x128xf32>
    %c0_5 = arith.constant 0 : index
    %c0_6 = arith.constant 0 : index
    %c0_7 = arith.constant 0 : index
    %4 = vector.load %arg3[%c0_5, %c0_6, %c0_7] : memref<2x8x8xi8, #tpu.memory_space<vmem>>, vector<2x8x8xi8>
    %c0_8 = arith.constant 0 : index
    %c0_9 = arith.constant 0 : index
    %c0_10 = arith.constant 0 : index
    %5 = vector.load %arg4[%c0_8, %c0_9, %c0_10] : memref<2x8x8xi8, #tpu.memory_space<vmem>>, vector<2x8x8xi8>
    %c0_11 = arith.constant 0 : index
    %c0_12 = arith.constant 0 : index
    %6 = vector.load %arg5[%c0_11, %c0_12] : memref<128x384xbf16, #tpu.memory_space<vmem>>, vector<128x384xbf16>
    %7 = arith.truncf %1 : vector<16x128xf32> to vector<16x128xbf16>
    %cst = arith.constant dense<0.000000e+00> : vector<16x384xf32>
    %8 = tpu.matmul %7, %6, %cst {dimension_numbers = #tpu.dot_dimension_numbers<[1], [0], [0], [1], [0, 0, 1, 1], [], []>} : vector<16x128xbf16>, vector<128x384xbf16>, vector<16x384xf32> -> vector<16x384xf32>
    %c0_13 = arith.constant 0 : index
    %c0_14 = arith.constant 0 : index
    %9 = vector.load %arg6[%c0_13, %c0_14] : memref<1x384xf32, #tpu.memory_space<vmem>>, vector<1x384xf32>
    %10 = vector.broadcast %9 : vector<1x384xf32> to vector<16x384xf32>
    %11 = arith.addf %8, %10 : vector<16x384xf32>
    %12 = vector.extract_strided_slice %11 {offsets = [0, 0], sizes = [8, 128], strides = [1, 1]} : vector<16x384xf32> to vector<8x128xf32>
    %13 = vector.extract_strided_slice %11 {offsets = [0, 128], sizes = [8, 128], strides = [1, 1]} : vector<16x384xf32> to vector<8x128xf32>
    %14 = vector.extract_strided_slice %11 {offsets = [0, 256], sizes = [8, 128], strides = [1, 1]} : vector<16x384xf32> to vector<8x128xf32>
    %15 = vector.extract_strided_slice %4 {offsets = [0, 0, 0], sizes = [1, 8, 8], strides = [1, 1, 1]} : vector<2x8x8xi8> to vector<1x8x8xi8>
    %16 = vector.shape_cast %15 : vector<1x8x8xi8> to vector<8x8xi8>
    %c0_i8 = arith.constant 0 : i8
    %17 = vector.broadcast %c0_i8 : i8 to vector<8x8xi8>
    %18 = arith.cmpi ne, %16, %17 : vector<8x8xi8>
    %19 = vector.extract_strided_slice %12 {offsets = [0, 0], sizes = [8, 32], strides = [1, 1]} : vector<8x128xf32> to vector<8x32xf32>
    %20 = vector.extract_strided_slice %13 {offsets = [0, 0], sizes = [8, 32], strides = [1, 1]} : vector<8x128xf32> to vector<8x32xf32>
    %21 = vector.extract_strided_slice %14 {offsets = [0, 0], sizes = [8, 32], strides = [1, 1]} : vector<8x128xf32> to vector<8x32xf32>
    %22 = arith.truncf %19 : vector<8x32xf32> to vector<8x32xbf16>
    %23 = arith.truncf %20 : vector<8x32xf32> to vector<8x32xbf16>
    %cst_15 = arith.constant dense<0.000000e+00> : vector<8x8xf32>
    %24 = tpu.matmul %22, %23, %cst_15 {dimension_numbers = #tpu.dot_dimension_numbers<[1], [1], [0], [0], [0, 0, 1, 0], [], []>} : vector<8x32xbf16>, vector<8x32xbf16>, vector<8x8xf32> -> vector<8x8xf32>
    %cst_16 = arith.constant 1.000000e-10 : f32
    %25 = vector.broadcast %cst_16 : f32 to vector<8x8xf32>
    %26 = arith.select %18, %25, %24 : vector<8x8xi1>, vector<8x8xf32>
    %cst_17 = arith.constant dense<0xFF800000> : vector<8xf32>
    %27 = vector.multi_reduction <maximumf>, %26, %cst_17 [1] : vector<8x8xf32> to vector<8xf32>
    %28 = vector.shape_cast %27 : vector<8xf32> to vector<8x1xf32>
    %29 = vector.broadcast %28 : vector<8x1xf32> to vector<8x8xf32>
    %30 = arith.subf %26, %29 : vector<8x8xf32>
    %31 = math.exp %30 : vector<8x8xf32>
    %cst_18 = arith.constant dense<0.000000e+00> : vector<8xf32>
    %32 = vector.multi_reduction <add>, %31, %cst_18 [1] : vector<8x8xf32> to vector<8xf32>
    %33 = vector.shape_cast %32 : vector<8xf32> to vector<8x1xf32>
    %34 = tpu.reciprocal %33 {approx = true} : vector<8x1xf32> -> vector<8x1xf32>
    %35 = vector.broadcast %34 : vector<8x1xf32> to vector<8x8xf32>
    %36 = arith.mulf %31, %35 : vector<8x8xf32>
    %37 = arith.truncf %36 : vector<8x8xf32> to vector<8x8xbf16>
    %38 = arith.truncf %21 : vector<8x32xf32> to vector<8x32xbf16>
    %cst_19 = arith.constant dense<0.000000e+00> : vector<8x32xf32>
    %39 = tpu.matmul %37, %38, %cst_19 {dimension_numbers = #tpu.dot_dimension_numbers<[1], [0], [0], [1], [0, 0, 1, 1], [], []>} : vector<8x8xbf16>, vector<8x32xbf16>, vector<8x32xf32> -> vector<8x32xf32>
    %c0_20 = arith.constant 0 : index
    %c0_21 = arith.constant 0 : index
    %40 = vector.load %arg22[%c0_20, %c0_21] : memref<16x128xf32, #tpu.memory_space<vmem>>, vector<8x32xf32>
    tpu.vector_store %arg22[%c0_20, %c0_21], %39 {strides = array<i32>} : memref<16x128xf32, #tpu.memory_space<vmem>>, vector<8x32xf32>,
    %41 = vector.extract_strided_slice %12 {offsets = [0, 32], sizes = [8, 32], strides = [1, 1]} : vector<8x128xf32> to vector<8x32xf32>
    %42 = vector.extract_strided_slice %13 {offsets = [0, 32], sizes = [8, 32], strides = [1, 1]} : vector<8x128xf32> to vector<8x32xf32>
    %43 = vector.extract_strided_slice %14 {offsets = [0, 32], sizes = [8, 32], strides = [1, 1]} : vector<8x128xf32> to vector<8x32xf32>
    %44 = arith.truncf %41 : vector<8x32xf32> to vector<8x32xbf16>
    %45 = arith.truncf %42 : vector<8x32xf32> to vector<8x32xbf16>
    %cst_22 = arith.constant dense<0.000000e+00> : vector<8x8xf32>
    %46 = tpu.matmul %44, %45, %cst_22 {dimension_numbers = #tpu.dot_dimension_numbers<[1], [1], [0], [0], [0, 0, 1, 0], [], []>} : vector<8x32xbf16>, vector<8x32xbf16>, vector<8x8xf32> -> vector<8x8xf32>
    %cst_23 = arith.constant 1.000000e-10 : f32
    %47 = vector.broadcast %cst_23 : f32 to vector<8x8xf32>
    %48 = arith.select %18, %47, %46 : vector<8x8xi1>, vector<8x8xf32>
    %cst_24 = arith.constant dense<0xFF800000> : vector<8xf32>
    %49 = vector.multi_reduction <maximumf>, %48, %cst_24 [1] : vector<8x8xf32> to vector<8xf32>
    %50 = vector.shape_cast %49 : vector<8xf32> to vector<8x1xf32>
    %51 = vector.broadcast %50 : vector<8x1xf32> to vector<8x8xf32>
    %52 = arith.subf %48, %51 : vector<8x8xf32>
    %53 = math.exp %52 : vector<8x8xf32>
    %cst_25 = arith.constant dense<0.000000e+00> : vector<8xf32>
    %54 = vector.multi_reduction <add>, %53, %cst_25 [1] : vector<8x8xf32> to vector<8xf32>
    %55 = vector.shape_cast %54 : vector<8xf32> to vector<8x1xf32>
    %56 = tpu.reciprocal %55 {approx = true} : vector<8x1xf32> -> vector<8x1xf32>
    %57 = vector.broadcast %56 : vector<8x1xf32> to vector<8x8xf32>
    %58 = arith.mulf %53, %57 : vector<8x8xf32>
    %59 = arith.truncf %58 : vector<8x8xf32> to vector<8x8xbf16>
    %60 = arith.truncf %43 : vector<8x32xf32> to vector<8x32xbf16>
    %cst_26 = arith.constant dense<0.000000e+00> : vector<8x32xf32>
    %61 = tpu.matmul %59, %60, %cst_26 {dimension_numbers = #tpu.dot_dimension_numbers<[1], [0], [0], [1], [0, 0, 1, 1], [], []>} : vector<8x8xbf16>, vector<8x32xbf16>, vector<8x32xf32> -> vector<8x32xf32>
    %c0_27 = arith.constant 0 : index
    %c32 = arith.constant 32 : index
    %62 = vector.load %arg22[%c0_27, %c32] : memref<16x128xf32, #tpu.memory_space<vmem>>, vector<8x32xf32>
    tpu.vector_store %arg22[%c0_27, %c32], %61 {strides = array<i32>} : memref<16x128xf32, #tpu.memory_space<vmem>>, vector<8x32xf32>,
    %63 = vector.extract_strided_slice %12 {offsets = [0, 64], sizes = [8, 32], strides = [1, 1]} : vector<8x128xf32> to vector<8x32xf32>
    %64 = vector.extract_strided_slice %13 {offsets = [0, 64], sizes = [8, 32], strides = [1, 1]} : vector<8x128xf32> to vector<8x32xf32>
    %65 = vector.extract_strided_slice %14 {offsets = [0, 64], sizes = [8, 32], strides = [1, 1]} : vector<8x128xf32> to vector<8x32xf32>
    %66 = arith.truncf %63 : vector<8x32xf32> to vector<8x32xbf16>
    %67 = arith.truncf %64 : vector<8x32xf32> to vector<8x32xbf16>
    %cst_28 = arith.constant dense<0.000000e+00> : vector<8x8xf32>
    %68 = tpu.matmul %66, %67, %cst_28 {dimension_numbers = #tpu.dot_dimension_numbers<[1], [1], [0], [0], [0, 0, 1, 0], [], []>} : vector<8x32xbf16>, vector<8x32xbf16>, vector<8x8xf32> -> vector<8x8xf32>
    %cst_29 = arith.constant 1.000000e-10 : f32
    %69 = vector.broadcast %cst_29 : f32 to vector<8x8xf32>
    %70 = arith.select %18, %69, %68 : vector<8x8xi1>, vector<8x8xf32>
    %cst_30 = arith.constant dense<0xFF800000> : vector<8xf32>
    %71 = vector.multi_reduction <maximumf>, %70, %cst_30 [1] : vector<8x8xf32> to vector<8xf32>
    %72 = vector.shape_cast %71 : vector<8xf32> to vector<8x1xf32>
    %73 = vector.broadcast %72 : vector<8x1xf32> to vector<8x8xf32>
    %74 = arith.subf %70, %73 : vector<8x8xf32>
    %75 = math.exp %74 : vector<8x8xf32>
    %cst_31 = arith.constant dense<0.000000e+00> : vector<8xf32>
    %76 = vector.multi_reduction <add>, %75, %cst_31 [1] : vector<8x8xf32> to vector<8xf32>
    %77 = vector.shape_cast %76 : vector<8xf32> to vector<8x1xf32>
    %78 = tpu.reciprocal %77 {approx = true} : vector<8x1xf32> -> vector<8x1xf32>
    %79 = vector.broadcast %78 : vector<8x1xf32> to vector<8x8xf32>
    %80 = arith.mulf %75, %79 : vector<8x8xf32>
    %81 = arith.truncf %80 : vector<8x8xf32> to vector<8x8xbf16>
    %82 = arith.truncf %65 : vector<8x32xf32> to vector<8x32xbf16>
    %cst_32 = arith.constant dense<0.000000e+00> : vector<8x32xf32>
    %83 = tpu.matmul %81, %82, %cst_32 {dimension_numbers = #tpu.dot_dimension_numbers<[1], [0], [0], [1], [0, 0, 1, 1], [], []>} : vector<8x8xbf16>, vector<8x32xbf16>, vector<8x32xf32> -> vector<8x32xf32>
    %c0_33 = arith.constant 0 : index
    %c64 = arith.constant 64 : index
    %84 = vector.load %arg22[%c0_33, %c64] : memref<16x128xf32, #tpu.memory_space<vmem>>, vector<8x32xf32>
    tpu.vector_store %arg22[%c0_33, %c64], %83 {strides = array<i32>} : memref<16x128xf32, #tpu.memory_space<vmem>>, vector<8x32xf32>,
    %85 = vector.extract_strided_slice %12 {offsets = [0, 96], sizes = [8, 32], strides = [1, 1]} : vector<8x128xf32> to vector<8x32xf32>
    %86 = vector.extract_strided_slice %13 {offsets = [0, 96], sizes = [8, 32], strides = [1, 1]} : vector<8x128xf32> to vector<8x32xf32>
    %87 = vector.extract_strided_slice %14 {offsets = [0, 96], sizes = [8, 32], strides = [1, 1]} : vector<8x128xf32> to vector<8x32xf32>
    %88 = arith.truncf %85 : vector<8x32xf32> to vector<8x32xbf16>
    %89 = arith.truncf %86 : vector<8x32xf32> to vector<8x32xbf16>
    %cst_34 = arith.constant dense<0.000000e+00> : vector<8x8xf32>
    %90 = tpu.matmul %88, %89, %cst_34 {dimension_numbers = #tpu.dot_dimension_numbers<[1], [1], [0], [0], [0, 0, 1, 0], [], []>} : vector<8x32xbf16>, vector<8x32xbf16>, vector<8x8xf32> -> vector<8x8xf32>
    %cst_35 = arith.constant 1.000000e-10 : f32
    %91 = vector.broadcast %cst_35 : f32 to vector<8x8xf32>
    %92 = arith.select %18, %91, %90 : vector<8x8xi1>, vector<8x8xf32>
    %cst_36 = arith.constant dense<0xFF800000> : vector<8xf32>
    %93 = vector.multi_reduction <maximumf>, %92, %cst_36 [1] : vector<8x8xf32> to vector<8xf32>
    %94 = vector.shape_cast %93 : vector<8xf32> to vector<8x1xf32>
    %95 = vector.broadcast %94 : vector<8x1xf32> to vector<8x8xf32>
    %96 = arith.subf %92, %95 : vector<8x8xf32>
    %97 = math.exp %96 : vector<8x8xf32>
    %cst_37 = arith.constant dense<0.000000e+00> : vector<8xf32>
    %98 = vector.multi_reduction <add>, %97, %cst_37 [1] : vector<8x8xf32> to vector<8xf32>
    %99 = vector.shape_cast %98 : vector<8xf32> to vector<8x1xf32>
    %100 = tpu.reciprocal %99 {approx = true} : vector<8x1xf32> -> vector<8x1xf32>
    %101 = vector.broadcast %100 : vector<8x1xf32> to vector<8x8xf32>
    %102 = arith.mulf %97, %101 : vector<8x8xf32>
    %103 = arith.truncf %102 : vector<8x8xf32> to vector<8x8xbf16>
    %104 = arith.truncf %87 : vector<8x32xf32> to vector<8x32xbf16>
    %cst_38 = arith.constant dense<0.000000e+00> : vector<8x32xf32>
    %105 = tpu.matmul %103, %104, %cst_38 {dimension_numbers = #tpu.dot_dimension_numbers<[1], [0], [0], [1], [0, 0, 1, 1], [], []>} : vector<8x8xbf16>, vector<8x32xbf16>, vector<8x32xf32> -> vector<8x32xf32>
    %c0_39 = arith.constant 0 : index
    %c96 = arith.constant 96 : index
    %106 = vector.load %arg22[%c0_39, %c96] : memref<16x128xf32, #tpu.memory_space<vmem>>, vector<8x32xf32>
    tpu.vector_store %arg22[%c0_39, %c96], %105 {strides = array<i32>} : memref<16x128xf32, #tpu.memory_space<vmem>>, vector<8x32xf32>,
    %107 = vector.extract_strided_slice %11 {offsets = [8, 0], sizes = [8, 128], strides = [1, 1]} : vector<16x384xf32> to vector<8x128xf32>
    %108 = vector.extract_strided_slice %11 {offsets = [8, 128], sizes = [8, 128], strides = [1, 1]} : vector<16x384xf32> to vector<8x128xf32>
    %109 = vector.extract_strided_slice %11 {offsets = [8, 256], sizes = [8, 128], strides = [1, 1]} : vector<16x384xf32> to vector<8x128xf32>
    %110 = vector.extract_strided_slice %4 {offsets = [1, 0, 0], sizes = [1, 8, 8], strides = [1, 1, 1]} : vector<2x8x8xi8> to vector<1x8x8xi8>
    %111 = vector.shape_cast %110 : vector<1x8x8xi8> to vector<8x8xi8>
    %c0_i8_40 = arith.constant 0 : i8
    %112 = vector.broadcast %c0_i8_40 : i8 to vector<8x8xi8>
    %113 = arith.cmpi ne, %111, %112 : vector<8x8xi8>
    %114 = vector.extract_strided_slice %107 {offsets = [0, 0], sizes = [8, 32], strides = [1, 1]} : vector<8x128xf32> to vector<8x32xf32>
    %115 = vector.extract_strided_slice %108 {offsets = [0, 0], sizes = [8, 32], strides = [1, 1]} : vector<8x128xf32> to vector<8x32xf32>
    %116 = vector.extract_strided_slice %109 {offsets = [0, 0], sizes = [8, 32], strides = [1, 1]} : vector<8x128xf32> to vector<8x32xf32>
    %117 = arith.truncf %114 : vector<8x32xf32> to vector<8x32xbf16>
    %118 = arith.truncf %115 : vector<8x32xf32> to vector<8x32xbf16>
    %cst_41 = arith.constant dense<0.000000e+00> : vector<8x8xf32>
    %119 = tpu.matmul %117, %118, %cst_41 {dimension_numbers = #tpu.dot_dimension_numbers<[1], [1], [0], [0], [0, 0, 1, 0], [], []>} : vector<8x32xbf16>, vector<8x32xbf16>, vector<8x8xf32> -> vector<8x8xf32>
    %cst_42 = arith.constant 1.000000e-10 : f32
    %120 = vector.broadcast %cst_42 : f32 to vector<8x8xf32>
    %121 = arith.select %113, %120, %119 : vector<8x8xi1>, vector<8x8xf32>
    %cst_43 = arith.constant dense<0xFF800000> : vector<8xf32>
    %122 = vector.multi_reduction <maximumf>, %121, %cst_43 [1] : vector<8x8xf32> to vector<8xf32>
    %123 = vector.shape_cast %122 : vector<8xf32> to vector<8x1xf32>
    %124 = vector.broadcast %123 : vector<8x1xf32> to vector<8x8xf32>
    %125 = arith.subf %121, %124 : vector<8x8xf32>
    %126 = math.exp %125 : vector<8x8xf32>
    %cst_44 = arith.constant dense<0.000000e+00> : vector<8xf32>
    %127 = vector.multi_reduction <add>, %126, %cst_44 [1] : vector<8x8xf32> to vector<8xf32>
    %128 = vector.shape_cast %127 : vector<8xf32> to vector<8x1xf32>
    %129 = tpu.reciprocal %128 {approx = true} : vector<8x1xf32> -> vector<8x1xf32>
    %130 = vector.broadcast %129 : vector<8x1xf32> to vector<8x8xf32>
    %131 = arith.mulf %126, %130 : vector<8x8xf32>
    %132 = arith.truncf %131 : vector<8x8xf32> to vector<8x8xbf16>
    %133 = arith.truncf %116 : vector<8x32xf32> to vector<8x32xbf16>
    %cst_45 = arith.constant dense<0.000000e+00> : vector<8x32xf32>
    %134 = tpu.matmul %132, %133, %cst_45 {dimension_numbers = #tpu.dot_dimension_numbers<[1], [0], [0], [1], [0, 0, 1, 1], [], []>} : vector<8x8xbf16>, vector<8x32xbf16>, vector<8x32xf32> -> vector<8x32xf32>
    %c8 = arith.constant 8 : index
    %c0_46 = arith.constant 0 : index
    %135 = vector.load %arg22[%c8, %c0_46] : memref<16x128xf32, #tpu.memory_space<vmem>>, vector<8x32xf32>
    tpu.vector_store %arg22[%c8, %c0_46], %134 {strides = array<i32>} : memref<16x128xf32, #tpu.memory_space<vmem>>, vector<8x32xf32>,
    %136 = vector.extract_strided_slice %107 {offsets = [0, 32], sizes = [8, 32], strides = [1, 1]} : vector<8x128xf32> to vector<8x32xf32>
    %137 = vector.extract_strided_slice %108 {offsets = [0, 32], sizes = [8, 32], strides = [1, 1]} : vector<8x128xf32> to vector<8x32xf32>
    %138 = vector.extract_strided_slice %109 {offsets = [0, 32], sizes = [8, 32], strides = [1, 1]} : vector<8x128xf32> to vector<8x32xf32>
    %139 = arith.truncf %136 : vector<8x32xf32> to vector<8x32xbf16>
    %140 = arith.truncf %137 : vector<8x32xf32> to vector<8x32xbf16>
    %cst_47 = arith.constant dense<0.000000e+00> : vector<8x8xf32>
    %141 = tpu.matmul %139, %140, %cst_47 {dimension_numbers = #tpu.dot_dimension_numbers<[1], [1], [0], [0], [0, 0, 1, 0], [], []>} : vector<8x32xbf16>, vector<8x32xbf16>, vector<8x8xf32> -> vector<8x8xf32>
    %cst_48 = arith.constant 1.000000e-10 : f32
    %142 = vector.broadcast %cst_48 : f32 to vector<8x8xf32>
    %143 = arith.select %113, %142, %141 : vector<8x8xi1>, vector<8x8xf32>
    %cst_49 = arith.constant dense<0xFF800000> : vector<8xf32>
    %144 = vector.multi_reduction <maximumf>, %143, %cst_49 [1] : vector<8x8xf32> to vector<8xf32>
    %145 = vector.shape_cast %144 : vector<8xf32> to vector<8x1xf32>
    %146 = vector.broadcast %145 : vector<8x1xf32> to vector<8x8xf32>
    %147 = arith.subf %143, %146 : vector<8x8xf32>
    %148 = math.exp %147 : vector<8x8xf32>
    %cst_50 = arith.constant dense<0.000000e+00> : vector<8xf32>
    %149 = vector.multi_reduction <add>, %148, %cst_50 [1] : vector<8x8xf32> to vector<8xf32>
    %150 = vector.shape_cast %149 : vector<8xf32> to vector<8x1xf32>
    %151 = tpu.reciprocal %150 {approx = true} : vector<8x1xf32> -> vector<8x1xf32>
    %152 = vector.broadcast %151 : vector<8x1xf32> to vector<8x8xf32>
    %153 = arith.mulf %148, %152 : vector<8x8xf32>
    %154 = arith.truncf %153 : vector<8x8xf32> to vector<8x8xbf16>
    %155 = arith.truncf %138 : vector<8x32xf32> to vector<8x32xbf16>
    %cst_51 = arith.constant dense<0.000000e+00> : vector<8x32xf32>
    %156 = tpu.matmul %154, %155, %cst_51 {dimension_numbers = #tpu.dot_dimension_numbers<[1], [0], [0], [1], [0, 0, 1, 1], [], []>} : vector<8x8xbf16>, vector<8x32xbf16>, vector<8x32xf32> -> vector<8x32xf32>
    %c8_52 = arith.constant 8 : index
    %c32_53 = arith.constant 32 : index
    %157 = vector.load %arg22[%c8_52, %c32_53] : memref<16x128xf32, #tpu.memory_space<vmem>>, vector<8x32xf32>
    tpu.vector_store %arg22[%c8_52, %c32_53], %156 {strides = array<i32>} : memref<16x128xf32, #tpu.memory_space<vmem>>, vector<8x32xf32>,
    %158 = vector.extract_strided_slice %107 {offsets = [0, 64], sizes = [8, 32], strides = [1, 1]} : vector<8x128xf32> to vector<8x32xf32>
    %159 = vector.extract_strided_slice %108 {offsets = [0, 64], sizes = [8, 32], strides = [1, 1]} : vector<8x128xf32> to vector<8x32xf32>
    %160 = vector.extract_strided_slice %109 {offsets = [0, 64], sizes = [8, 32], strides = [1, 1]} : vector<8x128xf32> to vector<8x32xf32>
    %161 = arith.truncf %158 : vector<8x32xf32> to vector<8x32xbf16>
    %162 = arith.truncf %159 : vector<8x32xf32> to vector<8x32xbf16>
    %cst_54 = arith.constant dense<0.000000e+00> : vector<8x8xf32>
    %163 = tpu.matmul %161, %162, %cst_54 {dimension_numbers = #tpu.dot_dimension_numbers<[1], [1], [0], [0], [0, 0, 1, 0], [], []>} : vector<8x32xbf16>, vector<8x32xbf16>, vector<8x8xf32> -> vector<8x8xf32>
    %cst_55 = arith.constant 1.000000e-10 : f32
    %164 = vector.broadcast %cst_55 : f32 to vector<8x8xf32>
    %165 = arith.select %113, %164, %163 : vector<8x8xi1>, vector<8x8xf32>
    %cst_56 = arith.constant dense<0xFF800000> : vector<8xf32>
    %166 = vector.multi_reduction <maximumf>, %165, %cst_56 [1] : vector<8x8xf32> to vector<8xf32>
    %167 = vector.shape_cast %166 : vector<8xf32> to vector<8x1xf32>
    %168 = vector.broadcast %167 : vector<8x1xf32> to vector<8x8xf32>
    %169 = arith.subf %165, %168 : vector<8x8xf32>
    %170 = math.exp %169 : vector<8x8xf32>
    %cst_57 = arith.constant dense<0.000000e+00> : vector<8xf32>
    %171 = vector.multi_reduction <add>, %170, %cst_57 [1] : vector<8x8xf32> to vector<8xf32>
    %172 = vector.shape_cast %171 : vector<8xf32> to vector<8x1xf32>
    %173 = tpu.reciprocal %172 {approx = true} : vector<8x1xf32> -> vector<8x1xf32>
    %174 = vector.broadcast %173 : vector<8x1xf32> to vector<8x8xf32>
    %175 = arith.mulf %170, %174 : vector<8x8xf32>
    %176 = arith.truncf %175 : vector<8x8xf32> to vector<8x8xbf16>
    %177 = arith.truncf %160 : vector<8x32xf32> to vector<8x32xbf16>
    %cst_58 = arith.constant dense<0.000000e+00> : vector<8x32xf32>
    %178 = tpu.matmul %176, %177, %cst_58 {dimension_numbers = #tpu.dot_dimension_numbers<[1], [0], [0], [1], [0, 0, 1, 1], [], []>} : vector<8x8xbf16>, vector<8x32xbf16>, vector<8x32xf32> -> vector<8x32xf32>
    %c8_59 = arith.constant 8 : index
    %c64_60 = arith.constant 64 : index
    %179 = vector.load %arg22[%c8_59, %c64_60] : memref<16x128xf32, #tpu.memory_space<vmem>>, vector<8x32xf32>
    tpu.vector_store %arg22[%c8_59, %c64_60], %178 {strides = array<i32>} : memref<16x128xf32, #tpu.memory_space<vmem>>, vector<8x32xf32>,
    %180 = vector.extract_strided_slice %107 {offsets = [0, 96], sizes = [8, 32], strides = [1, 1]} : vector<8x128xf32> to vector<8x32xf32>
    %181 = vector.extract_strided_slice %108 {offsets = [0, 96], sizes = [8, 32], strides = [1, 1]} : vector<8x128xf32> to vector<8x32xf32>
    %182 = vector.extract_strided_slice %109 {offsets = [0, 96], sizes = [8, 32], strides = [1, 1]} : vector<8x128xf32> to vector<8x32xf32>
    %183 = arith.truncf %180 : vector<8x32xf32> to vector<8x32xbf16>
    %184 = arith.truncf %181 : vector<8x32xf32> to vector<8x32xbf16>
    %cst_61 = arith.constant dense<0.000000e+00> : vector<8x8xf32>
    %185 = tpu.matmul %183, %184, %cst_61 {dimension_numbers = #tpu.dot_dimension_numbers<[1], [1], [0], [0], [0, 0, 1, 0], [], []>} : vector<8x32xbf16>, vector<8x32xbf16>, vector<8x8xf32> -> vector<8x8xf32>
    %cst_62 = arith.constant 1.000000e-10 : f32
    %186 = vector.broadcast %cst_62 : f32 to vector<8x8xf32>
    %187 = arith.select %113, %186, %185 : vector<8x8xi1>, vector<8x8xf32>
    %cst_63 = arith.constant dense<0xFF800000> : vector<8xf32>
    %188 = vector.multi_reduction <maximumf>, %187, %cst_63 [1] : vector<8x8xf32> to vector<8xf32>
    %189 = vector.shape_cast %188 : vector<8xf32> to vector<8x1xf32>
    %190 = vector.broadcast %189 : vector<8x1xf32> to vector<8x8xf32>
    %191 = arith.subf %187, %190 : vector<8x8xf32>
    %192 = math.exp %191 : vector<8x8xf32>
    %cst_64 = arith.constant dense<0.000000e+00> : vector<8xf32>
    %193 = vector.multi_reduction <add>, %192, %cst_64 [1] : vector<8x8xf32> to vector<8xf32>
    %194 = vector.shape_cast %193 : vector<8xf32> to vector<8x1xf32>
    %195 = tpu.reciprocal %194 {approx = true} : vector<8x1xf32> -> vector<8x1xf32>
    %196 = vector.broadcast %195 : vector<8x1xf32> to vector<8x8xf32>
    %197 = arith.mulf %192, %196 : vector<8x8xf32>
    %198 = arith.truncf %197 : vector<8x8xf32> to vector<8x8xbf16>
    %199 = arith.truncf %182 : vector<8x32xf32> to vector<8x32xbf16>
    %cst_65 = arith.constant dense<0.000000e+00> : vector<8x32xf32>
    %200 = tpu.matmul %198, %199, %cst_65 {dimension_numbers = #tpu.dot_dimension_numbers<[1], [0], [0], [1], [0, 0, 1, 1], [], []>} : vector<8x8xbf16>, vector<8x32xbf16>, vector<8x32xf32> -> vector<8x32xf32>
    %c8_66 = arith.constant 8 : index
    %c96_67 = arith.constant 96 : index
    %201 = vector.load %arg22[%c8_66, %c96_67] : memref<16x128xf32, #tpu.memory_space<vmem>>, vector<8x32xf32>
    tpu.vector_store %arg22[%c8_66, %c96_67], %200 {strides = array<i32>} : memref<16x128xf32, #tpu.memory_space<vmem>>, vector<8x32xf32>,
    %c0_68 = arith.constant 0 : index
    %c0_69 = arith.constant 0 : index
    %202 = vector.load %arg22[%c0_68, %c0_69] : memref<16x128xf32, #tpu.memory_space<vmem>>, vector<16x128xf32>
    %203 = arith.addf %1, %202 : vector<16x128xf32>
    %cst_70 = arith.constant dense<0.000000e+00> : vector<16xf32>
    %204 = vector.multi_reduction <add>, %203, %cst_70 [1] : vector<16x128xf32> to vector<16xf32>
    %205 = vector.shape_cast %204 : vector<16xf32> to vector<16x1xf32>
    %cst_71 = arith.constant 1.280000e+02 : f32
    %206 = vector.broadcast %cst_71 : f32 to vector<16x1xf32>
    %207 = arith.divf %205, %206 : vector<16x1xf32>
    %208 = vector.broadcast %207 : vector<16x1xf32> to vector<16x128xf32>
    %209 = arith.subf %203, %208 : vector<16x128xf32>
    %210 = arith.mulf %209, %209 : vector<16x128xf32>
    %cst_72 = arith.constant dense<0.000000e+00> : vector<16xf32>
    %211 = vector.multi_reduction <add>, %210, %cst_72 [1] : vector<16x128xf32> to vector<16xf32>
    %212 = vector.shape_cast %211 : vector<16xf32> to vector<16x1xf32>
    %cst_73 = arith.constant 1.280000e+02 : f32
    %213 = vector.broadcast %cst_73 : f32 to vector<16x1xf32>
    %214 = arith.divf %212, %213 : vector<16x1xf32>
    %215 = vector.broadcast %207 : vector<16x1xf32> to vector<16x128xf32>
    %216 = arith.subf %203, %215 : vector<16x128xf32>
    %cst_74 = arith.constant 9.99999974E-6 : f32
    %217 = vector.broadcast %cst_74 : f32 to vector<16x1xf32>
    %218 = arith.addf %214, %217 : vector<16x1xf32>
    %219 = math.rsqrt %218 : vector<16x1xf32>
    %220 = vector.broadcast %219 : vector<16x1xf32> to vector<16x128xf32>
    %221 = arith.mulf %216, %220 : vector<16x128xf32>
    %c0_75 = arith.constant 0 : index
    %c0_76 = arith.constant 0 : index
    %222 = vector.load %arg7[%c0_75, %c0_76] : memref<1x128xf32, #tpu.memory_space<vmem>>, vector<1x128xf32>
    %223 = vector.broadcast %222 : vector<1x128xf32> to vector<16x128xf32>
    %224 = arith.mulf %221, %223 : vector<16x128xf32>
    %c0_77 = arith.constant 0 : index
    %c0_78 = arith.constant 0 : index
    %225 = vector.load %arg8[%c0_77, %c0_78] : memref<1x128xf32, #tpu.memory_space<vmem>>, vector<1x128xf32>
    %226 = vector.broadcast %225 : vector<1x128xf32> to vector<16x128xf32>
    %227 = arith.addf %224, %226 : vector<16x128xf32>
    %c0_79 = arith.constant 0 : index
    %c0_80 = arith.constant 0 : index
    %228 = vector.load %arg9[%c0_79, %c0_80] : memref<128x128xbf16, #tpu.memory_space<vmem>>, vector<128x128xbf16>
    %229 = arith.truncf %227 : vector<16x128xf32> to vector<16x128xbf16>
    %cst_81 = arith.constant dense<0.000000e+00> : vector<16x128xf32>
    %230 = tpu.matmul %229, %228, %cst_81 {dimension_numbers = #tpu.dot_dimension_numbers<[1], [0], [0], [1], [0, 0, 1, 1], [], []>} : vector<16x128xbf16>, vector<128x128xbf16>, vector<16x128xf32> -> vector<16x128xf32>
    %c0_82 = arith.constant 0 : index
    %c0_83 = arith.constant 0 : index
    %231 = vector.load %arg10[%c0_82, %c0_83] : memref<1x128xf32, #tpu.memory_space<vmem>>, vector<1x128xf32>
    %232 = vector.broadcast %231 : vector<1x128xf32> to vector<16x128xf32>
    %233 = arith.addf %230, %232 : vector<16x128xf32>
    %c0_84 = arith.constant 0 : index
    %c0_85 = arith.constant 0 : index
    %234 = vector.load %arg11[%c0_84, %c0_85] : memref<128x256xbf16, #tpu.memory_space<vmem>>, vector<128x256xbf16>
    %235 = arith.truncf %3 : vector<16x128xf32> to vector<16x128xbf16>
    %cst_86 = arith.constant dense<0.000000e+00> : vector<16x256xf32>
    %236 = tpu.matmul %235, %234, %cst_86 {dimension_numbers = #tpu.dot_dimension_numbers<[1], [0], [0], [1], [0, 0, 1, 1], [], []>} : vector<16x128xbf16>, vector<128x256xbf16>, vector<16x256xf32> -> vector<16x256xf32>
    %c0_87 = arith.constant 0 : index
    %c0_88 = arith.constant 0 : index
    %237 = vector.load %arg12[%c0_87, %c0_88] : memref<1x256xf32, #tpu.memory_space<vmem>>, vector<1x256xf32>
    %238 = vector.broadcast %237 : vector<1x256xf32> to vector<16x256xf32>
    %239 = arith.addf %236, %238 : vector<16x256xf32>
    %240 = vector.extract_strided_slice %233 {offsets = [0, 0], sizes = [8, 128], strides = [1, 1]} : vector<16x128xf32> to vector<8x128xf32>
    %241 = vector.extract_strided_slice %239 {offsets = [0, 0], sizes = [8, 128], strides = [1, 1]} : vector<16x256xf32> to vector<8x128xf32>
    %242 = vector.extract_strided_slice %239 {offsets = [0, 128], sizes = [8, 128], strides = [1, 1]} : vector<16x256xf32> to vector<8x128xf32>
    %243 = vector.extract_strided_slice %5 {offsets = [0, 0, 0], sizes = [1, 8, 8], strides = [1, 1, 1]} : vector<2x8x8xi8> to vector<1x8x8xi8>
    %244 = vector.shape_cast %243 : vector<1x8x8xi8> to vector<8x8xi8>
    %c0_i8_89 = arith.constant 0 : i8
    %245 = vector.broadcast %c0_i8_89 : i8 to vector<8x8xi8>
    %246 = arith.cmpi ne, %244, %245 : vector<8x8xi8>
    %247 = vector.extract_strided_slice %240 {offsets = [0, 0], sizes = [8, 32], strides = [1, 1]} : vector<8x128xf32> to vector<8x32xf32>
    %248 = vector.extract_strided_slice %241 {offsets = [0, 0], sizes = [8, 32], strides = [1, 1]} : vector<8x128xf32> to vector<8x32xf32>
    %249 = vector.extract_strided_slice %242 {offsets = [0, 0], sizes = [8, 32], strides = [1, 1]} : vector<8x128xf32> to vector<8x32xf32>
    %250 = arith.truncf %247 : vector<8x32xf32> to vector<8x32xbf16>
    %251 = arith.truncf %248 : vector<8x32xf32> to vector<8x32xbf16>
    %cst_90 = arith.constant dense<0.000000e+00> : vector<8x8xf32>
    %252 = tpu.matmul %250, %251, %cst_90 {dimension_numbers = #tpu.dot_dimension_numbers<[1], [1], [0], [0], [0, 0, 1, 0], [], []>} : vector<8x32xbf16>, vector<8x32xbf16>, vector<8x8xf32> -> vector<8x8xf32>
    %cst_91 = arith.constant 1.000000e-10 : f32
    %253 = vector.broadcast %cst_91 : f32 to vector<8x8xf32>
    %254 = arith.select %246, %253, %252 : vector<8x8xi1>, vector<8x8xf32>
    %cst_92 = arith.constant dense<0xFF800000> : vector<8xf32>
    %255 = vector.multi_reduction <maximumf>, %254, %cst_92 [1] : vector<8x8xf32> to vector<8xf32>
    %256 = vector.shape_cast %255 : vector<8xf32> to vector<8x1xf32>
    %257 = vector.broadcast %256 : vector<8x1xf32> to vector<8x8xf32>
    %258 = arith.subf %254, %257 : vector<8x8xf32>
    %259 = math.exp %258 : vector<8x8xf32>
    %cst_93 = arith.constant dense<0.000000e+00> : vector<8xf32>
    %260 = vector.multi_reduction <add>, %259, %cst_93 [1] : vector<8x8xf32> to vector<8xf32>
    %261 = vector.shape_cast %260 : vector<8xf32> to vector<8x1xf32>
    %262 = tpu.reciprocal %261 {approx = true} : vector<8x1xf32> -> vector<8x1xf32>
    %263 = vector.broadcast %262 : vector<8x1xf32> to vector<8x8xf32>
    %264 = arith.mulf %259, %263 : vector<8x8xf32>
    %265 = arith.truncf %264 : vector<8x8xf32> to vector<8x8xbf16>
    %266 = arith.truncf %249 : vector<8x32xf32> to vector<8x32xbf16>
    %cst_94 = arith.constant dense<0.000000e+00> : vector<8x32xf32>
    %267 = tpu.matmul %265, %266, %cst_94 {dimension_numbers = #tpu.dot_dimension_numbers<[1], [0], [0], [1], [0, 0, 1, 1], [], []>} : vector<8x8xbf16>, vector<8x32xbf16>, vector<8x32xf32> -> vector<8x32xf32>
    %c0_95 = arith.constant 0 : index
    %c0_96 = arith.constant 0 : index
    %268 = vector.load %arg22[%c0_95, %c0_96] : memref<16x128xf32, #tpu.memory_space<vmem>>, vector<8x32xf32>
    tpu.vector_store %arg22[%c0_95, %c0_96], %267 {strides = array<i32>} : memref<16x128xf32, #tpu.memory_space<vmem>>, vector<8x32xf32>,
    %269 = vector.extract_strided_slice %240 {offsets = [0, 32], sizes = [8, 32], strides = [1, 1]} : vector<8x128xf32> to vector<8x32xf32>
    %270 = vector.extract_strided_slice %241 {offsets = [0, 32], sizes = [8, 32], strides = [1, 1]} : vector<8x128xf32> to vector<8x32xf32>
    %271 = vector.extract_strided_slice %242 {offsets = [0, 32], sizes = [8, 32], strides = [1, 1]} : vector<8x128xf32> to vector<8x32xf32>
    %272 = arith.truncf %269 : vector<8x32xf32> to vector<8x32xbf16>
    %273 = arith.truncf %270 : vector<8x32xf32> to vector<8x32xbf16>
    %cst_97 = arith.constant dense<0.000000e+00> : vector<8x8xf32>
    %274 = tpu.matmul %272, %273, %cst_97 {dimension_numbers = #tpu.dot_dimension_numbers<[1], [1], [0], [0], [0, 0, 1, 0], [], []>} : vector<8x32xbf16>, vector<8x32xbf16>, vector<8x8xf32> -> vector<8x8xf32>
    %cst_98 = arith.constant 1.000000e-10 : f32
    %275 = vector.broadcast %cst_98 : f32 to vector<8x8xf32>
    %276 = arith.select %246, %275, %274 : vector<8x8xi1>, vector<8x8xf32>
    %cst_99 = arith.constant dense<0xFF800000> : vector<8xf32>
    %277 = vector.multi_reduction <maximumf>, %276, %cst_99 [1] : vector<8x8xf32> to vector<8xf32>
    %278 = vector.shape_cast %277 : vector<8xf32> to vector<8x1xf32>
    %279 = vector.broadcast %278 : vector<8x1xf32> to vector<8x8xf32>
    %280 = arith.subf %276, %279 : vector<8x8xf32>
    %281 = math.exp %280 : vector<8x8xf32>
    %cst_100 = arith.constant dense<0.000000e+00> : vector<8xf32>
    %282 = vector.multi_reduction <add>, %281, %cst_100 [1] : vector<8x8xf32> to vector<8xf32>
    %283 = vector.shape_cast %282 : vector<8xf32> to vector<8x1xf32>
    %284 = tpu.reciprocal %283 {approx = true} : vector<8x1xf32> -> vector<8x1xf32>
    %285 = vector.broadcast %284 : vector<8x1xf32> to vector<8x8xf32>
    %286 = arith.mulf %281, %285 : vector<8x8xf32>
    %287 = arith.truncf %286 : vector<8x8xf32> to vector<8x8xbf16>
    %288 = arith.truncf %271 : vector<8x32xf32> to vector<8x32xbf16>
    %cst_101 = arith.constant dense<0.000000e+00> : vector<8x32xf32>
    %289 = tpu.matmul %287, %288, %cst_101 {dimension_numbers = #tpu.dot_dimension_numbers<[1], [0], [0], [1], [0, 0, 1, 1], [], []>} : vector<8x8xbf16>, vector<8x32xbf16>, vector<8x32xf32> -> vector<8x32xf32>
    %c0_102 = arith.constant 0 : index
    %c32_103 = arith.constant 32 : index
    %290 = vector.load %arg22[%c0_102, %c32_103] : memref<16x128xf32, #tpu.memory_space<vmem>>, vector<8x32xf32>
    tpu.vector_store %arg22[%c0_102, %c32_103], %289 {strides = array<i32>} : memref<16x128xf32, #tpu.memory_space<vmem>>, vector<8x32xf32>,
    %291 = vector.extract_strided_slice %240 {offsets = [0, 64], sizes = [8, 32], strides = [1, 1]} : vector<8x128xf32> to vector<8x32xf32>
    %292 = vector.extract_strided_slice %241 {offsets = [0, 64], sizes = [8, 32], strides = [1, 1]} : vector<8x128xf32> to vector<8x32xf32>
    %293 = vector.extract_strided_slice %242 {offsets = [0, 64], sizes = [8, 32], strides = [1, 1]} : vector<8x128xf32> to vector<8x32xf32>
    %294 = arith.truncf %291 : vector<8x32xf32> to vector<8x32xbf16>
    %295 = arith.truncf %292 : vector<8x32xf32> to vector<8x32xbf16>
    %cst_104 = arith.constant dense<0.000000e+00> : vector<8x8xf32>
    %296 = tpu.matmul %294, %295, %cst_104 {dimension_numbers = #tpu.dot_dimension_numbers<[1], [1], [0], [0], [0, 0, 1, 0], [], []>} : vector<8x32xbf16>, vector<8x32xbf16>, vector<8x8xf32> -> vector<8x8xf32>
    %cst_105 = arith.constant 1.000000e-10 : f32
    %297 = vector.broadcast %cst_105 : f32 to vector<8x8xf32>
    %298 = arith.select %246, %297, %296 : vector<8x8xi1>, vector<8x8xf32>
    %cst_106 = arith.constant dense<0xFF800000> : vector<8xf32>
    %299 = vector.multi_reduction <maximumf>, %298, %cst_106 [1] : vector<8x8xf32> to vector<8xf32>
    %300 = vector.shape_cast %299 : vector<8xf32> to vector<8x1xf32>
    %301 = vector.broadcast %300 : vector<8x1xf32> to vector<8x8xf32>
    %302 = arith.subf %298, %301 : vector<8x8xf32>
    %303 = math.exp %302 : vector<8x8xf32>
    %cst_107 = arith.constant dense<0.000000e+00> : vector<8xf32>
    %304 = vector.multi_reduction <add>, %303, %cst_107 [1] : vector<8x8xf32> to vector<8xf32>
    %305 = vector.shape_cast %304 : vector<8xf32> to vector<8x1xf32>
    %306 = tpu.reciprocal %305 {approx = true} : vector<8x1xf32> -> vector<8x1xf32>
    %307 = vector.broadcast %306 : vector<8x1xf32> to vector<8x8xf32>
    %308 = arith.mulf %303, %307 : vector<8x8xf32>
    %309 = arith.truncf %308 : vector<8x8xf32> to vector<8x8xbf16>
    %310 = arith.truncf %293 : vector<8x32xf32> to vector<8x32xbf16>
    %cst_108 = arith.constant dense<0.000000e+00> : vector<8x32xf32>
    %311 = tpu.matmul %309, %310, %cst_108 {dimension_numbers = #tpu.dot_dimension_numbers<[1], [0], [0], [1], [0, 0, 1, 1], [], []>} : vector<8x8xbf16>, vector<8x32xbf16>, vector<8x32xf32> -> vector<8x32xf32>
    %c0_109 = arith.constant 0 : index
    %c64_110 = arith.constant 64 : index
    %312 = vector.load %arg22[%c0_109, %c64_110] : memref<16x128xf32, #tpu.memory_space<vmem>>, vector<8x32xf32>
    tpu.vector_store %arg22[%c0_109, %c64_110], %311 {strides = array<i32>} : memref<16x128xf32, #tpu.memory_space<vmem>>, vector<8x32xf32>,
    %313 = vector.extract_strided_slice %240 {offsets = [0, 96], sizes = [8, 32], strides = [1, 1]} : vector<8x128xf32> to vector<8x32xf32>
    %314 = vector.extract_strided_slice %241 {offsets = [0, 96], sizes = [8, 32], strides = [1, 1]} : vector<8x128xf32> to vector<8x32xf32>
    %315 = vector.extract_strided_slice %242 {offsets = [0, 96], sizes = [8, 32], strides = [1, 1]} : vector<8x128xf32> to vector<8x32xf32>
    %316 = arith.truncf %313 : vector<8x32xf32> to vector<8x32xbf16>
    %317 = arith.truncf %314 : vector<8x32xf32> to vector<8x32xbf16>
    %cst_111 = arith.constant dense<0.000000e+00> : vector<8x8xf32>
    %318 = tpu.matmul %316, %317, %cst_111 {dimension_numbers = #tpu.dot_dimension_numbers<[1], [1], [0], [0], [0, 0, 1, 0], [], []>} : vector<8x32xbf16>, vector<8x32xbf16>, vector<8x8xf32> -> vector<8x8xf32>
    %cst_112 = arith.constant 1.000000e-10 : f32
    %319 = vector.broadcast %cst_112 : f32 to vector<8x8xf32>
    %320 = arith.select %246, %319, %318 : vector<8x8xi1>, vector<8x8xf32>
    %cst_113 = arith.constant dense<0xFF800000> : vector<8xf32>
    %321 = vector.multi_reduction <maximumf>, %320, %cst_113 [1] : vector<8x8xf32> to vector<8xf32>
    %322 = vector.shape_cast %321 : vector<8xf32> to vector<8x1xf32>
    %323 = vector.broadcast %322 : vector<8x1xf32> to vector<8x8xf32>
    %324 = arith.subf %320, %323 : vector<8x8xf32>
    %325 = math.exp %324 : vector<8x8xf32>
    %cst_114 = arith.constant dense<0.000000e+00> : vector<8xf32>
    %326 = vector.multi_reduction <add>, %325, %cst_114 [1] : vector<8x8xf32> to vector<8xf32>
    %327 = vector.shape_cast %326 : vector<8xf32> to vector<8x1xf32>
    %328 = tpu.reciprocal %327 {approx = true} : vector<8x1xf32> -> vector<8x1xf32>
    %329 = vector.broadcast %328 : vector<8x1xf32> to vector<8x8xf32>
    %330 = arith.mulf %325, %329 : vector<8x8xf32>
    %331 = arith.truncf %330 : vector<8x8xf32> to vector<8x8xbf16>
    %332 = arith.truncf %315 : vector<8x32xf32> to vector<8x32xbf16>
    %cst_115 = arith.constant dense<0.000000e+00> : vector<8x32xf32>
    %333 = tpu.matmul %331, %332, %cst_115 {dimension_numbers = #tpu.dot_dimension_numbers<[1], [0], [0], [1], [0, 0, 1, 1], [], []>} : vector<8x8xbf16>, vector<8x32xbf16>, vector<8x32xf32> -> vector<8x32xf32>
    %c0_116 = arith.constant 0 : index
    %c96_117 = arith.constant 96 : index
    %334 = vector.load %arg22[%c0_116, %c96_117] : memref<16x128xf32, #tpu.memory_space<vmem>>, vector<8x32xf32>
    tpu.vector_store %arg22[%c0_116, %c96_117], %333 {strides = array<i32>} : memref<16x128xf32, #tpu.memory_space<vmem>>, vector<8x32xf32>,
    %335 = vector.extract_strided_slice %233 {offsets = [8, 0], sizes = [8, 128], strides = [1, 1]} : vector<16x128xf32> to vector<8x128xf32>
    %336 = vector.extract_strided_slice %239 {offsets = [8, 0], sizes = [8, 128], strides = [1, 1]} : vector<16x256xf32> to vector<8x128xf32>
    %337 = vector.extract_strided_slice %239 {offsets = [8, 128], sizes = [8, 128], strides = [1, 1]} : vector<16x256xf32> to vector<8x128xf32>
    %338 = vector.extract_strided_slice %5 {offsets = [1, 0, 0], sizes = [1, 8, 8], strides = [1, 1, 1]} : vector<2x8x8xi8> to vector<1x8x8xi8>
    %339 = vector.shape_cast %338 : vector<1x8x8xi8> to vector<8x8xi8>
    %c0_i8_118 = arith.constant 0 : i8
    %340 = vector.broadcast %c0_i8_118 : i8 to vector<8x8xi8>
    %341 = arith.cmpi ne, %339, %340 : vector<8x8xi8>
    %342 = vector.extract_strided_slice %335 {offsets = [0, 0], sizes = [8, 32], strides = [1, 1]} : vector<8x128xf32> to vector<8x32xf32>
    %343 = vector.extract_strided_slice %336 {offsets = [0, 0], sizes = [8, 32], strides = [1, 1]} : vector<8x128xf32> to vector<8x32xf32>
    %344 = vector.extract_strided_slice %337 {offsets = [0, 0], sizes = [8, 32], strides = [1, 1]} : vector<8x128xf32> to vector<8x32xf32>
    %345 = arith.truncf %342 : vector<8x32xf32> to vector<8x32xbf16>
    %346 = arith.truncf %343 : vector<8x32xf32> to vector<8x32xbf16>
    %cst_119 = arith.constant dense<0.000000e+00> : vector<8x8xf32>
    %347 = tpu.matmul %345, %346, %cst_119 {dimension_numbers = #tpu.dot_dimension_numbers<[1], [1], [0], [0], [0, 0, 1, 0], [], []>} : vector<8x32xbf16>, vector<8x32xbf16>, vector<8x8xf32> -> vector<8x8xf32>
    %cst_120 = arith.constant 1.000000e-10 : f32
    %348 = vector.broadcast %cst_120 : f32 to vector<8x8xf32>
    %349 = arith.select %341, %348, %347 : vector<8x8xi1>, vector<8x8xf32>
    %cst_121 = arith.constant dense<0xFF800000> : vector<8xf32>
    %350 = vector.multi_reduction <maximumf>, %349, %cst_121 [1] : vector<8x8xf32> to vector<8xf32>
    %351 = vector.shape_cast %350 : vector<8xf32> to vector<8x1xf32>
    %352 = vector.broadcast %351 : vector<8x1xf32> to vector<8x8xf32>
    %353 = arith.subf %349, %352 : vector<8x8xf32>
    %354 = math.exp %353 : vector<8x8xf32>
    %cst_122 = arith.constant dense<0.000000e+00> : vector<8xf32>
    %355 = vector.multi_reduction <add>, %354, %cst_122 [1] : vector<8x8xf32> to vector<8xf32>
    %356 = vector.shape_cast %355 : vector<8xf32> to vector<8x1xf32>
    %357 = tpu.reciprocal %356 {approx = true} : vector<8x1xf32> -> vector<8x1xf32>
    %358 = vector.broadcast %357 : vector<8x1xf32> to vector<8x8xf32>
    %359 = arith.mulf %354, %358 : vector<8x8xf32>
    %360 = arith.truncf %359 : vector<8x8xf32> to vector<8x8xbf16>
    %361 = arith.truncf %344 : vector<8x32xf32> to vector<8x32xbf16>
    %cst_123 = arith.constant dense<0.000000e+00> : vector<8x32xf32>
    %362 = tpu.matmul %360, %361, %cst_123 {dimension_numbers = #tpu.dot_dimension_numbers<[1], [0], [0], [1], [0, 0, 1, 1], [], []>} : vector<8x8xbf16>, vector<8x32xbf16>, vector<8x32xf32> -> vector<8x32xf32>
    %c8_124 = arith.constant 8 : index
    %c0_125 = arith.constant 0 : index
    %363 = vector.load %arg22[%c8_124, %c0_125] : memref<16x128xf32, #tpu.memory_space<vmem>>, vector<8x32xf32>
    tpu.vector_store %arg22[%c8_124, %c0_125], %362 {strides = array<i32>} : memref<16x128xf32, #tpu.memory_space<vmem>>, vector<8x32xf32>,
    %364 = vector.extract_strided_slice %335 {offsets = [0, 32], sizes = [8, 32], strides = [1, 1]} : vector<8x128xf32> to vector<8x32xf32>
    %365 = vector.extract_strided_slice %336 {offsets = [0, 32], sizes = [8, 32], strides = [1, 1]} : vector<8x128xf32> to vector<8x32xf32>
    %366 = vector.extract_strided_slice %337 {offsets = [0, 32], sizes = [8, 32], strides = [1, 1]} : vector<8x128xf32> to vector<8x32xf32>
    %367 = arith.truncf %364 : vector<8x32xf32> to vector<8x32xbf16>
    %368 = arith.truncf %365 : vector<8x32xf32> to vector<8x32xbf16>
    %cst_126 = arith.constant dense<0.000000e+00> : vector<8x8xf32>
    %369 = tpu.matmul %367, %368, %cst_126 {dimension_numbers = #tpu.dot_dimension_numbers<[1], [1], [0], [0], [0, 0, 1, 0], [], []>} : vector<8x32xbf16>, vector<8x32xbf16>, vector<8x8xf32> -> vector<8x8xf32>
    %cst_127 = arith.constant 1.000000e-10 : f32
    %370 = vector.broadcast %cst_127 : f32 to vector<8x8xf32>
    %371 = arith.select %341, %370, %369 : vector<8x8xi1>, vector<8x8xf32>
    %cst_128 = arith.constant dense<0xFF800000> : vector<8xf32>
    %372 = vector.multi_reduction <maximumf>, %371, %cst_128 [1] : vector<8x8xf32> to vector<8xf32>
    %373 = vector.shape_cast %372 : vector<8xf32> to vector<8x1xf32>
    %374 = vector.broadcast %373 : vector<8x1xf32> to vector<8x8xf32>
    %375 = arith.subf %371, %374 : vector<8x8xf32>
    %376 = math.exp %375 : vector<8x8xf32>
    %cst_129 = arith.constant dense<0.000000e+00> : vector<8xf32>
    %377 = vector.multi_reduction <add>, %376, %cst_129 [1] : vector<8x8xf32> to vector<8xf32>
    %378 = vector.shape_cast %377 : vector<8xf32> to vector<8x1xf32>
    %379 = tpu.reciprocal %378 {approx = true} : vector<8x1xf32> -> vector<8x1xf32>
    %380 = vector.broadcast %379 : vector<8x1xf32> to vector<8x8xf32>
    %381 = arith.mulf %376, %380 : vector<8x8xf32>
    %382 = arith.truncf %381 : vector<8x8xf32> to vector<8x8xbf16>
    %383 = arith.truncf %366 : vector<8x32xf32> to vector<8x32xbf16>
    %cst_130 = arith.constant dense<0.000000e+00> : vector<8x32xf32>
    %384 = tpu.matmul %382, %383, %cst_130 {dimension_numbers = #tpu.dot_dimension_numbers<[1], [0], [0], [1], [0, 0, 1, 1], [], []>} : vector<8x8xbf16>, vector<8x32xbf16>, vector<8x32xf32> -> vector<8x32xf32>
    %c8_131 = arith.constant 8 : index
    %c32_132 = arith.constant 32 : index
    %385 = vector.load %arg22[%c8_131, %c32_132] : memref<16x128xf32, #tpu.memory_space<vmem>>, vector<8x32xf32>
    tpu.vector_store %arg22[%c8_131, %c32_132], %384 {strides = array<i32>} : memref<16x128xf32, #tpu.memory_space<vmem>>, vector<8x32xf32>,
    %386 = vector.extract_strided_slice %335 {offsets = [0, 64], sizes = [8, 32], strides = [1, 1]} : vector<8x128xf32> to vector<8x32xf32>
    %387 = vector.extract_strided_slice %336 {offsets = [0, 64], sizes = [8, 32], strides = [1, 1]} : vector<8x128xf32> to vector<8x32xf32>
    %388 = vector.extract_strided_slice %337 {offsets = [0, 64], sizes = [8, 32], strides = [1, 1]} : vector<8x128xf32> to vector<8x32xf32>
    %389 = arith.truncf %386 : vector<8x32xf32> to vector<8x32xbf16>
    %390 = arith.truncf %387 : vector<8x32xf32> to vector<8x32xbf16>
    %cst_133 = arith.constant dense<0.000000e+00> : vector<8x8xf32>
    %391 = tpu.matmul %389, %390, %cst_133 {dimension_numbers = #tpu.dot_dimension_numbers<[1], [1], [0], [0], [0, 0, 1, 0], [], []>} : vector<8x32xbf16>, vector<8x32xbf16>, vector<8x8xf32> -> vector<8x8xf32>
    %cst_134 = arith.constant 1.000000e-10 : f32
    %392 = vector.broadcast %cst_134 : f32 to vector<8x8xf32>
    %393 = arith.select %341, %392, %391 : vector<8x8xi1>, vector<8x8xf32>
    %cst_135 = arith.constant dense<0xFF800000> : vector<8xf32>
    %394 = vector.multi_reduction <maximumf>, %393, %cst_135 [1] : vector<8x8xf32> to vector<8xf32>
    %395 = vector.shape_cast %394 : vector<8xf32> to vector<8x1xf32>
    %396 = vector.broadcast %395 : vector<8x1xf32> to vector<8x8xf32>
    %397 = arith.subf %393, %396 : vector<8x8xf32>
    %398 = math.exp %397 : vector<8x8xf32>
    %cst_136 = arith.constant dense<0.000000e+00> : vector<8xf32>
    %399 = vector.multi_reduction <add>, %398, %cst_136 [1] : vector<8x8xf32> to vector<8xf32>
    %400 = vector.shape_cast %399 : vector<8xf32> to vector<8x1xf32>
    %401 = tpu.reciprocal %400 {approx = true} : vector<8x1xf32> -> vector<8x1xf32>
    %402 = vector.broadcast %401 : vector<8x1xf32> to vector<8x8xf32>
    %403 = arith.mulf %398, %402 : vector<8x8xf32>
    %404 = arith.truncf %403 : vector<8x8xf32> to vector<8x8xbf16>
    %405 = arith.truncf %388 : vector<8x32xf32> to vector<8x32xbf16>
    %cst_137 = arith.constant dense<0.000000e+00> : vector<8x32xf32>
    %406 = tpu.matmul %404, %405, %cst_137 {dimension_numbers = #tpu.dot_dimension_numbers<[1], [0], [0], [1], [0, 0, 1, 1], [], []>} : vector<8x8xbf16>, vector<8x32xbf16>, vector<8x32xf32> -> vector<8x32xf32>
    %c8_138 = arith.constant 8 : index
    %c64_139 = arith.constant 64 : index
    %407 = vector.load %arg22[%c8_138, %c64_139] : memref<16x128xf32, #tpu.memory_space<vmem>>, vector<8x32xf32>
    tpu.vector_store %arg22[%c8_138, %c64_139], %406 {strides = array<i32>} : memref<16x128xf32, #tpu.memory_space<vmem>>, vector<8x32xf32>,
    %408 = vector.extract_strided_slice %335 {offsets = [0, 96], sizes = [8, 32], strides = [1, 1]} : vector<8x128xf32> to vector<8x32xf32>
    %409 = vector.extract_strided_slice %336 {offsets = [0, 96], sizes = [8, 32], strides = [1, 1]} : vector<8x128xf32> to vector<8x32xf32>
    %410 = vector.extract_strided_slice %337 {offsets = [0, 96], sizes = [8, 32], strides = [1, 1]} : vector<8x128xf32> to vector<8x32xf32>
    %411 = arith.truncf %408 : vector<8x32xf32> to vector<8x32xbf16>
    %412 = arith.truncf %409 : vector<8x32xf32> to vector<8x32xbf16>
    %cst_140 = arith.constant dense<0.000000e+00> : vector<8x8xf32>
    %413 = tpu.matmul %411, %412, %cst_140 {dimension_numbers = #tpu.dot_dimension_numbers<[1], [1], [0], [0], [0, 0, 1, 0], [], []>} : vector<8x32xbf16>, vector<8x32xbf16>, vector<8x8xf32> -> vector<8x8xf32>
    %cst_141 = arith.constant 1.000000e-10 : f32
    %414 = vector.broadcast %cst_141 : f32 to vector<8x8xf32>
    %415 = arith.select %341, %414, %413 : vector<8x8xi1>, vector<8x8xf32>
    %cst_142 = arith.constant dense<0xFF800000> : vector<8xf32>
    %416 = vector.multi_reduction <maximumf>, %415, %cst_142 [1] : vector<8x8xf32> to vector<8xf32>
    %417 = vector.shape_cast %416 : vector<8xf32> to vector<8x1xf32>
    %418 = vector.broadcast %417 : vector<8x1xf32> to vector<8x8xf32>
    %419 = arith.subf %415, %418 : vector<8x8xf32>
    %420 = math.exp %419 : vector<8x8xf32>
    %cst_143 = arith.constant dense<0.000000e+00> : vector<8xf32>
    %421 = vector.multi_reduction <add>, %420, %cst_143 [1] : vector<8x8xf32> to vector<8xf32>
    %422 = vector.shape_cast %421 : vector<8xf32> to vector<8x1xf32>
    %423 = tpu.reciprocal %422 {approx = true} : vector<8x1xf32> -> vector<8x1xf32>
    %424 = vector.broadcast %423 : vector<8x1xf32> to vector<8x8xf32>
    %425 = arith.mulf %420, %424 : vector<8x8xf32>
    %426 = arith.truncf %425 : vector<8x8xf32> to vector<8x8xbf16>
    %427 = arith.truncf %410 : vector<8x32xf32> to vector<8x32xbf16>
    %cst_144 = arith.constant dense<0.000000e+00> : vector<8x32xf32>
    %428 = tpu.matmul %426, %427, %cst_144 {dimension_numbers = #tpu.dot_dimension_numbers<[1], [0], [0], [1], [0, 0, 1, 1], [], []>} : vector<8x8xbf16>, vector<8x32xbf16>, vector<8x32xf32> -> vector<8x32xf32>
    %c8_145 = arith.constant 8 : index
    %c96_146 = arith.constant 96 : index
    %429 = vector.load %arg22[%c8_145, %c96_146] : memref<16x128xf32, #tpu.memory_space<vmem>>, vector<8x32xf32>
    tpu.vector_store %arg22[%c8_145, %c96_146], %428 {strides = array<i32>} : memref<16x128xf32, #tpu.memory_space<vmem>>, vector<8x32xf32>,
    %c0_147 = arith.constant 0 : index
    %c0_148 = arith.constant 0 : index
    %430 = vector.load %arg22[%c0_147, %c0_148] : memref<16x128xf32, #tpu.memory_space<vmem>>, vector<16x128xf32>
    %431 = arith.addf %227, %430 : vector<16x128xf32>
    %cst_149 = arith.constant dense<0.000000e+00> : vector<16xf32>
    %432 = vector.multi_reduction <add>, %431, %cst_149 [1] : vector<16x128xf32> to vector<16xf32>
    %433 = vector.shape_cast %432 : vector<16xf32> to vector<16x1xf32>
    %cst_150 = arith.constant 1.280000e+02 : f32
    %434 = vector.broadcast %cst_150 : f32 to vector<16x1xf32>
    %435 = arith.divf %433, %434 : vector<16x1xf32>
    %436 = vector.broadcast %435 : vector<16x1xf32> to vector<16x128xf32>
    %437 = arith.subf %431, %436 : vector<16x128xf32>
    %438 = arith.mulf %437, %437 : vector<16x128xf32>
    %cst_151 = arith.constant dense<0.000000e+00> : vector<16xf32>
    %439 = vector.multi_reduction <add>, %438, %cst_151 [1] : vector<16x128xf32> to vector<16xf32>
    %440 = vector.shape_cast %439 : vector<16xf32> to vector<16x1xf32>
    %cst_152 = arith.constant 1.280000e+02 : f32
    %441 = vector.broadcast %cst_152 : f32 to vector<16x1xf32>
    %442 = arith.divf %440, %441 : vector<16x1xf32>
    %443 = vector.broadcast %435 : vector<16x1xf32> to vector<16x128xf32>
    %444 = arith.subf %431, %443 : vector<16x128xf32>
    %cst_153 = arith.constant 9.99999974E-6 : f32
    %445 = vector.broadcast %cst_153 : f32 to vector<16x1xf32>
    %446 = arith.addf %442, %445 : vector<16x1xf32>
    %447 = math.rsqrt %446 : vector<16x1xf32>
    %448 = vector.broadcast %447 : vector<16x1xf32> to vector<16x128xf32>
    %449 = arith.mulf %444, %448 : vector<16x128xf32>
    %c0_154 = arith.constant 0 : index
    %c0_155 = arith.constant 0 : index
    %450 = vector.load %arg13[%c0_154, %c0_155] : memref<1x128xf32, #tpu.memory_space<vmem>>, vector<1x128xf32>
    %451 = vector.broadcast %450 : vector<1x128xf32> to vector<16x128xf32>
    %452 = arith.mulf %449, %451 : vector<16x128xf32>
    %c0_156 = arith.constant 0 : index
    %c0_157 = arith.constant 0 : index
    %453 = vector.load %arg14[%c0_156, %c0_157] : memref<1x128xf32, #tpu.memory_space<vmem>>, vector<1x128xf32>
    %454 = vector.broadcast %453 : vector<1x128xf32> to vector<16x128xf32>
    %455 = arith.addf %452, %454 : vector<16x128xf32>
    %c0_158 = arith.constant 0 : index
    %c0_159 = arith.constant 0 : index
    %456 = vector.load %arg15[%c0_158, %c0_159] : memref<128x256xbf16, #tpu.memory_space<vmem>>, vector<128x256xbf16>
    %457 = arith.truncf %455 : vector<16x128xf32> to vector<16x128xbf16>
    %cst_160 = arith.constant dense<0.000000e+00> : vector<16x256xf32>
    %458 = tpu.matmul %457, %456, %cst_160 {dimension_numbers = #tpu.dot_dimension_numbers<[1], [0], [0], [1], [0, 0, 1, 1], [], []>} : vector<16x128xbf16>, vector<128x256xbf16>, vector<16x256xf32> -> vector<16x256xf32>
    %c0_161 = arith.constant 0 : index
    %c0_162 = arith.constant 0 : index
    %459 = vector.load %arg16[%c0_161, %c0_162] : memref<1x256xf32, #tpu.memory_space<vmem>>, vector<1x256xf32>
    %460 = vector.broadcast %459 : vector<1x256xf32> to vector<16x256xf32>
    %461 = arith.addf %458, %460 : vector<16x256xf32>
    %cst_163 = arith.constant 0.000000e+00 : f32
    %462 = vector.broadcast %cst_163 : f32 to vector<16x256xf32>
    %463 = arith.maximumf %461, %462 : vector<16x256xf32>
    %c0_164 = arith.constant 0 : index
    %c0_165 = arith.constant 0 : index
    %464 = vector.load %arg17[%c0_164, %c0_165] : memref<256x128xbf16, #tpu.memory_space<vmem>>, vector<256x128xbf16>
    %465 = arith.truncf %463 : vector<16x256xf32> to vector<16x256xbf16>
    %cst_166 = arith.constant dense<0.000000e+00> : vector<16x128xf32>
    %466 = tpu.matmul %465, %464, %cst_166 {dimension_numbers = #tpu.dot_dimension_numbers<[1], [0], [0], [1], [0, 0, 1, 1], [], []>} : vector<16x256xbf16>, vector<256x128xbf16>, vector<16x128xf32> -> vector<16x128xf32>
    %c0_167 = arith.constant 0 : index
    %c0_168 = arith.constant 0 : index
    %467 = vector.load %arg18[%c0_167, %c0_168] : memref<1x128xf32, #tpu.memory_space<vmem>>, vector<1x128xf32>
    %468 = vector.broadcast %467 : vector<1x128xf32> to vector<16x128xf32>
    %469 = arith.addf %466, %468 : vector<16x128xf32>
    %470 = arith.addf %469, %455 : vector<16x128xf32>
    %cst_169 = arith.constant dense<0.000000e+00> : vector<16xf32>
    %471 = vector.multi_reduction <add>, %470, %cst_169 [1] : vector<16x128xf32> to vector<16xf32>
    %472 = vector.shape_cast %471 : vector<16xf32> to vector<16x1xf32>
    %cst_170 = arith.constant 1.280000e+02 : f32
    %473 = vector.broadcast %cst_170 : f32 to vector<16x1xf32>
    %474 = arith.divf %472, %473 : vector<16x1xf32>
    %475 = vector.broadcast %474 : vector<16x1xf32> to vector<16x128xf32>
    %476 = arith.subf %470, %475 : vector<16x128xf32>
    %477 = arith.mulf %476, %476 : vector<16x128xf32>
    %cst_171 = arith.constant dense<0.000000e+00> : vector<16xf32>
    %478 = vector.multi_reduction <add>, %477, %cst_171 [1] : vector<16x128xf32> to vector<16xf32>
    %479 = vector.shape_cast %478 : vector<16xf32> to vector<16x1xf32>
    %cst_172 = arith.constant 1.280000e+02 : f32
    %480 = vector.broadcast %cst_172 : f32 to vector<16x1xf32>
    %481 = arith.divf %479, %480 : vector<16x1xf32>
    %482 = vector.broadcast %474 : vector<16x1xf32> to vector<16x128xf32>
    %483 = arith.subf %470, %482 : vector<16x128xf32>
    %cst_173 = arith.constant 9.99999974E-6 : f32
    %484 = vector.broadcast %cst_173 : f32 to vector<16x1xf32>
    %485 = arith.addf %481, %484 : vector<16x1xf32>
    %486 = math.rsqrt %485 : vector<16x1xf32>
    %487 = vector.broadcast %486 : vector<16x1xf32> to vector<16x128xf32>
    %488 = arith.mulf %483, %487 : vector<16x128xf32>
    %c0_174 = arith.constant 0 : index
    %c0_175 = arith.constant 0 : index
    %489 = vector.load %arg19[%c0_174, %c0_175] : memref<1x128xf32, #tpu.memory_space<vmem>>, vector<1x128xf32>
    %490 = vector.broadcast %489 : vector<1x128xf32> to vector<16x128xf32>
    %491 = arith.mulf %488, %490 : vector<16x128xf32>
    %c0_176 = arith.constant 0 : index
    %c0_177 = arith.constant 0 : index
    %492 = vector.load %arg20[%c0_176, %c0_177] : memref<1x128xf32, #tpu.memory_space<vmem>>, vector<1x128xf32>
    %493 = vector.broadcast %492 : vector<1x128xf32> to vector<16x128xf32>
    %494 = arith.addf %491, %493 : vector<16x128xf32>
    %495 = vector.shape_cast %494 : vector<16x128xf32> to vector<2x8x128xf32>
    %c0_178 = arith.constant 0 : index
    %c0_179 = arith.constant 0 : index
    %c0_180 = arith.constant 0 : index
    %496 = vector.load %arg21[%c0_178, %c0_179, %c0_180] : memref<2x8x128xf32, #tpu.memory_space<vmem>>, vector<2x8x128xf32>
    tpu.vector_store %arg21[%c0_178, %c0_179, %c0_180], %495 {strides = array<i32>} : memref<2x8x128xf32, #tpu.memory_space<vmem>>, vector<2x8x128xf32>,
    return
  }
  func.func @transform_0(%arg0: i32) -> (i32, i32, i32) {
    %c0_i32 = arith.constant 0 : i32
    %c0_i32_0 = arith.constant 0 : i32
    %c0_i32_1 = arith.constant 0 : i32
    return %arg0, %c0_i32, %c0_i32_0 : i32, i32, i32
  }
  func.func @transform_1(%arg0: i32) -> (i32, i32, i32) {
    %c0_i32 = arith.constant 0 : i32
    %c0_i32_0 = arith.constant 0 : i32
    %c0_i32_1 = arith.constant 0 : i32
    return %arg0, %c0_i32, %c0_i32_0 : i32, i32, i32
  }
  func.func @transform_2(%arg0: i32) -> (i32, i32, i32) {
    %c0_i32 = arith.constant 0 : i32
    %c0_i32_0 = arith.constant 0 : i32
    %c0_i32_1 = arith.constant 0 : i32
    return %arg0, %c0_i32, %c0_i32_0 : i32, i32, i32
  }
  func.func @transform_3(%arg0: i32) -> (i32, i32, i32) {
    %c0_i32 = arith.constant 0 : i32
    %c0_i32_0 = arith.constant 0 : i32
    %c0_i32_1 = arith.constant 0 : i32
    return %arg0, %c0_i32, %c0_i32_0 : i32, i32, i32
  }
  func.func @transform_4(%arg0: i32) -> (i32, i32) {
    %c0_i32 = arith.constant 0 : i32
    %c0_i32_0 = arith.constant 0 : i32
    %c0_i32_1 = arith.constant 0 : i32
    return %c0_i32, %c0_i32_0 : i32, i32
  }
  func.func @transform_5(%arg0: i32) -> (i32, i32) {
    %c0_i32 = arith.constant 0 : i32
    %c0_i32_0 = arith.constant 0 : i32
    %c0_i32_1 = arith.constant 0 : i32
    return %c0_i32, %c0_i32_0 : i32, i32
  }
  func.func @transform_6(%arg0: i32) -> (i32, i32) {
    %c0_i32 = arith.constant 0 : i32
    %c0_i32_0 = arith.constant 0 : i32
    %c0_i32_1 = arith.constant 0 : i32
    return %c0_i32, %c0_i32_0 : i32, i32
  }
  func.func @transform_7(%arg0: i32) -> (i32, i32) {
    %c0_i32 = arith.constant 0 : i32
    %c0_i32_0 = arith.constant 0 : i32
    %c0_i32_1 = arith.constant 0 : i32
    return %c0_i32, %c0_i32_0 : i32, i32
  }
  func.func @transform_8(%arg0: i32) -> (i32, i32) {
    %c0_i32 = arith.constant 0 : i32
    %c0_i32_0 = arith.constant 0 : i32
    %c0_i32_1 = arith.constant 0 : i32
    return %c0_i32, %c0_i32_0 : i32, i32
  }
  func.func @transform_9(%arg0: i32) -> (i32, i32) {
    %c0_i32 = arith.constant 0 : i32
    %c0_i32_0 = arith.constant 0 : i32
    %c0_i32_1 = arith.constant 0 : i32
    return %c0_i32, %c0_i32_0 : i32, i32
  }
  func.func @transform_10(%arg0: i32) -> (i32, i32) {
    %c0_i32 = arith.constant 0 : i32
    %c0_i32_0 = arith.constant 0 : i32
    %c0_i32_1 = arith.constant 0 : i32
    return %c0_i32, %c0_i32_0 : i32, i32
  }
  func.func @transform_11(%arg0: i32) -> (i32, i32) {
    %c0_i32 = arith.constant 0 : i32
    %c0_i32_0 = arith.constant 0 : i32
    %c0_i32_1 = arith.constant 0 : i32
    return %c0_i32, %c0_i32_0 : i32, i32
  }
  func.func @transform_12(%arg0: i32) -> (i32, i32) {
    %c0_i32 = arith.constant 0 : i32
    %c0_i32_0 = arith.constant 0 : i32
    %c0_i32_1 = arith.constant 0 : i32
    return %c0_i32, %c0_i32_0 : i32, i32
  }
  func.func @transform_13(%arg0: i32) -> (i32, i32) {
    %c0_i32 = arith.constant 0 : i32
    %c0_i32_0 = arith.constant 0 : i32
    %c0_i32_1 = arith.constant 0 : i32
    return %c0_i32, %c0_i32_0 : i32, i32
  }
  func.func @transform_14(%arg0: i32) -> (i32, i32) {
    %c0_i32 = arith.constant 0 : i32
    %c0_i32_0 = arith.constant 0 : i32
    %c0_i32_1 = arith.constant 0 : i32
    return %c0_i32, %c0_i32_0 : i32, i32
  }
  func.func @transform_15(%arg0: i32) -> (i32, i32) {
    %c0_i32 = arith.constant 0 : i32
    %c0_i32_0 = arith.constant 0 : i32
    %c0_i32_1 = arith.constant 0 : i32
    return %c0_i32, %c0_i32_0 : i32, i32
  }
  func.func @transform_16(%arg0: i32) -> (i32, i32) {
    %c0_i32 = arith.constant 0 : i32
    %c0_i32_0 = arith.constant 0 : i32
    %c0_i32_1 = arith.constant 0 : i32
    return %c0_i32, %c0_i32_0 : i32, i32
  }
  func.func @transform_17(%arg0: i32) -> (i32, i32) {
    %c0_i32 = arith.constant 0 : i32
    %c0_i32_0 = arith.constant 0 : i32
    %c0_i32_1 = arith.constant 0 : i32
    return %c0_i32, %c0_i32_0 : i32, i32
  }
  func.func @transform_18(%arg0: i32) -> (i32, i32) {
    %c0_i32 = arith.constant 0 : i32
    %c0_i32_0 = arith.constant 0 : i32
    %c0_i32_1 = arith.constant 0 : i32
    return %c0_i32, %c0_i32_0 : i32, i32
  }
  func.func @transform_19(%arg0: i32) -> (i32, i32) {
    %c0_i32 = arith.constant 0 : i32
    %c0_i32_0 = arith.constant 0 : i32
    %c0_i32_1 = arith.constant 0 : i32
    return %c0_i32, %c0_i32_0 : i32, i32
  }
  func.func @transform_20(%arg0: i32) -> (i32, i32, i32) {
    %c0_i32 = arith.constant 0 : i32
    %c0_i32_0 = arith.constant 0 : i32
    %c0_i32_1 = arith.constant 0 : i32
    return %arg0, %c0_i32, %c0_i32_0 : i32, i32, i32
  }
}

</mosaic_0001>

<bundles_post_ra>
// kernel: tpu_custom_call.1
= control target key start
LH: loop header
LB: loop body
LE: loop exit
PB: predicated region body
PF: predicated region fallthrough
CT: control target
= control target key end

     0   :  { %s6071_s0 = inlined_call_operand.hbm [shape: f32[4,8,128], index: 0, kind: input, shape index: {}]   ;;  %s6072_s1 = inlined_call_operand.hbm [shape: f32[4,8,128], index: 1, kind: input, shape index: {}]   ;;  %s6073_s2 = inlined_call_operand.hbm [shape: s8[4,8,8], index: 2, kind: input, shape index: {}]   ;;  %s6074_s3 = inlined_call_operand.hbm [shape: s8[4,8,8], index: 3, kind: input, shape index: {}]   ;;  %s6075_s4 = inlined_call_operand.hbm [shape: bf16[128,384], index: 4, kind: input, shape index: {}]   ;;  %s6076_s5 = inlined_call_operand.vmem [shape: f32[1,384], index: 5, kind: input, shape index: {}]   ;;  %s6077_s6 = inlined_call_operand.vmem [shape: f32[1,128], index: 6, kind: input, shape index: {}]   ;;  %s6078_s7 = inlined_call_operand.vmem [shape: f32[1,128], index: 7, kind: input, shape index: {}]   ;;  %s6079_s8 = inlined_call_operand.hbm [shape: bf16[128,128], index: 8, kind: input, shape index: {}]   ;;  %s6080_s9 = inlined_call_operand.vmem [shape: f32[1,128], index: 9, kind: input, shape index: {}]   ;;  %s6081_s10 = inlined_call_operand.hbm [shape: bf16[128,256], index: 10, kind: input, shape index: {}]   ;;  %s6082_s11 = inlined_call_operand.vmem [shape: f32[1,256], index: 11, kind: input, shape index: {}]   ;;  %s6083_s12 = inlined_call_operand.vmem [shape: f32[1,128], index: 12, kind: input, shape index: {}]   ;;  %s6084_s13 = inlined_call_operand.vmem [shape: f32[1,128], index: 13, kind: input, shape index: {}]   ;;  %s6085_s14 = inlined_call_operand.hbm [shape: bf16[128,256], index: 14, kind: input, shape index: {}]   ;;  %s6086_s15 = inlined_call_operand.vmem [shape: f32[1,256], index: 15, kind: input, shape index: {}]   ;;  %s6087_s16 = inlined_call_operand.hbm [shape: bf16[256,128], index: 16, kind: input, shape index: {}]   ;;  %s6088_s17 = inlined_call_operand.vmem [shape: f32[1,128], index: 17, kind: input, shape index: {}]   ;;  %s6089_s18 = inlined_call_operand.vmem [shape: f32[1,128], index: 18, kind: input, shape index: {}]   ;;  %s6090_s19 = inlined_call_operand.vmem [shape: f32[1,128], index: 19, kind: input, shape index: {}]   ;;  %s6091_s20 = inlined_call_operand.hbm [shape: f32[4,8,128], index: 20, kind: output, shape index: {}]  }
   0x1   :  { %6122 = sst [smem:[#allocation32_spill]] %s6071_s0 }
   0x2   :  { %6123 = sst [smem:[#allocation33_spill]] %s6072_s1 }
   0x3   :  { %6124 = sst [smem:[#allocation34_spill]] %s6073_s2 }
   0x4   :  { %6125 = sst [smem:[#allocation35_spill]] %s6074_s3 }
   0x5   :  { %6126 = sst [smem:[#allocation36_spill]] %s6075_s4 }
   0x6   :  { %6127 = sst [smem:[#allocation37_spill]] %s6079_s8 }
   0x7   :  { %6128 = sst [smem:[#allocation38_spill]] %s6081_s10 }
   0x8   :  { %6129 = sst [smem:[#allocation39_spill]] %s6083_s12 }
   0x9   :  { %6130 = sst [smem:[#allocation40_spill]] %s6084_s13 }
   0xa   :  { %6131 = sst [smem:[#allocation41_spill]] %s6085_s14 }
   0xb   :  { %6132 = sst [smem:[#allocation42_spill]] %s6086_s15 }
   0xc   :  { %6133 = sst [smem:[#allocation43_spill]] %s6087_s16 }
   0xd   :  { %6134 = sst [smem:[#allocation44_spill]] %s6088_s17 }
   0xe   :  { %6135 = sst [smem:[#allocation45_spill]] %s6089_s18 }
   0xf   :  { %6136 = sst [smem:[#allocation46_spill]] %s6090_s19 }
  0x10   :  { %6137 = sst [smem:[#allocation47_spill]] %s6091_s20 }
  0x11   :  { %25 = vsyncpa [#allocation4], 0 }
  0x12   :  { %27 = vsyncpa [#allocation4 + $0x1], 0 }
  0x13   :  { %28 = vsyncpa [#allocation7], 0 }
  0x14   :  { %30 = vsyncpa [#allocation7 + $0x1], 0 }
  0x15   :  { %31 = vsyncpa [#allocation10], 0 }
  0x16   :  { %33 = vsyncpa [#allocation10 + $0x1], 0 }
  0x17   :  { %34 = vsyncpa [#allocation13], 0 }
  0x18   :  { %35 = vsyncpa [#allocation16], 0 }
  0x19   :  { %36 = vsyncpa [#allocation5], 0 }
  0x1a   :  { %38 = vsyncpa [#allocation5 + $0x1], 0  ;;  %s5173_s1 = smov 0   ;;  %s5175_s22 = smov 0  }
  0x1b   :  { %s5177_s23 = smov 0   ;;  %s5179_s24 = smov 0  }
  0x1c LB: > { %6138 = sst [smem:[#allocation26_spill]] %s5028_s1  ;;  %s5042_s2 = smov [#allocation11]   ;;  %s5040_s24 = sphi %s5179_s24, %s6199_s24   ;;  %s5036_s23 = sphi %s5177_s23, %s6201_s23   ;;  %s5032_s22 = sphi %s5175_s22, %s6203_s22   ;;  %s5028_s1 = sphi %s5173_s1, %s6202_s1  }
  0x1d   : > { %6139 = sst [smem:[#allocation27_spill]] %s5036_s23  ;;  %s527_s25 = sshll.u32 %s5042_s2, 4  ;;  %s528_s25 = int_to_ptr.vmem [resolvable:$true] %s527_s25 }
  0x1e   : > { %s5194_s3 = sadd.s32 4294967295, %s5040_s24   ;;  %p3910_p0 = scmp.ge.s32.totalorder %s5040_s24, 1 }
  0x1f   : > { %p6112_p1 = scmp.eq.s32.totalorder %s5194_s3, 0  ;;  %p502_p2 = scmp.eq.s32.totalorder %s5194_s3, 1 }
  0x20   : > { %p515_p3 = scmp.lt.s32.totalorder %s5040_s24, 3  ;;  %s5043_s27 = smov [#allocation12]  }
  0x21   : > { %s549_s28 = sshll.u32 %s5043_s27, 4  ;;  %s4725_s30 = scalar_lea.vmem %s528_s25, 3072  ;;  %s5207_s28 = int_to_ptr.vmem [resolvable:$true] %s549_s28 }
  0x22   : > { %p5200_p4 = pnand %p3910_p0, %p515_p3  ;;  %p4726_p9 = scmp.ne.s32.totalorder %s528_s25, %s4725_s30 }
  0x23   : > { %p4733_p12 = scmp.lt.s32.totalorder %s528_s25, %s528_s25  ;;  %p4734_p13 = scmp.lt.s32.totalorder %s4725_s30, %s4725_s30 }
  0x24   : > { %s6140_s26 = scalar_select %p5200_p4, 1, 0 }
  0x25   : > { %p4436_p6 = pneg %p5200_p4  ;;  %p4735_p0 = por %p4734_p13, %p4733_p12 }
  0x27   : > { %p5211_p7 = pnand %p4436_p6, %p6112_p1 }
  0x29   : > { %s6141_s4 = scalar_select %p5211_p7, 1, 0 }
  0x2a   : > { %p5217_p8 = pneg %p5211_p7 }
  0x2c   : > { %s6142_s29 = scalar_select %p5217_p8, 1, 0 }
  0x2d   : > { %p4728_p10 = pnand %p4726_p9, %p5217_p8 }
  0x2f   : > { %p4729_p11 = pneg %p4728_p10 }
  0x31   : > { %p4736_p3 = pnand %p4735_p0, %p4729_p11 }
  0x33   : > { %4739 = shalt.err (!%p4736_p3)
}
  0x34   : > { %s5044_s0 = smov 192   ;;  %s5045_s21 = smov 12  }
  0x35   : > { %s6143_s20 = sld [smem:[#allocation36_spill]]  ;;  %s4751_s19 = scalar_lea.vmem %s5207_s28, 1024 }
  0x36   : > { %p4752_p6 = scmp.ne.s32.totalorder %s5207_s28, %s4751_s19  ;;  %p4759_p11 = scmp.lt.s32.totalorder %s5207_s28, %s5207_s28 }
  0x37   : > { %p4760_p12 = scmp.lt.s32.totalorder %s4751_s19, %s4751_s19 }
  0x38   : > { %p4754_p9 = pnand %p4752_p6, %p5217_p8 }
  0x39   : > { %p4761_p13 = por %p4760_p12, %p4759_p11 }
  0x3a   : > { %p4755_p10 = pneg %p4754_p9 }
  0x3b   : > { %4439 = dma.hbm_to_vmem [thread:$0]  (!%p5211_p7), %s6143_s20, 3072, %s528_s25, [#allocation10], %s5044_s0, %s5044_s0, %s5045_s21  }
  0x3c   : > { %p4762_p0 = pnand %p4761_p13, %p4755_p10 }
  0x3e   : > { %4765 = shalt.err (!%p4762_p0)
}
  0x3f   : > { %s6097_s30 = smov 64   ;;  %s6098_s18 = smov 4  }
  0x40   : > { %s6144_s8 = sld [smem:[#allocation37_spill]]  ;;  %s5048_s0 = smov [#allocation15]  }
  0x41   : > { %s587_s21 = sshll.u32 %s5048_s0, 4  ;;  %s588_s21 = int_to_ptr.vmem [resolvable:$true] %s587_s21 }
  0x42   : > { %s4777_s19 = scalar_lea.vmem %s588_s21, 2048  ;;  %p4785_p10 = scmp.lt.s32.totalorder %s588_s21, %s588_s21 }
  0x43   : > { %p4778_p3 = scmp.ne.s32.totalorder %s588_s21, %s4777_s19  ;;  %p4786_p11 = scmp.lt.s32.totalorder %s4777_s19, %s4777_s19 }
  0x45   : > { %p4780_p6 = pnand %p4778_p3, %p5217_p8  ;;  %p4787_p12 = por %p4786_p11, %p4785_p10 }
  0x46   : > { %4442 = dma.hbm_to_vmem [thread:$0]  (!%p5211_p7), %s6144_s8, 1024, %s5207_s28, [#allocation13], %s6097_s30, %s6097_s30, %s6098_s18  }
  0x47   : > { %p4781_p9 = pneg %p4780_p6 }
  0x49   : > { %p4788_p13 = pnand %p4787_p12, %p4781_p9 }
  0x4b   : > { %4791 = shalt.err (!%p4788_p13)
}
  0x4c   : > { %s6099_s2 = smov 128   ;;  %s6101_s28 = smov 8  }
  0x4d   : > { %s6145_s14 = sld [smem:[#allocation41_spill]]  ;;  %s3909_s25 = sadd.s32 4294967294, %s5040_s24  }
  0x4e   : > { %s5255_s0 = sadd.s32 1, %s5040_s24   ;;  %s51_s30 = sadd.s32 1, %s5036_s23 }
  0x4f   : > { %6146 = sst [smem:[#allocation28_spill]] %s5255_s0  ;;  %s48_s19 = ssub.s32 %s5040_s24, %s5255_s0 }
  0x50   : > { %p49_p0 = scmp.eq.s32.totalorder %s48_s19, 0  ;;  %p58_p3 = scmp.ne.s32.totalorder %s5036_s23, %s5032_s22 }
  0x51   : > { %p59_p6 = scmp.eq.s32.totalorder %s5040_s24, 0  ;;  %p64_p9 = scmp.ne.s32.totalorder %s5032_s22, %s5028_s1 }
  0x52   : > { %s5266_s18 = scalar_select %p49_p0, %s5036_s23, %s51_s30  }
  0x53   : > { %4448 = dma.hbm_to_vmem [thread:$0]  (!%p5211_p7), %s6145_s14, 2048, %s588_s21, [#allocation16], %s6099_s2, %s6099_s2, %s6101_s28  }
  0x54   : > { %6147 = sst [smem:[#allocation29_spill]] %s5266_s18  ;;  %p60_p10 = por %p59_p6, %p58_p3 }
  0x55   : > { %p5270_p11 = por %p6112_p1, %p64_p9  ;;  %p5276_p12 = por %p502_p2, %p58_p3 }
  0x56   : > { %p508_p13 = scmp.eq.s32.totalorder %s3909_s25, 1  ;;  %p4474_p5 = scmp.lt.s32.totalorder %s5040_s24, 2 }
  0x57   : > { %s6148_s21 = scalar_select %p5270_p11, 1, 0 }
  0x58   : > { %s6149_s27 = scalar_select %p5276_p12, 1, 0 }
  0x59   : > { %s5282_s20 = sand.u32 1, %s5036_s23   ;;  %p5284_p0 = por %p508_p13, %p64_p9 }
  0x5a   : > { %6150 = sst [smem:[#allocation30_spill]] %s6149_s27  ;;  %s6110_s19 = sshll.u32 %s5282_s20, 4 }
  0x5b   : > { %s6151_s30 = scalar_select %p5284_p0, 1, 0 }
  0x5c   : > { %s6111_s2 = sshll.u32 %s5040_s24, 8  ;;  %p5290_p6 = pnand %p4474_p5, %p60_p10 }
  0x5d   : > { %6152 = sst [smem:[#allocation31_spill]] %s6151_s30  ;;  %s6113_s8 = sand.u32 1, %s5040_s24  }
  0x5e   : > { %s6154_s18 = sld [smem:[#allocation33_spill]]  ;;  %s651_s0 = scalar_lea.vmem [#allocation6], %s6110_s19 }
  0x5f   : > { %s658_s30 = sshll.u32 %s651_s0, 4  ;;  %s5308_s1 = scalar_lea.sflag [#allocation7], %s6113_s8  ;;  %s5304_s30 = int_to_ptr.vmem [resolvable:$true] %s658_s30 }
  0x60   : > { %p5314_p5 = pneg %p5290_p6 }
  0x64   : > { %s5300_s23 = scalar_lea.hbm %s6154_s18, %s6111_s2  ;;  %s4797_s0 = scalar_lea.hbm %s6154_s18, 512 }
  0x65   : > { %s4792_s27 = scalar_lea.hbm %s5300_s23, 256  ;;  %p4798_p10 = scmp.lt.s32.totalorder %s5300_s23, %s6154_s18 }
  0x66   : > { %p4793_p2 = scmp.ne.s32.totalorder %s5300_s23, %s4792_s27  ;;  %p4799_p13 = scmp.lt.s32.totalorder %s4797_s0, %s4792_s27 }
  0x68   : > { %p4795_p3 = pnand %p5314_p5, %p4793_p2  ;;  %p4800_p1 = por %p4799_p13, %p4798_p10 }
  0x6a   : > { %p4796_p9 = pneg %p4795_p3 }
  0x6c   : > { %p4801_p0 = pnand %p4800_p1, %p4796_p9 }
  0x6e   : > { %4804 = shalt.err (!%p4801_p0)
}
  0x6f   : > { %s4805_s8 = scalar_lea.vmem %s5304_s30, 256  ;;  %s5051_s15 = smov [#allocation6]  }
  0x70   : > { %p4806_p12 = scmp.ne.s32.totalorder %s5304_s30, %s4805_s8  ;;  %s4810_s14 = sshll.u32 %s5051_s15, 4  ;;  %s4811_s14 = int_to_ptr.vmem [resolvable:$false] %s4810_s14 }
  0x71   : > { %s4812_s25 = scalar_lea.vmem %s4811_s14, 512  ;;  %p4813_p11 = scmp.lt.s32.totalorder %s5304_s30, %s4811_s14 }
  0x72   : > { %p4808_p2 = pnand %p4806_p12, %p5314_p5  ;;  %p4814_p4 = scmp.lt.s32.totalorder %s4812_s25, %s4805_s8 }
  0x74   : > { %p4809_p3 = pneg %p4808_p2  ;;  %p4815_p7 = por %p4814_p4, %p4813_p11 }
  0x76   : > { %p4816_p8 = pnand %p4815_p7, %p4809_p3 }
  0x78   : > { %4819 = shalt.err (!%p4816_p8)
}
  0x79   : > { %s6156_s2 = smov 8   ;;  %s6157_s27 = smov 128  }
  0x7a   : > { %4458 = dma.hbm_to_vmem [thread:$0]  (!%p5290_p6), %s5300_s23, 256, %s5304_s30, %s5308_s1, %s6157_s27, %s6157_s27, %s6156_s2  }
  0x7b   : > { %s5052_s19 = smov [#allocation14]   ;;  %s5053_s15 = smov [#allocation17]  }
  0x7c   : > { %s565_s0 = sshll.u32 %s5052_s19, 4  ;;  %s603_s18 = sshll.u32 %s5053_s15, 4  ;;  %s566_s0 = int_to_ptr.vmem [resolvable:$true] %s565_s0  ;;  %s604_s18 = int_to_ptr.vmem [resolvable:$true] %s603_s18 }
  0x7d   : > { %s4831_s8 = scalar_lea.vmem %s566_s0, 2048  ;;  %p6158_p4 = scmp.ne.s32.totalorder %s6142_s29, 0 }
  0x7e   : > { %p4832_p1 = scmp.ne.s32.totalorder %s566_s0, %s4831_s8  ;;  %p4839_p11 = scmp.lt.s32.totalorder %s566_s0, %s566_s0 }
  0x7f   : > { %p4840_p12 = scmp.lt.s32.totalorder %s4831_s8, %s4831_s8 }
  0x80   : > { %p4834_p7 = pnand %p4832_p1, %p6158_p4 }
  0x81   : > { %p4841_p0 = por %p4840_p12, %p4839_p11 }
  0x82   : > { %p4835_p8 = pneg %p4834_p7 }
  0x84   : > { %p4842_p9 = pnand %p4841_p0, %p4835_p8 }
  0x86   : > { %4845 = shalt.err (!%p4842_p9)
}
  0x87   : > { %p6159_p10 = scmp.ne.s32.totalorder %s6141_s4, 0  ;;  %s6160_s10 = sld [smem:[#allocation38_spill]] }
  0x88   : > { %s4857_s14 = scalar_lea.vmem %s604_s18, 2048  ;;  %p4865_p1 = scmp.lt.s32.totalorder %s604_s18, %s604_s18 }
  0x89   : > { %p4858_p13 = scmp.ne.s32.totalorder %s604_s18, %s4857_s14  ;;  %p4866_p7 = scmp.lt.s32.totalorder %s4857_s14, %s4857_s14 }
  0x8b   : > { %p4860_p2 = pnand %p4858_p13, %p6158_p4  ;;  %p4867_p11 = por %p4866_p7, %p4865_p1 }
  0x8d   : > { %4445 = dma.hbm_to_vmem [thread:$0]  (!%p6159_p10), %s6160_s10, 2048, %s566_s0, [#allocation13], %s6157_s27, %s6157_s27, %s6156_s2  }
  0x8e   : > { %p4861_p3 = pneg %p4860_p2 }
  0x90   : > { %p4868_p8 = pnand %p4867_p11, %p4861_p3 }
  0x92   : > { %4871 = shalt.err (!%p4868_p8)
}
  0x93   : > { %s6161_s25 = smov 4   ;;  %s6162_s19 = smov 64  }
  0x94   : > { %s6163_s16 = sld [smem:[#allocation43_spill]]  ;;  %s6164_s29 = sshll.u32 %s5040_s24, 8 }
  0x95   : > { %s6165_s30 = sld [smem:[#allocation32_spill]]  ;;  %s6166_s10 = sshll.u32 %s5282_s20, 4 }
  0x96   : > { %s630_s4 = scalar_lea.vmem [#allocation3], %s6166_s10  ;;  %s3923_s15 = sshll.u32 %s5282_s20, 2 }
  0x97   : > { %s637_s13 = sshll.u32 %s630_s4, 4  ;;  %s627_s8 = scalar_lea.sflag [#allocation4], %s5282_s20  ;;  %s5369_s13 = int_to_ptr.vmem [resolvable:$true] %s637_s13 }
  0x9a   : > { %4451 = dma.hbm_to_vmem [thread:$0]  (!%p6159_p10), %s6163_s16, 2048, %s604_s18, [#allocation16], %s6162_s19, %s6162_s19, %s6161_s25  }
  0x9b   : > { %s5365_s14 = scalar_lea.hbm %s6165_s30, %s6164_s29  ;;  %s4877_s19 = scalar_lea.hbm %s6165_s30, 512 }
  0x9c   : > { %s4872_s12 = scalar_lea.hbm %s5365_s14, 256  ;;  %p4878_p9 = scmp.lt.s32.totalorder %s5365_s14, %s6165_s30 }
  0x9d   : > { %p4873_p4 = scmp.ne.s32.totalorder %s5365_s14, %s4872_s12  ;;  %p4879_p10 = scmp.lt.s32.totalorder %s4877_s19, %s4872_s12 }
  0x9f   : > { %p4875_p12 = pnand %p4873_p4, %p5314_p5  ;;  %p4880_p13 = por %p4879_p10, %p4878_p9 }
  0xa1   : > { %p4876_p0 = pneg %p4875_p12 }
  0xa3   : > { %p4881_p2 = pnand %p4880_p13, %p4876_p0 }
  0xa5   : > { %4884 = shalt.err (!%p4881_p2)
}
  0xa6   : > { %s4885_s10 = scalar_lea.vmem %s5369_s13, 256  ;;  %s5054_s23 = smov [#allocation3]  }
  0xa7   : > { %p4886_p3 = scmp.ne.s32.totalorder %s5369_s13, %s4885_s10  ;;  %s4890_s4 = sshll.u32 %s5054_s23, 4  ;;  %s4891_s4 = int_to_ptr.vmem [resolvable:$false] %s4890_s4 }
  0xa8   : > { %s4892_s18 = scalar_lea.vmem %s4891_s4, 512  ;;  %p4893_p11 = scmp.lt.s32.totalorder %s5369_s13, %s4891_s4 }
  0xa9   : > { %p4888_p1 = pnand %p4886_p3, %p5314_p5  ;;  %p4894_p8 = scmp.lt.s32.totalorder %s4892_s18, %s4885_s10 }
  0xab   : > { %p4889_p7 = pneg %p4888_p1  ;;  %p4895_p4 = por %p4894_p8, %p4893_p11 }
  0xad   : > { %p4896_p12 = pnand %p4895_p4, %p4889_p7 }
  0xaf   : > { %4899 = shalt.err (!%p4896_p12)
}
  0xb0   : > { %4455 = dma.hbm_to_vmem [thread:$0]  (!%p5290_p6), %s5365_s14, 256, %s5369_s13, %s627_s8, %s6157_s27, %s6157_s27, %s6156_s2  }
  0xb1   : > { %s4067_s12 = sshll.u32 %s5040_s24, 6  ;;  %s6167_s29 = sld [smem:[#allocation34_spill]] }
  0xb2   : > { %s672_s10 = scalar_lea.vmem [#allocation8], %s3923_s15 }
  0xb3   : > { %s679_s23 = sshll.u32 %s672_s10, 4  ;;  %s5406_s23 = int_to_ptr.vmem [resolvable:$true] %s679_s23 }
  0xb7   : > { %s5402_s0 = scalar_lea.hbm %s6167_s29, %s4067_s12  ;;  %s4905_s27 = scalar_lea.hbm %s6167_s29, 128 }
  0xb8   : > { %s4900_s4 = scalar_lea.hbm %s5402_s0, 64  ;;  %p4906_p13 = scmp.lt.s32.totalorder %s5402_s0, %s6167_s29 }
  0xb9   : > { %p4901_p0 = scmp.ne.s32.totalorder %s5402_s0, %s4900_s4  ;;  %p4907_p2 = scmp.lt.s32.totalorder %s4905_s27, %s4900_s4 }
  0xbb   : > { %p4903_p9 = pnand %p4901_p0, %p5314_p5  ;;  %p4908_p3 = por %p4907_p2, %p4906_p13 }
  0xbd   : > { %p4904_p10 = pneg %p4903_p9 }
  0xbf   : > { %p4909_p1 = pnand %p4908_p3, %p4904_p10 }
  0xc1   : > { %4912 = shalt.err (!%p4909_p1)
}
  0xc2   : > { %s4913_s18 = scalar_lea.vmem %s5406_s23, 64  ;;  %s5055_s25 = smov [#allocation8]  }
  0xc3   : > { %p4914_p7 = scmp.ne.s32.totalorder %s5406_s23, %s4913_s18  ;;  %s4918_s19 = sshll.u32 %s5055_s25, 4  ;;  %s4919_s19 = int_to_ptr.vmem [resolvable:$false] %s4918_s19 }
  0xc4   : > { %s4920_s10 = scalar_lea.vmem %s4919_s19, 128  ;;  %p4921_p4 = scmp.lt.s32.totalorder %s5406_s23, %s4919_s19 }
  0xc5   : > { %p4916_p11 = pnand %p4914_p7, %p5314_p5  ;;  %p4922_p12 = scmp.lt.s32.totalorder %s4920_s10, %s4913_s18 }
  0xc7   : > { %p4917_p8 = pneg %p4916_p11  ;;  %p4923_p0 = por %p4922_p12, %p4921_p4 }
  0xc9   : > { %p4924_p9 = pnand %p4923_p0, %p4917_p8 }
  0xcb   : > { %4927 = shalt.err (!%p4924_p9)
}
  0xcc   : > { %s5056_s4 = smov 32   ;;  %s5057_s13 = smov 2  }
  0xcd   : > { %4461 = dma.hbm_to_vmem [thread:$0]  (!%p5290_p6), %s5402_s0, 64, %s5406_s23, %s5308_s1, %s5056_s4, %s5056_s4, %s5057_s13  }
  0xce   : > { %s6168_s14 = sld [smem:[#allocation35_spill]]  ;;  %s693_s18 = scalar_lea.vmem [#allocation9], %s3923_s15 }
  0xcf   : > { %s700_s25 = sshll.u32 %s693_s18, 4  ;;  %s6169_s19 = sand.u32 1, %s5040_s24   ;;  %s5441_s25 = int_to_ptr.vmem [resolvable:$true] %s700_s25 }
  0xd0   : > { %s690_s10 = scalar_lea.sflag [#allocation10], %s6169_s19 }
  0xd4   : > { %s5437_s8 = scalar_lea.hbm %s6168_s14, %s4067_s12  ;;  %s4933_s12 = scalar_lea.hbm %s6168_s14, 128 }
  0xd5   : > { %s4928_s16 = scalar_lea.hbm %s5437_s8, 64  ;;  %p4934_p3 = scmp.lt.s32.totalorder %s5437_s8, %s6168_s14 }
  0xd6   : > { %p4929_p10 = scmp.ne.s32.totalorder %s5437_s8, %s4928_s16  ;;  %p4935_p1 = scmp.lt.s32.totalorder %s4933_s12, %s4928_s16 }
  0xd8   : > { %p4931_p13 = pnand %p4929_p10, %p5314_p5  ;;  %p4936_p7 = por %p4935_p1, %p4934_p3 }
  0xda   : > { %p4932_p2 = pneg %p4931_p13 }
  0xdc   : > { %p4937_p11 = pnand %p4936_p7, %p4932_p2 }
  0xde   : > { %4940 = shalt.err (!%p4937_p11)
}
  0xdf   : > { %s4941_s15 = scalar_lea.vmem %s5441_s25, 64  ;;  %s5058_s2 = smov [#allocation9]  }
  0xe0   : > { %p4942_p8 = scmp.ne.s32.totalorder %s5441_s25, %s4941_s15  ;;  %s4946_s27 = sshll.u32 %s5058_s2, 4  ;;  %s4947_s27 = int_to_ptr.vmem [resolvable:$false] %s4946_s27 }
  0xe1   : > { %s4948_s18 = scalar_lea.vmem %s4947_s27, 128  ;;  %p4949_p0 = scmp.lt.s32.totalorder %s5441_s25, %s4947_s27 }
  0xe2   : > { %p4944_p4 = pnand %p4942_p8, %p5314_p5  ;;  %p4950_p9 = scmp.lt.s32.totalorder %s4948_s18, %s4941_s15 }
  0xe4   : > { %p4945_p12 = pneg %p4944_p4  ;;  %p4951_p10 = por %p4950_p9, %p4949_p0 }
  0xe6   : > { %p4952_p13 = pnand %p4951_p10, %p4945_p12 }
  0xe8   : > { %4955 = shalt.err (!%p4952_p13)
}
  0xe9   : > { %4464 = dma.hbm_to_vmem [thread:$0]  (!%p5290_p6), %s5437_s8, 64, %s5441_s25, %s690_s10, %s5056_s4, %s5056_s4, %s5057_s13  }
  0xea   : > { %p6170_p5 = scmp.ne.s32.totalorder %s6140_s26, 0 }
  0xeb   : > { %s5471_s16 = sand.u32 (!%p6170_p5), 1, %s5032_s22   ;;  %p6171_p2 = scmp.ne.s32.totalorder (!%p6170_p5), %s6148_s21, 0 }
  0xec   : > { %712 = sbr.rel (%p6170_p5) target bundleno = 4102 (0x1006), region = 100  ;;  %s5474_s17 = sshll.u32 (!%p6170_p5), %s5471_s16, 4 }
  0xed   : > { %s715_s19 = scalar_lea.sflag (!%p6170_p5), [#allocation4], %s5471_s16  ;;  %s718_s28 = scalar_lea.vmem (!%p6170_p5), [#allocation3], %s5474_s17 }
  0xf1   : > { %4999 = dma.done.wait (%p6171_p2), %s715_s19, 256  }
  0xf2   : > { %5001 = vsyncadd (%p6171_p2), %s715_s19, 4294967040  ;;  %s723_s26 = sand.u32 1, %s5194_s3   ;;  %s727_s13 = scalar_lea.vmem [#allocation6], %s5474_s17 }
  0xf3   : > { %s724_s4 = scalar_lea.sflag [#allocation7], %s723_s26 }
  0xf4   : > { %5003 = dma.done.wait (%p6171_p2), %s724_s4, 320  }
  0xf5   : > { %5005 = vsyncadd (%p6171_p2), %s724_s4, 4294966976  ;;  %s3932_s8 = sshll.u32 %s5471_s16, 2  ;;  %s742_s10 = scalar_lea.sflag [#allocation10], %s723_s26 }
  0xf6   : > { %s5489_s25 = scalar_lea.vmem [#allocation8], %s3932_s8  ;;  %s5491_s1 = scalar_lea.vmem [#allocation9], %s3932_s8 }
  0xf7   : > { %5007 = dma.done.wait (%p6171_p2), %s742_s10, 64  }
  0xf8   : > { %5009 = vsyncadd (%p6171_p2), %s742_s10, 4294967232  ;;  %p6172_p6 = scmp.eq.s32.totalorder %s5194_s3, 0 }
  0xfa   : > { %5011 = dma.done.wait (%p6172_p6), [#allocation10], 3072   ;;  %p6173_p3 = pmov %p6172_p6 }
  0xfc   : > { %5013 = vsyncadd (%p6173_p3), [#allocation10], 4294964224  ;;  %p6174_p1 = pmov %p6173_p3 }
  0xfe   : > { %5015 = dma.done.wait (%p6174_p1), [#allocation13], 3072   ;;  %p6175_p7 = pmov %p6174_p1 }
  0xff   : > { %p6176_p11 = pmov %p6174_p1 }
 0x100   : > { %5017 = vsyncadd (%p6175_p7), [#allocation13], 4294964224 }
 0x101   : > { %5019 = dma.done.wait (%p6176_p11), [#allocation16], 4096   ;;  %p6177_p8 = pmov %p6174_p1 }
 0x102   : > { %v5059_v0 = vmov 0   ;;  %v4534_v1 = vld [vmem:[#allocation11 + $0xac] ss:$12 sps:$4 sm:$0xff]   ;;  %v4536_v2 = vld [vmem:[#allocation11 + $0xa8] ss:$12 sps:$4 sm:$0xff]   ;;  %v5060_v20 = vmov 0.0   ;;  %v888_v21 = vlaneseq }
 0x103   : > { %5021 = vsyncadd (%p6177_p8), [#allocation16], 4294963200  ;;  %1063 = vmatprep.mubr.bf16.mxu0 %v5059_v0  ;;  %1031 = vmatprep.subr.bf16.mxu0 %v4534_v1  ;;  %v4537_v3 = vld [vmem:[#allocation11 + $0x94] ss:$12 sps:$4 sm:$0xff]   ;;  %v4539_v4 = vld [vmem:[#allocation11 + $0x90] ss:$12 sps:$4 sm:$0xff]  }
 0x104   : > { %1032 = vmatpush1.bf16.msra.mxu0 %v4536_v2  ;;  %v4540_v5 = vld [vmem:[#allocation11 + $0x7c] ss:$12 sps:$4 sm:$0xff]   ;;  %v4542_v6 = vld [vmem:[#allocation11 + $0x78] ss:$12 sps:$4 sm:$0xff]   ;;  %v4545_v8 = vld [vmem:[#allocation11 + $0x60] ss:$12 sps:$4 sm:$0xff]   ;;  %4174 = vmatprep.subr.bf16.mxu1 %v5060_v20 }
 0x105   : > { %1033 = vmatprep.subr.bf16.mxu0 %v4537_v3  ;;  %v4543_v7 = vld [vmem:[#allocation11 + $0x64] ss:$12 sps:$4 sm:$0xff]   ;;  %v4546_v9 = vld [vmem:[#allocation11 + $0x4c] ss:$12 sps:$4 sm:$0xff]   ;;  %v4548_v10 = vld [vmem:[#allocation11 + $0x48] ss:$12 sps:$4 sm:$0xff]  }
 0x106   : > { %v4549_v11 = vld [vmem:[#allocation11 + $0x34] ss:$12 sps:$4 sm:$0xff]   ;;  %v4551_v12 = vld [vmem:[#allocation11 + $0x30] ss:$12 sps:$4 sm:$0xff]   ;;  %v4554_v14 = vld [vmem:[#allocation11 + $0x18] ss:$12 sps:$4 sm:$0xff]  }
 0x107   : > { %v4552_v13 = vld [vmem:[#allocation11 + $0x1c] ss:$12 sps:$4 sm:$0xff]   ;;  %v4555_v15 = vld [vmem:[#allocation11 + $0x4] ss:$12 sps:$4 sm:$0xff]   ;;  %v4557_v16 = vld [vmem:[#allocation11] ss:$12 sps:$4 sm:$0xff]  }
 0x108   : > { %1034 = vmatpush1.bf16.msra.mxu0 %v4539_v4  ;;  %v5512_v17 = vld [vmem:[%s718_s28] sm:$0xff]  ;;  %v5516_v18 = vld [vmem:[%s718_s28 + $0x8] sm:$0xff]  ;;  %vm5061_vm0 = vmmov 0   ;;  %v5529_v22 = vshrl.u32 %v888_v21, 7  ;;  %vm1118_vm1 = vcmask 261120   ;;  %s5062_s12 = smov 64  }
 0x109   : > { %1035 = vmatprep.subr.bf16.mxu0 %v4540_v5  ;;  %v5520_v19 = vpack.c.bf16 %v5516_v18, %v5512_v17  ;;  %4190 = vmatprep.mubr.msk.bf16.mxu1 %vm5061_vm0, %v5060_v20  ;;  %v5540_v25 = vld [vmem:[%s6076_s5] sm:$0x7]  ;;  %s5063_s23 = smov 96   ;;  %s5064_s20 = smov 32   ;;  %v4558_v41 = vld [vmem:[#allocation11 + $0xb0] ss:$12 sps:$4 sm:$0xff]  }
 0x10a   : > { %v5532_v23 = vsub.s32 1, %v5529_v22  ;;  %v5535_v24 = vsub.s32 0, %v5529_v22  ;;  %4175 = vmatpush3.bf16.msra.mxu1 %v4558_v41  ;;  %v4559_v42 = vld [vmem:[#allocation11 + $0x98] ss:$12 sps:$4 sm:$0xff]   ;;  %v4560_v43 = vld [vmem:[#allocation11 + $0x80] ss:$12 sps:$4 sm:$0xff]  }
 0x10b   : > { %4176 = vmatprep.subr.bf16.mxu1 %v5060_v20  ;;  %v4561_v44 = vld [vmem:[#allocation11 + $0x68] ss:$12 sps:$4 sm:$0xff]   ;;  %v4562_v45 = vld [vmem:[#allocation11 + $0x50] ss:$12 sps:$4 sm:$0xff]   ;;  %v4563_v46 = vld [vmem:[#allocation11 + $0x38] ss:$12 sps:$4 sm:$0xff]  }
 0x10c   : > { %1036 = vmatpush1.bf16.msra.mxu0 %v4542_v6  ;;  %v895_v26 = vrot.slane %v5540_v25, %v5532_v23  ;;  %v891_v28 = vrot.slane %v5540_v25, %v5535_v24  ;;  %v4564_v47 = vld [vmem:[#allocation11 + $0x20] ss:$12 sps:$4 sm:$0xff]   ;;  %v4565_v48 = vld [vmem:[#allocation11 + $0x8] ss:$12 sps:$4 sm:$0xff]   ;;  %vm1169_vm4 = vcmask 64512   ;;  %vm1186_vm7 = vcmask 1043456  }
 0x10d   : > { %1037 = vmatprep.subr.bf16.mxu0 %v4543_v7  ;;  %v849_v5 = vld [vmem:[%s5489_s25] sm:$0x3]  ;;  %vm1349_vm8 = vcmask 523520   ;;  %vm1466_vm9 = vcmask 785920   ;;  %vm1583_vm10 = vcmask 1048320   ;;  %s6187_s21 = sld [smem:[#allocation40_spill]] }
 0x10e   : > { %4177 = vmatpush3.bf16.msra.mxu1 %v4559_v42  ;;  %vm1115_vm2 = vnez %v849_v5  ;;  %s6189_s2 = sld [smem:[#allocation44_spill]]  ;;  %s4069_s8 = sshll.u32 %s5194_s3, 8 }
 0x10f   : > { %4178 = vmatprep.subr.bf16.mxu1 %v5060_v20  ;;  %v1165_v6 = vsel %vm1115_vm2, 16843009, %v5059_v0  ;;  %s6190_s19 = sld [smem:[#allocation45_spill]]  ;;  %s5065_s3 = smov [#allocation18]  }
 0x110   : > { %1038 = vmatpush1.bf16.msra.mxu0 %v4545_v8  ;;  %v1166_v7 = vunpack.c.0.s8 %v1165_v6  ;;  %s6191_s4 = sld [smem:[#allocation46_spill]] }
 0x111   : > { %1039 = vmatprep.subr.bf16.mxu0 %v4546_v9  ;;  %s6193_s0 = sld [smem:[#allocation47_spill]] }
 0x112   : > { %4179 = vmatpush3.bf16.msra.mxu1 %v4560_v43  ;;  %vm5611_vm3 = vcmp.ne.s32.totalorder %v1166_v7, 0  ;;  %v898_v7 = vsub.s32 2, %v5529_v22 }
 0x113   : > { %4180 = vmatprep.subr.bf16.mxu1 %v5060_v20 }
 0x114   : > { %1040 = vmatpush1.bf16.msra.mxu0 %v4548_v10 }
 0x115   : > { %1041 = vmatprep.subr.bf16.mxu0 %v4549_v11 }
 0x116   : > { %4181 = vmatpush3.bf16.msra.mxu1 %v4561_v44 }
 0x117   : > { %4182 = vmatprep.subr.bf16.mxu1 %v5060_v20 }
 0x118   : > { %1042 = vmatpush1.bf16.msra.mxu0 %v4551_v12 }
 0x119   : > { %1043 = vmatprep.subr.bf16.mxu0 %v4552_v13 }
 0x11a   : > { %4183 = vmatpush3.bf16.msra.mxu1 %v4562_v45 }
 0x11b   : > { %4184 = vmatprep.subr.bf16.mxu1 %v5060_v20 }
 0x11c   : > { %1044 = vmatpush1.bf16.msra.mxu0 %v4554_v14 }
 0x11d   : > { %1045 = vmatprep.subr.bf16.mxu0 %v4555_v15 }
 0x11e   : > { %4185 = vmatpush3.bf16.msra.mxu1 %v4563_v46 }
 0x11f   : > { %4186 = vmatprep.subr.bf16.mxu1 %v5060_v20 }
 0x120   : > { %1046 = vmatpush1.bf16.msra.mxu0 %v4557_v16 }
 0x121   : > { %4194 = vmatprep.subr.bf16.mxu0 %v5060_v20 }
 0x122   : > { %4187 = vmatpush3.bf16.msra.mxu1 %v4564_v47 }
 0x123   : > { %1064 = vmatmul.mubr.bf16.vlgmr.msra.gmra.mxu0 %v5520_v19  ;;  %4188 = vmatprep.subr.bf16.mxu1 %v5060_v20 }
 0x124   : > { %4196 = vmatprep.mubr.msk.bf16.mxu0 %vm5061_vm0, %v5060_v20 }
 0x126   : > { %4189 = vmatpush3.bf16.msra.mxu1 %v4565_v48 }
 0x127   : > { %4200 = vmatprep.subr.bf16.mxu1 %v5060_v20 }
 0x129   : > { %4191 = vmatmul.mubr.bf16.vlgmr.msra.gmra.mxu1 %v5520_v19 }
 0x12a   : > { %4202 = vmatprep.mubr.msk.bf16.mxu1 %vm5061_vm0, %v5060_v20 }
 0x1e3   : > { %v1065_v27 = vpop.f32.mrf.mxu0 }
 0x1e4   : > { %v1066_v31 = vadd.f32 %v1065_v27, %v891_v28 }
 0x1e5   : > { %v1067_v29 = vpop.f32.mrf.mxu0 }
 0x1e6   : > { %v1068_v30 = vadd.f32 %v1067_v29, %v895_v26  ;;  %v1116_v35 = vpack.c.bf16 %v1066_v31, %v1066_v31 }
 0x1e7   : > { %v1069_v33 = vpop.f32.mrf.mxu0 }
 0x1e8   : > { %v1117_v32 = vpack.c.bf16 %v1068_v30, %v1068_v30  ;;  %v1070_v37 = vadd.f32 %v1069_v33, %v891_v28  ;;  %v850_v30 = vld [vmem:[%s5489_s25 + $0x2] sm:$0x3]  ;;  %s6186_s25 = sld [smem:[#allocation39_spill]] }
 0x1e9   : > { %v1071_v36 = vpop.f32.mrf.mxu0  ;;  %vm1585_vm5 = vnez %v850_v30 }
 0x1ea   : > { %1353 = vrot.lane.b32.xlu1 %v1117_v32, %s5062_s12  ;;  %1235 = vrot.lane.b32.xlu0 %v1117_v32, %s5063_s23  ;;  %v1123_v34 = vsel %vm1118_vm1, %v1117_v32, 0  ;;  %v1072_v38 = vadd.f32 %v1071_v36, %v895_v26  ;;  %v1586_v39 = vpack.c.bf16 %v1070_v37, %v1070_v37 }
 0x1eb   : > { %4195 = vmatpush3.bf16.xpose.msra.mxu0 %v1123_v34 }
 0x1ec   : > { %4206 = vmatprep.subr.bf16.mxu0 %v5060_v20  ;;  %v1587_v40 = vpack.c.bf16 %v1072_v38, %v1072_v38 }
 0x1ee   : > { %1351 = vrot.lane.b32.xlu1 %v1116_v35, %s5062_s12  ;;  %1232 = vrot.lane.b32.xlu0 %v1116_v35, %s5063_s23  ;;  %v1592_v58 = vsel %vm1118_vm1, %v1587_v40, 0 }
 0x1f2   : > { %1468 = vrot.lane.b32.xlu1 %v1116_v35, %s5064_s20  ;;  %1470 = vrot.lane.b32.xlu0 %v1117_v32, %s5064_s20 }
 0x1f3   : > { %4197 = vmatmul.mubr.msk.bf16.vlgmr.msra.gmra.mxu0 %vm1118_vm1, %v1116_v35  ;;  %v1634_v35 = vsel %vm1585_vm5, 16843009, %v5059_v0 }
 0x1f4   : > { %4208 = vmatprep.mubr.msk.bf16.mxu0 %vm5061_vm0, %v5060_v20 }
 0x1f6   : > { %1699 = vrot.lane.b32.xlu1 %v1586_v39, %s5063_s23  ;;  %1702 = vrot.lane.b32.xlu0 %v1587_v40, %s5063_s23 }
 0x1fa   : > { %1817 = vrot.lane.b32.xlu1 %v1586_v39, %s5062_s12  ;;  %1819 = vrot.lane.b32.xlu0 %v1587_v40, %s5062_s12 }
 0x1fe   : > { %1933 = vrot.lane.b32.xlu1 %v1586_v39, %s5064_s20  ;;  %1935 = vrot.lane.b32.xlu0 %v1587_v40, %s5064_s20  ;;  %v1635_v40 = vunpack.c.0.s8 %v1634_v35 }
 0x200   : > { %vm5638_vm6 = vcmp.ne.s32.totalorder %v1635_v40, 0 }
 0x25c   : > { %v1236_v49 = vpop.permute.xlu0 %1235  ;;  %v1354_v51 = vpop.permute.xlu1 %1353 }
 0x25d   : > { %v1241_v50 = vsel %vm1118_vm1, %v1236_v49, 0  ;;  %v1359_v53 = vsel %vm1118_vm1, %v1354_v51, 0 }
 0x25e   : > { %4207 = vmatpush3.bf16.xpose.msra.mxu0 %v1241_v50 }
 0x25f   : > { %4218 = vmatprep.subr.bf16.mxu0 %v5060_v20 }
 0x260   : > { %v1233_v52 = vpop.permute.xlu0 %1232  ;;  %v1352_v55 = vpop.permute.xlu1 %1351 }
 0x264   : > { %v1471_v54 = vpop.permute.xlu0 %1470  ;;  %v1469_v57 = vpop.permute.xlu1 %1468 }
 0x265   : > { %4209 = vmatmul.mubr.msk.bf16.vlgmr.msra.gmra.mxu0 %vm1118_vm1, %v1233_v52  ;;  %v1476_v56 = vsel %vm1118_vm1, %v1471_v54, 0 }
 0x266   : > { %4219 = vmatpush3.bf16.xpose.msra.mxu0 %v1359_v53  ;;  %4220 = vmatprep.mubr.msk.bf16.mxu0 %vm5061_vm0, %v5060_v20 }
 0x267   : > { %4230 = vmatprep.subr.bf16.mxu0 %v5060_v20 }
 0x268   : > { %v1703_v59 = vpop.permute.xlu0 %1702  ;;  %v1700_v62 = vpop.permute.xlu1 %1699 }
 0x269   : > { %v1708_v60 = vsel %vm1118_vm1, %v1703_v59, 0 }
 0x26c   : > { %v1820_v61 = vpop.permute.xlu0 %1819  ;;  %v1818_v2 = vpop.permute.xlu1 %1817 }
 0x26d   : > { %4221 = vmatmul.mubr.msk.bf16.vlgmr.msra.gmra.mxu0 %vm1118_vm1, %v1352_v55  ;;  %v1825_v63 = vsel %vm1118_vm1, %v1820_v61, 0 }
 0x26e   : > { %4231 = vmatpush3.bf16.xpose.msra.mxu0 %v1476_v56  ;;  %4232 = vmatprep.mubr.msk.bf16.mxu0 %vm5061_vm0, %v5060_v20 }
 0x26f   : > { %4242 = vmatprep.subr.bf16.mxu0 %v5060_v20 }
 0x270   : > { %v1936_v1 = vpop.permute.xlu0 %1935  ;;  %v1934_v4 = vpop.permute.xlu1 %1933 }
 0x271   : > { %v1941_v3 = vsel %vm1118_vm1, %v1936_v1, 0 }
 0x275   : > { %4233 = vmatmul.mubr.msk.bf16.vlgmr.msra.gmra.mxu0 %vm1118_vm1, %v1469_v57 }
 0x276   : > { %4243 = vmatpush3.bf16.xpose.msra.mxu0 %v1592_v58  ;;  %4244 = vmatprep.mubr.msk.bf16.mxu0 %vm5061_vm0, %v5060_v20 }
 0x277   : > { %4254 = vmatprep.subr.bf16.mxu0 %v5060_v20 }
 0x27d   : > { %4245 = vmatmul.mubr.msk.bf16.vlgmr.msra.gmra.mxu0 %vm1118_vm1, %v1586_v39 }
 0x27e   : > { %4255 = vmatpush3.bf16.xpose.msra.mxu0 %v1708_v60  ;;  %4256 = vmatprep.mubr.msk.bf16.mxu0 %vm5061_vm0, %v5060_v20 }
 0x27f   : > { %4266 = vmatprep.subr.bf16.mxu0 %v5060_v20 }
 0x285   : > { %4257 = vmatmul.mubr.msk.bf16.vlgmr.msra.gmra.mxu0 %vm1118_vm1, %v1700_v62 }
 0x286   : > { %4267 = vmatpush3.bf16.xpose.msra.mxu0 %v1825_v63  ;;  %4268 = vmatprep.mubr.msk.bf16.mxu0 %vm5061_vm0, %v5060_v20 }
 0x287   : > { %4278 = vmatprep.subr.bf16.mxu0 %v5060_v20 }
 0x28d   : > { %4269 = vmatmul.mubr.msk.bf16.vlgmr.msra.gmra.mxu0 %vm1118_vm1, %v1818_v2 }
 0x28e   : > { %4279 = vmatpush3.bf16.xpose.msra.mxu0 %v1941_v3  ;;  %4280 = vmatprep.mubr.msk.bf16.mxu0 %vm5061_vm0, %v5060_v20 }
 0x28f   : > { %4290 = vmatprep.subr.bf16.mxu0 %v5060_v20 }
 0x295   : > { %4281 = vmatmul.mubr.msk.bf16.vlgmr.msra.gmra.mxu0 %vm1118_vm1, %v1934_v4  ;;  %v1108_v4 = vpop.f32.mrf.mxu1 }
 0x296   : > { %4306 = vmatprep.mubr.msk.bf16.mxu0 %vm5061_vm0, %v5060_v20 }
 0x297   : > { %v4192_v8 = vpop.f32.mrf.mxu1 }
 0x2b3   : > { %v1159_v9 = vpop.f32.mrf.mxu0 }
 0x2b4   : > { %v1168_v10 = vsel %vm5611_vm3, 1e-10, %v1159_v9 }
 0x2b5   : > { %v4198_v11 = vpop.f32.mrf.mxu0  ;;  %v1170_v12 = vsel %vm1169_vm4, %v1168_v10, -inf }
 0x2b6   : > { %1171 = vmax.xlane.f32.xlu0 %v1170_v12  ;;  %v899_v11 = vrot.slane %v5540_v25, %v898_v7  ;;  %v1111_v12 = vpop.f32.mrf.mxu1 }
 0x2b7   : > { %v1162_v13 = vpop.f32.mrf.mxu0 }
 0x2b9   : > { %v4199_v14 = vpop.f32.mrf.mxu0 }
 0x2ba   : > { %v1109_v14 = vadd.f32 %v1108_v4, %v899_v11 }
 0x325   : > { %v1277_v15 = vpop.f32.mrf.mxu0 }
 0x326   : > { %v5620_v16 = vsel %vm5611_vm3, 1e-10, %v1277_v15  ;;  %v5669_v15 = vadd.f32 %v1111_v12, %v899_v11 }
 0x327   : > { %v4210_v19 = vpop.f32.mrf.mxu0  ;;  %v1284_v21 = vsel %vm1169_vm4, %v5620_v16, -inf }
 0x328   : > { %1285 = vmax.xlane.f32.xlu1 %v1284_v21  ;;  %v4193_v19 = vpop.f32.mrf.mxu1 }
 0x329   : > { %v1280_v26 = vpop.f32.mrf.mxu0 }
 0x32a   : > { %v1182_v26 = vpack.c.bf16 %v1109_v14, %v1109_v14 }
 0x32b   : > { %v4211_v27 = vpop.f32.mrf.mxu0 }
 0x32c   : > { %v1188_v27 = vsel %vm1186_vm7, %v1182_v26, 0 }
 0x32d   : > { %v1395_v28 = vpop.f32.mrf.mxu0  ;;  %4201 = vmatpush3.bf16.msra.mxu1 %v1188_v27 }
 0x32e   : > { %v5626_v29 = vsel %vm5611_vm3, 1e-10, %v1395_v28  ;;  %4212 = vmatprep.subr.bf16.mxu1 %v5060_v20 }
 0x32f   : > { %v4222_v31 = vpop.f32.mrf.mxu0  ;;  %v1402_v32 = vsel %vm1169_vm4, %v5626_v29, -inf }
 0x330   : > { %1403 = vmax.xlane.f32.xlu0 %v1402_v32 }
 0x331   : > { %v1398_v33 = vpop.f32.mrf.mxu0 }
 0x333   : > { %v4223_v34 = vpop.f32.mrf.mxu0 }
 0x335   : > { %v1512_v36 = vpop.f32.mrf.mxu0 }
 0x336   : > { %v5634_v37 = vsel %vm5611_vm3, 1e-10, %v1512_v36 }
 0x337   : > { %v4234_v38 = vpop.f32.mrf.mxu0  ;;  %v1519_v39 = vsel %vm1169_vm4, %v5634_v37, -inf }
 0x338   : > { %1520 = vmax.xlane.f32.xlu0 %v1519_v39 }
 0x339   : > { %v1515_v41 = vpop.f32.mrf.mxu0 }
 0x33b   : > { %v4235_v42 = vpop.f32.mrf.mxu0 }
 0x33d   : > { %v1628_v44 = vpop.f32.mrf.mxu0 }
 0x33e   : > { %v5644_v45 = vsel %vm5638_vm6, 1e-10, %v1628_v44 }
 0x33f   : > { %v1172_v46 = vpop.xlane.xlu0 %1171  ;;  %v4246_v47 = vpop.f32.mrf.mxu0  ;;  %v1638_v48 = vsel %vm1169_vm4, %v5644_v45, -inf }
 0x340   : > { %v1173_v49 = vsub.f32 %v1168_v10, %v1172_v46  ;;  %1639 = vmax.xlane.f32.xlu1 %v1638_v48 }
 0x341   : > { %v1631_v50 = vpop.f32.mrf.mxu0 }
 0x342   : > { %v1174_v51 = vmul.f32 1.442695, %v1173_v49 }
 0x343   : > { %v4247_v52 = vpop.f32.mrf.mxu0 }
 0x344   : > { %4638 = vpow2.f32 %v1174_v51 }
 0x345   : > { %v1744_v53 = vpop.f32.mrf.mxu0 }
 0x346   : > { %v5650_v54 = vsel %vm5638_vm6, 1e-10, %v1744_v53 }
 0x347   : > { %v4258_v55 = vpop.f32.mrf.mxu0  ;;  %v1751_v56 = vsel %vm1169_vm4, %v5650_v54, -inf }
 0x348   : > { %1752 = vmax.xlane.f32.xlu0 %v1751_v56 }
 0x349   : > { %v1747_v57 = vpop.f32.mrf.mxu0 }
 0x34b   : > { %v4259_v58 = vpop.f32.mrf.mxu0 }
 0x34d   : > { %v1861_v59 = vpop.f32.mrf.mxu0 }
 0x34e   : > { %v5656_v60 = vsel %vm5638_vm6, 1e-10, %v1861_v59 }
 0x34f   : > { %v4270_v61 = vpop.f32.mrf.mxu0  ;;  %v1868_v62 = vsel %vm1169_vm4, %v5656_v60, -inf }
 0x350   : > { %1869 = vmax.xlane.f32.xlu1 %v1868_v62 }
 0x351   : > { %v4639_v63 = vpop.eup %4638  ;;  %v1864_v1 = vpop.f32.mrf.mxu0 }
 0x352   : > { %v1176_v3 = vsel %vm1169_vm4, %v4639_v63, 0.0  ;;  %v1650_v1 = vpack.c.bf16 %v5669_v15, %v5669_v15 }
 0x353   : > { %v4271_v2 = vpop.f32.mrf.mxu0 }
 0x354   : > { %1177 = vadd.xlane.f32.xlu1 %v1176_v3 }
 0x355   : > { %v1977_v5 = vpop.f32.mrf.mxu0 }
 0x356   : > { %v5663_v6 = vsel %vm5638_vm6, 1e-10, %v1977_v5 }
 0x357   : > { %v4282_v9 = vpop.f32.mrf.mxu0  ;;  %v1984_v10 = vsel %vm1169_vm4, %v5663_v6, -inf }
 0x358   : > { %1985 = vmax.xlane.f32.xlu0 %v1984_v10 }
 0x359   : > { %v1980_v13 = vpop.f32.mrf.mxu0 }
 0x35b   : > { %v4283_v21 = vpop.f32.mrf.mxu0 }
 0x3b1   : > { %v1286_v22 = vpop.xlane.xlu1 %1285 }
 0x3b2   : > { %v1287_v28 = vsub.f32 %v5620_v16, %v1286_v22  ;;  %v1655_v22 = vsel %vm1186_vm7, %v1650_v1, 0 }
 0x3b4   : > { %v1288_v30 = vmul.f32 1.442695, %v1287_v28 }
 0x3b6   : > { %4640 = vpow2.f32 %v1288_v30 }
 0x3b9   : > { %v1404_v25 = vpop.xlane.xlu0 %1403 }
 0x3ba   : > { %v1405_v31 = vsub.f32 %v5626_v29, %v1404_v25 }
 0x3bc   : > { %v1406_v32 = vmul.f32 1.442695, %v1405_v31 }
 0x3be   : > { %4642 = vpow2.f32 %v1406_v32 }
 0x3c1   : > { %v1521_v33 = vpop.xlane.xlu0 %1520 }
 0x3c2   : > { %v1522_v34 = vsub.f32 %v5634_v37, %v1521_v33 }
 0x3c3   : > { %v4641_v35 = vpop.eup %4640 }
 0x3c4   : > { %v1523_v36 = vmul.f32 1.442695, %v1522_v34  ;;  %v1290_v38 = vsel %vm1169_vm4, %v4641_v35, 0.0 }
 0x3c5   : > { %1291 = vadd.xlane.f32.xlu0 %v1290_v38 }
 0x3c6   : > { %4644 = vpow2.f32 %v1523_v36 }
 0x3c9   : > { %v1640_v41 = vpop.xlane.xlu1 %1639 }
 0x3ca   : > { %v1641_v44 = vsub.f32 %v5644_v45, %v1640_v41 }
 0x3cb   : > { %v5677_v39 = vpop.eup %4642 }
 0x3cc   : > { %v1408_v16 = vsel %vm1169_vm4, %v5677_v39, 0.0  ;;  %v1642_v50 = vmul.f32 1.442695, %v1641_v44 }
 0x3cd   : > { %1409 = vadd.xlane.f32.xlu1 %v1408_v16 }
 0x3d1   : > { %v1753_v46 = vpop.xlane.xlu0 %1752 }
 0x3d2   : > { %v1754_v49 = vsub.f32 %v5650_v54, %v1753_v46 }
 0x3d3   : > { %v5681_v40 = vpop.eup %4644 }
 0x3d4   : > { %v1525_v29 = vsel %vm1169_vm4, %v5681_v40, 0.0  ;;  %v1755_v53 = vmul.f32 1.442695, %v1754_v49 }
 0x3d5   : > { %1526 = vadd.xlane.f32.xlu0 %v1525_v29 }
 0x3d9   : > { %v1870_v37 = vpop.xlane.xlu1 %1869 }
 0x3da   : > { %v1871_v51 = vsub.f32 %v5656_v60, %v1870_v37 }
 0x3dc   : > { %v1872_v55 = vmul.f32 1.442695, %v1871_v51 }
 0x3dd   : > { %v1178_v42 = vpop.xlane.xlu1 %1177 }
 0x3de   : > { %1414 = vrot.lane.b32.xlu1 %v1182_v26, %s5062_s12  ;;  %4646 = vrcp.f32 %v1178_v42 }
 0x3df   : > { %4648 = vpow2.f32 %v1642_v50 }
 0x3e0   : > { %4650 = vpow2.f32 %v1755_v53 }
 0x3e1   : > { %v1986_v52 = vpop.xlane.xlu0 %1985  ;;  %4652 = vpow2.f32 %v1872_v55 }
 0x3e2   : > { %1531 = vrot.lane.b32.xlu1 %v1182_v26, %s5064_s20  ;;  %v1987_v56 = vsub.f32 %v5663_v6, %v1986_v52 }
 0x3e4   : > { %v1988_v45 = vmul.f32 1.442695, %v1987_v56 }
 0x3e6   : > { %4654 = vpow2.f32 %v1988_v45 }
 0x3eb   : > { %1297 = vrot.lane.b32.xlu0 %v1182_v26, %s5063_s23  ;;  %v4647_v43 = vpop.eup %4646 }
 0x3ec   : > { %v1180_v47 = vmul.f32 %v4647_v43, %v4639_v63  ;;  %v4649_v57 = vpop.eup %4648 }
 0x3ed   : > { %v5695_v54 = vpop.eup %4650  ;;  %v1644_v58 = vsel %vm1169_vm4, %v4649_v57, 0.0 }
 0x3ee   : > { %v1181_v48 = vpack.c.bf16 %v1180_v47, %v1180_v47  ;;  %v5698_v59 = vpop.eup %4652  ;;  %v1757_v60 = vsel %vm1169_vm4, %v5695_v54, 0.0 }
 0x3ef   : > { %v1874_v61 = vsel %vm1169_vm4, %v5698_v59, 0.0 }
 0x3f0   : > { %4203 = vmatmul.mubr.msk.bf16.vlgmr.msra.gmra.mxu1 %vm1169_vm4, %v1181_v48 }
 0x3f1   : > { %4214 = vmatprep.mubr.msk.bf16.mxu1 %vm5061_vm0, %v5060_v20 }
 0x3f3   : > { %v5704_v62 = vpop.eup %4654 }
 0x3f4   : > { %v1990_v63 = vsel %vm1169_vm4, %v5704_v62, 0.0 }
 0x406   : > { %1645 = vadd.xlane.f32.xlu1 %v1644_v58 }
 0x40a   : > { %1758 = vadd.xlane.f32.xlu1 %v1757_v60  ;;  %1875 = vadd.xlane.f32.xlu0 %v1874_v61 }
 0x40e   : > { %1991 = vadd.xlane.f32.xlu1 %v1990_v63 }
 0x41f   : > { %1880 = vrot.lane.b32.xlu1 %v1650_v1, %s5062_s12 }
 0x420   : > { %1764 = vrot.lane.b32.xlu0 %v1650_v1, %s5063_s23 }
 0x424   : > { %1996 = vrot.lane.b32.xlu0 %v1650_v1, %s5064_s20 }
 0x44e   : > { %v1292_v2 = vpop.xlane.xlu0 %1291 }
 0x44f   : > { %4656 = vrcp.f32 %v1292_v2 }
 0x456   : > { %v1410_v3 = vpop.xlane.xlu1 %1409 }
 0x457   : > { %4658 = vrcp.f32 %v1410_v3 }
 0x45a   : > { %v1415_v9 = vpop.permute.xlu1 %1414 }
 0x45b   : > { %v1420_v12 = vsel %vm1186_vm7, %v1415_v9, 0 }
 0x45c   : > { %v4657_v4 = vpop.eup %4656 }
 0x45d   : > { %v1294_v6 = vmul.f32 %v4657_v4, %v4641_v35 }
 0x45e   : > { %v1527_v5 = vpop.xlane.xlu0 %1526  ;;  %v1532_v14 = vpop.permute.xlu1 %1531 }
 0x45f   : > { %4660 = vrcp.f32 %v1527_v5  ;;  %v1295_v10 = vpack.c.bf16 %v1294_v6, %v1294_v6  ;;  %v1537_v21 = vsel %vm1186_vm7, %v1532_v14, 0 }
 0x462   : > { %v1298_v7 = vpop.permute.xlu0 %1297 }
 0x463   : > { %v1303_v8 = vsel %vm1186_vm7, %v1298_v7, 0 }
 0x464   : > { %4213 = vmatpush3.bf16.msra.mxu1 %v1303_v8  ;;  %v4659_v11 = vpop.eup %4658 }
 0x465   : > { %4224 = vmatprep.subr.bf16.mxu1 %v5060_v20  ;;  %v1412_v13 = vmul.f32 %v4659_v11, %v5677_v39 }
 0x467   : > { %4215 = vmatmul.mubr.msk.bf16.vlgmr.msra.gmra.mxu1 %vm1169_vm4, %v1295_v10  ;;  %v1413_v15 = vpack.c.bf16 %v1412_v13, %v1412_v13 }
 0x468   : > { %4225 = vmatpush3.bf16.msra.mxu1 %v1420_v12  ;;  %4226 = vmatprep.mubr.msk.bf16.mxu1 %vm5061_vm0, %v5060_v20 }
 0x469   : > { %4236 = vmatprep.subr.bf16.mxu1 %v5060_v20 }
 0x46c   : > { %v4661_v19 = vpop.eup %4660 }
 0x46d   : > { %v1529_v26 = vmul.f32 %v4661_v19, %v5681_v40 }
 0x46f   : > { %4227 = vmatmul.mubr.msk.bf16.vlgmr.msra.gmra.mxu1 %vm1169_vm4, %v1413_v15  ;;  %v1530_v27 = vpack.c.bf16 %v1529_v26, %v1529_v26 }
 0x470   : > { %4237 = vmatpush3.bf16.msra.mxu1 %v1537_v21  ;;  %4238 = vmatprep.mubr.msk.bf16.mxu1 %vm5061_vm0, %v5060_v20 }
 0x471   : > { %4248 = vmatprep.subr.bf16.mxu1 %v5060_v20 }
 0x477   : > { %4239 = vmatmul.mubr.msk.bf16.vlgmr.msra.gmra.mxu1 %vm1169_vm4, %v1530_v27 }
 0x478   : > { %4249 = vmatpush3.bf16.msra.mxu1 %v1655_v22  ;;  %4250 = vmatprep.mubr.msk.bf16.mxu1 %vm5061_vm0, %v5060_v20 }
 0x479   : > { %4260 = vmatprep.subr.bf16.mxu1 %v5060_v20 }
 0x48f   : > { %v1646_v28 = vpop.xlane.xlu1 %1645 }
 0x490   : > { %4662 = vrcp.f32 %v1646_v28 }
 0x493   : > { %v1759_v30 = vpop.xlane.xlu1 %1758  ;;  %v1876_v25 = vpop.xlane.xlu0 %1875 }
 0x494   : > { %4664 = vrcp.f32 %v1759_v30 }
 0x495   : > { %4666 = vrcp.f32 %v1876_v25 }
 0x497   : > { %v1765_v33 = vpop.permute.xlu0 %1764  ;;  %v1992_v36 = vpop.xlane.xlu1 %1991 }
 0x498   : > { %v1770_v38 = vsel %vm1186_vm7, %v1765_v33, 0  ;;  %4668 = vrcp.f32 %v1992_v36 }
 0x49b   : > { %v1881_v16 = vpop.permute.xlu1 %1880  ;;  %v1997_v42 = vpop.permute.xlu0 %1996 }
 0x49c   : > { %v1886_v41 = vsel %vm1186_vm7, %v1881_v16, 0  ;;  %v2002_v47 = vsel %vm1186_vm7, %v1997_v42, 0  ;;  %v4571_v16 = vld [vmem:[#allocation14 + $0x64] ss:$8 sps:$4 sm:$0xff]  }
 0x49d   : > { %v4663_v31 = vpop.eup %4662  ;;  %v4577_v42 = vld [vmem:[#allocation14 + $0x44] ss:$8 sps:$4 sm:$0xff]  }
 0x49e   : > { %v1648_v32 = vmul.f32 %v4663_v31, %v4649_v57 }
 0x4a0   : > { %v1649_v34 = vpack.c.bf16 %v1648_v32, %v1648_v32 }
 0x4a1   : > { %v4665_v35 = vpop.eup %4664 }
 0x4a2   : > { %4251 = vmatmul.mubr.msk.bf16.vlgmr.msra.gmra.mxu1 %vm1169_vm4, %v1649_v34  ;;  %v1761_v39 = vmul.f32 %v4665_v35, %v5695_v54  ;;  %v4667_v29 = vpop.eup %4666 }
 0x4a3   : > { %4261 = vmatpush3.bf16.msra.mxu1 %v1770_v38  ;;  %4262 = vmatprep.mubr.msk.bf16.mxu1 %vm5061_vm0, %v5060_v20  ;;  %v1878_v37 = vmul.f32 %v4667_v29, %v5698_v59  ;;  %v4566_v38 = vld [vmem:[#allocation14 + $0x70] ss:$8 sps:$4 sm:$0xff]   ;;  %v4569_v29 = vld [vmem:[#allocation14 + $0x60] ss:$8 sps:$4 sm:$0xff]  }
 0x4a4   : > { %4272 = vmatprep.subr.bf16.mxu1 %v5060_v20  ;;  %v1762_v40 = vpack.c.bf16 %v1761_v39, %v1761_v39  ;;  %v4568_v39 = vld [vmem:[#allocation14 + $0x74] ss:$8 sps:$4 sm:$0xff]  }
 0x4a5   : > { %v1879_v43 = vpack.c.bf16 %v1878_v37, %v1878_v37  ;;  %v4669_v44 = vpop.eup %4668  ;;  %v4572_v37 = vld [vmem:[#allocation14 + $0x50] ss:$8 sps:$4 sm:$0xff]  }
 0x4a6   : > { %v1994_v49 = vmul.f32 %v4669_v44, %v5704_v62  ;;  %v4581_v44 = vld [vmem:[#allocation14 + $0x34] ss:$8 sps:$4 sm:$0xff]  }
 0x4a8   : > { %v1995_v52 = vpack.c.bf16 %v1994_v49, %v1994_v49 }
 0x4aa   : > { %4263 = vmatmul.mubr.msk.bf16.vlgmr.msra.gmra.mxu1 %vm1169_vm4, %v1762_v40  ;;  %v4578_v40 = vld [vmem:[#allocation12 + $0x38] sm:$0xff]  }
 0x4ab   : > { %4273 = vmatpush3.bf16.msra.mxu1 %v1886_v41  ;;  %4274 = vmatprep.mubr.msk.bf16.mxu1 %vm5061_vm0, %v5060_v20  ;;  %v4574_v41 = vld [vmem:[#allocation14 + $0x54] ss:$8 sps:$4 sm:$0xff]  }
 0x4ac   : > { %4284 = vmatprep.subr.bf16.mxu1 %v5060_v20  ;;  %4291 = vmatpush3.bf16.msra.mxu0 %v4578_v40 }
 0x4ad   : > { %4292 = vmatprep.subr.bf16.mxu0 %v5060_v20 }
 0x4b0   : > { %v1224_v46 = vpop.f32.mrf.mxu1 }
 0x4b1   : > { %1230 = vst.msk [vmem:[#allocation2] sm:$0xff] %vm1118_vm1, %v1224_v46  ;;  %v4579_v46 = vld [vmem:[#allocation14 + $0x30] ss:$8 sps:$4 sm:$0xff]  }
 0x4b2   : > { %4275 = vmatmul.mubr.msk.bf16.vlgmr.msra.gmra.mxu1 %vm1169_vm4, %v1879_v43  ;;  %v4204_v48 = vpop.f32.mrf.mxu1  ;;  %v4575_v43 = vld [vmem:[#allocation14 + $0x40] ss:$8 sps:$4 sm:$0xff]  }
 0x4b3   : > { %4285 = vmatpush3.bf16.msra.mxu1 %v2002_v47  ;;  %4286 = vmatprep.mubr.msk.bf16.mxu1 %vm5061_vm0, %v5060_v20 }
 0x4b4   : > { %v1227_v50 = vpop.f32.mrf.mxu1  ;;  %2316 = vmatprep.subr.bf16.mxu1 %v4568_v39 }
 0x4b6   : > { %v4205_v51 = vpop.f32.mrf.mxu1 }
 0x4b7   : > { %v4585_v51 = vld [vmem:[#allocation14 + $0x24] ss:$8 sps:$4 sm:$0xff]  }
 0x4ba   : > { %4287 = vmatmul.mubr.msk.bf16.vlgmr.msra.gmra.mxu1 %vm1169_vm4, %v1995_v52  ;;  %v4583_v52 = vld [vmem:[#allocation14 + $0x20] ss:$8 sps:$4 sm:$0xff]  }
 0x4bb   : > { %2348 = vmatprep.mubr.bf16.mxu1 %v5059_v0  ;;  %2317 = vmatpush1.bf16.msra.mxu1 %v4566_v38 }
 0x4bc   : > { %2318 = vmatprep.subr.bf16.mxu1 %v4571_v16 }
 0x4bf   : > { %2319 = vmatpush1.bf16.msra.mxu1 %v4569_v29 }
 0x4c0   : > { %2320 = vmatprep.subr.bf16.mxu1 %v4574_v41 }
 0x4c3   : > { %2321 = vmatpush1.bf16.msra.mxu1 %v4572_v37 }
 0x4c4   : > { %2322 = vmatprep.subr.bf16.mxu1 %v4577_v42 }
 0x4c7   : > { %2323 = vmatpush1.bf16.msra.mxu1 %v4575_v43 }
 0x4c8   : > { %2324 = vmatprep.subr.bf16.mxu1 %v4581_v44 }
 0x4cb   : > { %2325 = vmatpush1.bf16.msra.mxu1 %v4579_v46 }
 0x4cc   : > { %2326 = vmatprep.subr.bf16.mxu1 %v4585_v51 }
 0x4cf   : > { %2327 = vmatpush1.bf16.msra.mxu1 %v4583_v52 }
 0x527   : > { %v1339_v53 = vpop.f32.mrf.mxu1 }
 0x528   : > { %1346 = vrot.lane.b32.xlu0 %v1339_v53, %s5064_s20  ;;  %v4586_v53 = vld [vmem:[#allocation12 + $0x28] sm:$0xff]  }
 0x529   : > { %v4216_v55 = vpop.f32.mrf.mxu1 }
 0x52a   : > { %v4589_v55 = vld [vmem:[#allocation14 + $0x14] ss:$8 sps:$4 sm:$0xff]  }
 0x52b   : > { %v1342_v56 = vpop.f32.mrf.mxu1  ;;  %2328 = vmatprep.subr.bf16.mxu1 %v4589_v55 }
 0x52c   : > { %v4587_v56 = vld [vmem:[#allocation14 + $0x10] ss:$8 sps:$4 sm:$0xff]  }
 0x52d   : > { %v4217_v45 = vpop.f32.mrf.mxu1  ;;  %2329 = vmatpush1.bf16.msra.mxu1 %v4587_v56 }
 0x52e   : > { %v4590_v45 = vld [vmem:[#allocation12 + $0x20] sm:$0xff]  }
 0x52f   : > { %v1456_v57 = vpop.f32.mrf.mxu1 }
 0x530   : > { %1463 = vrot.lane.b32.xlu0 %v1456_v57, %s5062_s12  ;;  %v4593_v57 = vld [vmem:[#allocation14 + $0x4] ss:$8 sps:$4 sm:$0xff]  }
 0x531   : > { %v4228_v54 = vpop.f32.mrf.mxu1  ;;  %2330 = vmatprep.subr.bf16.mxu1 %v4593_v57 }
 0x532   : > { %v4591_v54 = vld [vmem:[#allocation14] ss:$8 sps:$4 sm:$0xff]  }
 0x533   : > { %v1459_v58 = vpop.f32.mrf.mxu1  ;;  %2331 = vmatpush1.bf16.msra.mxu1 %v4591_v54 }
 0x534   : > { %v847_v58 = vld [vmem:[%s727_s13] sm:$0xff]  ;;  %4316 = vmatprep.subr.bf16.mxu1 %v5060_v20 }
 0x535   : > { %v4229_v59 = vpop.f32.mrf.mxu1 }
 0x536   : > { %v848_v59 = vld [vmem:[%s727_s13 + $0x8] sm:$0xff]  ;;  %s6192_s13 = sld [smem:[#allocation30_spill]] }
 0x537   : > { %v1573_v60 = vpop.f32.mrf.mxu1 }
 0x538   : > { %1580 = vrot.lane.b32.xlu0 %v1573_v60, %s5063_s23  ;;  %v4594_v60 = vld [vmem:[#allocation12 + $0x18] sm:$0xff]  }
 0x539   : > { %v4240_v61 = vpop.f32.mrf.mxu1 }
 0x53a   : > { %v2223_v61 = vpack.c.bf16 %v848_v59, %v847_v58 }
 0x53b   : > { %v1576_v62 = vpop.f32.mrf.mxu1 }
 0x53c   : > { %v4595_v62 = vld [vmem:[#allocation12 + $0x10] sm:$0xff]   ;;  %2349 = vmatmul.mubr.bf16.vlgmr.msra.gmra.mxu1 %v2223_v61  ;;  %p6194_p12 = scmp.ne.s32.totalorder %s6192_s13, 0 }
 0x53d   : > { %v4241_v63 = vpop.f32.mrf.mxu1  ;;  %4318 = vmatprep.mubr.msk.bf16.mxu1 %vm5061_vm0, %v5060_v20 }
 0x53e   : > { %v4596_v63 = vld [vmem:[#allocation12 + $0x8] sm:$0xff]  }
 0x562   : > { %v1691_v1 = vpop.f32.mrf.mxu1 }
 0x563   : > { %1697 = vst.msk [vmem:[#allocation2 + $0x8] sm:$0xff] %vm1118_vm1, %v1691_v1  ;;  %v4597_v1 = vld [vmem:[#allocation12] sm:$0xff]  }
 0x564   : > { %v4252_v2 = vpop.f32.mrf.mxu1 }
 0x566   : > { %v1694_v3 = vpop.f32.mrf.mxu1 }
 0x568   : > { %v4253_v4 = vpop.f32.mrf.mxu1 }
 0x56a   : > { %v1806_v5 = vpop.f32.mrf.mxu1 }
 0x56b   : > { %1813 = vrot.lane.b32.xlu1 %v1806_v5, %s5064_s20 }
 0x56c   : > { %v4264_v6 = vpop.f32.mrf.mxu1 }
 0x56e   : > { %v1809_v7 = vpop.f32.mrf.mxu1 }
 0x570   : > { %v4265_v8 = vpop.f32.mrf.mxu1 }
 0x572   : > { %v1922_v9 = vpop.f32.mrf.mxu1 }
 0x573   : > { %1929 = vrot.lane.b32.xlu1 %v1922_v9, %s5062_s12 }
 0x574   : > { %v4276_v10 = vpop.f32.mrf.mxu1 }
 0x575   : > { %v3980_v10 = vld [vmem:[%s6077_s6] ss:$0 sm:$0xff] }
 0x576   : > { %v1925_v11 = vpop.f32.mrf.mxu1 }
 0x578   : > { %v4277_v12 = vpop.f32.mrf.mxu1 }
 0x57a   : > { %v2038_v13 = vpop.f32.mrf.mxu1 }
 0x57b   : > { %2045 = vrot.lane.b32.xlu1 %v2038_v13, %s5063_s23 }
 0x57c   : > { %v4288_v14 = vpop.f32.mrf.mxu1 }
 0x57d   : > { %v3981_v14 = vld [vmem:[%s6078_s7] ss:$0 sm:$0xff] }
 0x57e   : > { %v2041_v15 = vpop.f32.mrf.mxu1 }
 0x580   : > { %v4289_v19 = vpop.f32.mrf.mxu1 }
 0x59a   : > { %v1347_v21 = vpop.permute.xlu0 %1346 }
 0x59b   : > { %1350 = vst.msk [vmem:[#allocation2] sm:$0xff] %vm1349_vm8, %v1347_v21 }
 0x5a2   : > { %v1464_v26 = vpop.permute.xlu0 %1463 }
 0x5a3   : > { %1467 = vst.msk [vmem:[#allocation2] sm:$0xff] %vm1466_vm9, %v1464_v26 }
 0x5aa   : > { %v1581_v27 = vpop.permute.xlu0 %1580 }
 0x5ab   : > { %1584 = vst.msk [vmem:[#allocation2] sm:$0xff] %vm1583_vm10, %v1581_v27  ;;  %v2224_v27 = vld [vmem:[%s6082_s11] sm:$0x3] }
 0x5b2   : > { %v2049_v22 = vld [vmem:[#allocation2] sm:$0xff] }
 0x5b3   : > { %v2051_v28 = vadd.f32 %v2049_v22, %v5512_v17  ;;  %v2229_v22 = vrot.slane %v2224_v27, %v5535_v24 }
 0x5b5   : > { %2053 = vadd.xlane.f32.xlu0 %v2051_v28 }
 0x5dd   : > { %v1814_v30 = vpop.permute.xlu1 %1813 }
 0x5de   : > { %1816 = vst.msk [vmem:[#allocation2 + $0x8] sm:$0xff] %vm1349_vm8, %v1814_v30 }
 0x5e5   : > { %v1930_v25 = vpop.permute.xlu1 %1929 }
 0x5e6   : > { %1932 = vst.msk [vmem:[#allocation2 + $0x8] sm:$0xff] %vm1466_vm9, %v1930_v25 }
 0x5ed   : > { %v2046_v31 = vpop.permute.xlu1 %2045 }
 0x5ee   : > { %2048 = vst.msk [vmem:[#allocation2 + $0x8] sm:$0xff] %vm1583_vm10, %v2046_v31 }
 0x5f5   : > { %v2050_v32 = vld [vmem:[#allocation2 + $0x8] sm:$0xff] }
 0x5f6   : > { %v2052_v33 = vadd.f32 %v2050_v32, %v5516_v18  ;;  %v4582_v18 = vld [vmem:[#allocation12 + $0x30] sm:$0xff]  }
 0x5f7   : > { %4293 = vmatpush3.bf16.msra.mxu0 %v4582_v18 }
 0x5f8   : > { %2055 = vadd.xlane.f32.xlu1 %v2052_v33  ;;  %4294 = vmatprep.subr.bf16.mxu0 %v5060_v20 }
 0x5fb   : > { %4295 = vmatpush3.bf16.msra.mxu0 %v4586_v53 }
 0x5fc   : > { %4296 = vmatprep.subr.bf16.mxu0 %v5060_v20  ;;  %v2350_v30 = vpop.f32.mrf.mxu1 }
 0x5fd   : > { %v2351_v25 = vadd.f32 %v2350_v30, %v2229_v22  ;;  %v852_v30 = vld [vmem:[%s5491_s1 + $0x2] sm:$0x3] }
 0x5fe   : > { %v2352_v31 = vpop.f32.mrf.mxu1  ;;  %vm2823_vm13 = vnez %v852_v30 }
 0x5ff   : > { %4297 = vmatpush3.bf16.msra.mxu0 %v4590_v45  ;;  %v2361_v32 = vpack.c.bf16 %v2351_v25, %v2351_v25 }
 0x600   : > { %4298 = vmatprep.subr.bf16.mxu0 %v5060_v20  ;;  %v2354_v37 = vpop.f32.mrf.mxu1 }
 0x601   : > { %v2355_v43 = vadd.f32 %v2354_v37, %v2229_v22 }
 0x603   : > { %4299 = vmatpush3.bf16.msra.mxu0 %v4594_v60  ;;  %v2825_v46 = vpack.c.bf16 %v2355_v43, %v2355_v43 }
 0x604   : > { %4300 = vmatprep.subr.bf16.mxu0 %v5060_v20 }
 0x605   : > { %v2830_v56 = vsel %vm1118_vm1, %v2825_v46, 0 }
 0x607   : > { %4301 = vmatpush3.bf16.msra.mxu0 %v4595_v62 }
 0x608   : > { %4302 = vmatprep.subr.bf16.mxu0 %v5060_v20 }
 0x609   : > { %2476 = vrot.lane.b32.xlu1 %v2361_v32, %s5063_s23 }
 0x60b   : > { %4303 = vmatpush3.bf16.msra.mxu0 %v4596_v63 }
 0x60c   : > { %4304 = vmatprep.subr.bf16.mxu0 %v5060_v20 }
 0x60d   : > { %2593 = vrot.lane.b32.xlu1 %v2361_v32, %s5062_s12 }
 0x60f   : > { %4305 = vmatpush3.bf16.msra.mxu0 %v4597_v1  ;;  %v851_v1 = vld [vmem:[%s5491_s1] sm:$0x3] }
 0x610   : > { %4310 = vmatprep.subr.bf16.mxu0 %v5060_v20  ;;  %vm2359_vm11 = vnez %v851_v1 }
 0x63e   : > { %v2054_v34 = vpop.xlane.xlu0 %2053 }
 0x63f   : > { %v2058_v35 = vmul.f32 0.0078125, %v2054_v34 }
 0x641   : > { %v5767_v36 = vsub.f32 %v2051_v28, %v2058_v35  ;;  %v5806_v28 = vrot.slane %v2224_v27, %v5532_v23  ;;  %v2366_v35 = vsel %vm1118_vm1, %v2361_v32, 0 }
 0x643   : > { %v2062_v17 = vmul.f32 %v5767_v36, %v5767_v36 }
 0x645   : > { %2064 = vadd.xlane.f32.xlu0 %v2062_v17  ;;  %v3982_v17 = vld [vmem:[%s6080_s9] ss:$0 sm:$0xff] }
 0x681   : > { %v2056_v47 = vpop.xlane.xlu1 %2055 }
 0x682   : > { %v2059_v48 = vmul.f32 0.0078125, %v2056_v47 }
 0x684   : > { %v2061_v49 = vsub.f32 %v2052_v33, %v2059_v48  ;;  %v2353_v33 = vadd.f32 %v2352_v31, %v5806_v28 }
 0x685   : > { %v2477_v29 = vpop.permute.xlu1 %2476 }
 0x686   : > { %v2063_v50 = vmul.f32 %v2061_v49, %v2061_v49  ;;  %v5809_v34 = vpack.c.bf16 %v2353_v33, %v2353_v33  ;;  %v2482_v18 = vsel %vm1118_vm1, %v2477_v29, 0 }
 0x688   : > { %2066 = vadd.xlane.f32.xlu0 %v2063_v50 }
 0x689   : > { %v2594_v48 = vpop.permute.xlu1 %2593 }
 0x68a   : > { %v2599_v50 = vsel %vm1118_vm1, %v2594_v48, 0 }
 0x6ce   : > { %v2065_v2 = vpop.xlane.xlu0 %2064 }
 0x6cf   : > { %v2068_v3 = vmul.f32 0.0078125, %v2065_v2  ;;  %v2408_v2 = vsel %vm2359_vm11, 16843009, %v5059_v0 }
 0x6d1   : > { %v2070_v4 = vadd.f32 1e-05, %v2068_v3  ;;  %v2409_v3 = vunpack.c.0.s8 %v2408_v2 }
 0x6d3   : > { %4670 = vrsqrt.f32 %v2070_v4  ;;  %vm5869_vm12 = vcmp.ne.s32.totalorder %v2409_v3, 0 }
 0x6e0   : > { %v4671_v8 = vpop.eup %4670 }
 0x6e1   : > { %v2074_v9 = vmul.f32 %v4671_v8, %v5767_v36  ;;  %v2429_v36 = vsel %vm1186_vm7, %v5809_v34, 0 }
 0x6e2   : > { %4317 = vmatpush3.bf16.msra.mxu1 %v2429_v36 }
 0x6e3   : > { %v2083_v13 = vmul.f32 %v3980_v10, %v2074_v9  ;;  %4328 = vmatprep.subr.bf16.mxu1 %v5060_v20 }
 0x6e5   : > { %v5793_v19 = vadd.f32 %v3981_v14, %v2083_v13 }
 0x711   : > { %v2067_v5 = vpop.xlane.xlu0 %2066 }
 0x712   : > { %v2069_v6 = vmul.f32 0.0078125, %v2067_v5 }
 0x714   : > { %v2071_v7 = vadd.f32 1e-05, %v2069_v6 }
 0x716   : > { %4672 = vrsqrt.f32 %v2071_v7 }
 0x723   : > { %v4673_v11 = vpop.eup %4672 }
 0x724   : > { %v2075_v12 = vmul.f32 %v4673_v11, %v2061_v49 }
 0x726   : > { %v2084_v15 = vmul.f32 %v3980_v10, %v2075_v12 }
 0x728   : > { %v5795_v21 = vadd.f32 %v3981_v14, %v2084_v15 }
 0x72a   : > { %v2110_v26 = vpack.c.bf16 %v5795_v21, %v5793_v19 }
 0x72c   : > { %4307 = vmatmul.mubr.bf16.vlgmr.msra.gmra.mxu0 %v2110_v26 }
 0x72d   : > { %4312 = vmatprep.mubr.msk.bf16.mxu0 %vm5061_vm0, %v5060_v20  ;;  %4311 = vmatpush3.bf16.xpose.msra.mxu0 %v2366_v35  ;;  %v2872_v35 = vsel %vm2823_vm13, 16843009, %v5059_v0 }
 0x72e   : > { %4322 = vmatprep.subr.bf16.mxu0 %v5060_v20 }
 0x7ec   : > { %v2200_v38 = vpop.f32.mrf.mxu0 }
 0x7ed   : > { %v2201_v39 = vadd.f32 %v3982_v17, %v2200_v38 }
 0x7ee   : > { %v4308_v16 = vpop.f32.mrf.mxu0 }
 0x7ef   : > { %v2360_v40 = vpack.c.bf16 %v2201_v39, %v2201_v39  ;;  %v2873_v16 = vunpack.c.0.s8 %v2872_v35 }
 0x7f0   : > { %v2203_v41 = vpop.f32.mrf.mxu0 }
 0x7f1   : > { %2591 = vrot.lane.b32.xlu1 %v2360_v40, %s5062_s12  ;;  %2473 = vrot.lane.b32.xlu0 %v2360_v40, %s5063_s23  ;;  %v2204_v44 = vadd.f32 %v3982_v17, %v2203_v41  ;;  %vm5887_vm14 = vcmp.ne.s32.totalorder %v2873_v16, 0 }
 0x7f2   : > { %4313 = vmatmul.mubr.msk.bf16.vlgmr.msra.gmra.mxu0 %vm1118_vm1, %v2360_v40  ;;  %v4309_v42 = vpop.f32.mrf.mxu0 }
 0x7f3   : > { %4323 = vmatpush3.bf16.xpose.msra.mxu0 %v2482_v18  ;;  %4324 = vmatprep.mubr.msk.bf16.mxu0 %vm5061_vm0, %v5060_v20  ;;  %v2824_v47 = vpack.c.bf16 %v2204_v44, %v2204_v44 }
 0x7f4   : > { %4334 = vmatprep.subr.bf16.mxu0 %v5060_v20 }
 0x7f5   : > { %2707 = vrot.lane.b32.xlu1 %v2360_v40, %s5064_s20  ;;  %2709 = vrot.lane.b32.xlu0 %v2361_v32, %s5064_s20 }
 0x7f9   : > { %2940 = vrot.lane.b32.xlu0 %v2825_v46, %s5063_s23  ;;  %2937 = vrot.lane.b32.xlu1 %v2824_v47, %s5063_s23 }
 0x7fd   : > { %3057 = vrot.lane.b32.xlu0 %v2825_v46, %s5062_s12  ;;  %3055 = vrot.lane.b32.xlu1 %v2824_v47, %s5062_s12 }
 0x801   : > { %3173 = vrot.lane.b32.xlu0 %v2825_v46, %s5064_s20  ;;  %3171 = vrot.lane.b32.xlu1 %v2824_v47, %s5064_s20 }
 0x863   : > { %v2474_v49 = vpop.permute.xlu0 %2473  ;;  %v2592_v52 = vpop.permute.xlu1 %2591 }
 0x864   : > { %4325 = vmatmul.mubr.msk.bf16.vlgmr.msra.gmra.mxu0 %vm1118_vm1, %v2474_v49 }
 0x865   : > { %4335 = vmatpush3.bf16.xpose.msra.mxu0 %v2599_v50  ;;  %4336 = vmatprep.mubr.msk.bf16.mxu0 %vm5061_vm0, %v5060_v20 }
 0x866   : > { %4346 = vmatprep.subr.bf16.mxu0 %v5060_v20 }
 0x867   : > { %v2710_v51 = vpop.permute.xlu0 %2709  ;;  %v2708_v55 = vpop.permute.xlu1 %2707 }
 0x868   : > { %v2715_v53 = vsel %vm1118_vm1, %v2710_v51, 0 }
 0x86b   : > { %v2941_v45 = vpop.permute.xlu0 %2940  ;;  %v2938_v58 = vpop.permute.xlu1 %2937 }
 0x86c   : > { %4337 = vmatmul.mubr.msk.bf16.vlgmr.msra.gmra.mxu0 %vm1118_vm1, %v2592_v52  ;;  %v2946_v57 = vsel %vm1118_vm1, %v2941_v45, 0 }
 0x86d   : > { %4347 = vmatpush3.bf16.xpose.msra.mxu0 %v2715_v53  ;;  %4348 = vmatprep.mubr.msk.bf16.mxu0 %vm5061_vm0, %v5060_v20 }
 0x86e   : > { %4358 = vmatprep.subr.bf16.mxu0 %v5060_v20 }
 0x86f   : > { %v3058_v54 = vpop.permute.xlu0 %3057  ;;  %v3056_v61 = vpop.permute.xlu1 %3055 }
 0x870   : > { %v3063_v59 = vsel %vm1118_vm1, %v3058_v54, 0 }
 0x873   : > { %v3174_v60 = vpop.permute.xlu0 %3173  ;;  %v3172_v63 = vpop.permute.xlu1 %3171 }
 0x874   : > { %4349 = vmatmul.mubr.msk.bf16.vlgmr.msra.gmra.mxu0 %vm1118_vm1, %v2708_v55  ;;  %v3179_v62 = vsel %vm1118_vm1, %v3174_v60, 0 }
 0x875   : > { %4359 = vmatpush3.bf16.xpose.msra.mxu0 %v2830_v56  ;;  %4360 = vmatprep.mubr.msk.bf16.mxu0 %vm5061_vm0, %v5060_v20 }
 0x876   : > { %4370 = vmatprep.subr.bf16.mxu0 %v5060_v20 }
 0x87c   : > { %4361 = vmatmul.mubr.msk.bf16.vlgmr.msra.gmra.mxu0 %vm1118_vm1, %v2824_v47 }
 0x87d   : > { %4371 = vmatpush3.bf16.xpose.msra.mxu0 %v2946_v57  ;;  %4372 = vmatprep.mubr.msk.bf16.mxu0 %vm5061_vm0, %v5060_v20 }
 0x87e   : > { %4382 = vmatprep.subr.bf16.mxu0 %v5060_v20 }
 0x884   : > { %4373 = vmatmul.mubr.msk.bf16.vlgmr.msra.gmra.mxu0 %vm1118_vm1, %v2938_v58 }
 0x885   : > { %4383 = vmatpush3.bf16.xpose.msra.mxu0 %v3063_v59  ;;  %4384 = vmatprep.mubr.msk.bf16.mxu0 %vm5061_vm0, %v5060_v20 }
 0x886   : > { %4394 = vmatprep.subr.bf16.mxu0 %v5060_v20 }
 0x88c   : > { %4385 = vmatmul.mubr.msk.bf16.vlgmr.msra.gmra.mxu0 %vm1118_vm1, %v3056_v61 }
 0x88d   : > { %4395 = vmatpush3.bf16.xpose.msra.mxu0 %v3179_v62  ;;  %4396 = vmatprep.mubr.msk.bf16.mxu0 %vm5061_vm0, %v5060_v20 }
 0x894   : > { %4397 = vmatmul.mubr.msk.bf16.vlgmr.msra.gmra.mxu0 %vm1118_vm1, %v3172_v63 }
 0x895   : > { %3472 = vmatprep.mubr.bf16.mxu0 %v5059_v0 }
 0x8b2   : > { %v2402_v5 = vpop.f32.mrf.mxu0 }
 0x8b3   : > { %v2411_v6 = vsel %vm5869_vm12, 1e-10, %v2402_v5 }
 0x8b4   : > { %v4314_v7 = vpop.f32.mrf.mxu0  ;;  %v2412_v8 = vsel %vm1169_vm4, %v2411_v6, -inf }
 0x8b5   : > { %2413 = vmax.xlane.f32.xlu0 %v2412_v8 }
 0x8b6   : > { %v2405_v9 = vpop.f32.mrf.mxu0 }
 0x8b8   : > { %v4315_v10 = vpop.f32.mrf.mxu0 }
 0x924   : > { %v2518_v11 = vpop.f32.mrf.mxu0 }
 0x925   : > { %v2524_v12 = vsel %vm5869_vm12, 1e-10, %v2518_v11 }
 0x926   : > { %v4326_v13 = vpop.f32.mrf.mxu0  ;;  %v2525_v14 = vsel %vm1169_vm4, %v2524_v12, -inf }
 0x927   : > { %2526 = vmax.xlane.f32.xlu1 %v2525_v14 }
 0x928   : > { %v2521_v15 = vpop.f32.mrf.mxu0 }
 0x92a   : > { %v4327_v26 = vpop.f32.mrf.mxu0 }
 0x92c   : > { %v2635_v27 = vpop.f32.mrf.mxu0 }
 0x92d   : > { %v2641_v22 = vsel %vm5869_vm12, 1e-10, %v2635_v27 }
 0x92e   : > { %v4338_v25 = vpop.f32.mrf.mxu0  ;;  %v2642_v31 = vsel %vm1169_vm4, %v2641_v22, -inf }
 0x92f   : > { %2643 = vmax.xlane.f32.xlu0 %v2642_v31 }
 0x930   : > { %v2638_v32 = vpop.f32.mrf.mxu0 }
 0x932   : > { %v4339_v33 = vpop.f32.mrf.mxu0 }
 0x934   : > { %v2751_v36 = vpop.f32.mrf.mxu0 }
 0x935   : > { %v2757_v17 = vsel %vm5869_vm12, 1e-10, %v2751_v36 }
 0x936   : > { %v4350_v38 = vpop.f32.mrf.mxu0  ;;  %v2758_v39 = vsel %vm1169_vm4, %v2757_v17, -inf }
 0x937   : > { %2759 = vmax.xlane.f32.xlu0 %v2758_v39 }
 0x938   : > { %v2754_v40 = vpop.f32.mrf.mxu0 }
 0x93a   : > { %v4351_v29 = vpop.f32.mrf.mxu0 }
 0x93c   : > { %v2866_v18 = vpop.f32.mrf.mxu0 }
 0x93d   : > { %v5893_v37 = vsel %vm5887_vm14, 1e-10, %v2866_v18 }
 0x93e   : > { %v2414_v0 = vpop.xlane.xlu0 %2413  ;;  %v4362_v42 = vpop.f32.mrf.mxu0  ;;  %v2876_v43 = vsel %vm1169_vm4, %v5893_v37, -inf }
 0x93f   : > { %v2415_v44 = vsub.f32 %v2411_v6, %v2414_v0  ;;  %2877 = vmax.xlane.f32.xlu1 %v2876_v43 }
 0x940   : > { %v2869_v46 = vpop.f32.mrf.mxu0 }
 0x941   : > { %v2416_v47 = vmul.f32 1.442695, %v2415_v44 }
 0x942   : > { %v4363_v48 = vpop.f32.mrf.mxu0 }
 0x943   : > { %4674 = vpow2.f32 %v2416_v47 }
 0x944   : > { %v2982_v49 = vpop.f32.mrf.mxu0 }
 0x945   : > { %v2988_v50 = vsel %vm5887_vm14, 1e-10, %v2982_v49 }
 0x946   : > { %v4374_v51 = vpop.f32.mrf.mxu0  ;;  %v2989_v52 = vsel %vm1169_vm4, %v2988_v50, -inf }
 0x947   : > { %2990 = vmax.xlane.f32.xlu0 %v2989_v52 }
 0x948   : > { %v2985_v53 = vpop.f32.mrf.mxu0 }
 0x94a   : > { %v4375_v55 = vpop.f32.mrf.mxu0 }
 0x94c   : > { %v3099_v56 = vpop.f32.mrf.mxu0 }
 0x94d   : > { %v3105_v45 = vsel %vm5887_vm14, 1e-10, %v3099_v56 }
 0x94e   : > { %v4386_v57 = vpop.f32.mrf.mxu0  ;;  %v3106_v54 = vsel %vm1169_vm4, %v3105_v45, -inf }
 0x94f   : > { %3107 = vmax.xlane.f32.xlu1 %v3106_v54 }
 0x950   : > { %v4675_v58 = vpop.eup %4674  ;;  %v3102_v59 = vpop.f32.mrf.mxu0 }
 0x951   : > { %v2418_v61 = vsel %vm1169_vm4, %v4675_v58, 0.0 }
 0x952   : > { %v4387_v60 = vpop.f32.mrf.mxu0 }
 0x953   : > { %2419 = vadd.xlane.f32.xlu1 %v2418_v61 }
 0x954   : > { %v3215_v62 = vpop.f32.mrf.mxu0 }
 0x955   : > { %v3221_v63 = vsel %vm5887_vm14, 1e-10, %v3215_v62 }
 0x956   : > { %v4398_v1 = vpop.f32.mrf.mxu0  ;;  %v3222_v2 = vsel %vm1169_vm4, %v3221_v63, -inf }
 0x957   : > { %3223 = vmax.xlane.f32.xlu0 %v3222_v2 }
 0x958   : > { %v3218_v3 = vpop.f32.mrf.mxu0 }
 0x95a   : > { %v4399_v4 = vpop.f32.mrf.mxu0 }
 0x9b0   : > { %v2527_v5 = vpop.xlane.xlu1 %2526 }
 0x9b1   : > { %v2528_v6 = vsub.f32 %v2524_v12, %v2527_v5 }
 0x9b3   : > { %v2529_v7 = vmul.f32 1.442695, %v2528_v6 }
 0x9b5   : > { %4676 = vpow2.f32 %v2529_v7 }
 0x9b8   : > { %v2644_v8 = vpop.xlane.xlu0 %2643 }
 0x9b9   : > { %v2645_v9 = vsub.f32 %v2641_v22, %v2644_v8 }
 0x9bb   : > { %v2646_v10 = vmul.f32 1.442695, %v2645_v9 }
 0x9bd   : > { %4678 = vpow2.f32 %v2646_v10 }
 0x9c0   : > { %v2760_v11 = vpop.xlane.xlu0 %2759 }
 0x9c1   : > { %v2761_v13 = vsub.f32 %v2757_v17, %v2760_v11 }
 0x9c2   : > { %v4677_v14 = vpop.eup %4676 }
 0x9c3   : > { %v2762_v15 = vmul.f32 1.442695, %v2761_v13  ;;  %v2531_v26 = vsel %vm1169_vm4, %v4677_v14, 0.0 }
 0x9c4   : > { %2532 = vadd.xlane.f32.xlu0 %v2531_v26 }
 0x9c5   : > { %4680 = vpow2.f32 %v2762_v15 }
 0x9c8   : > { %v2878_v25 = vpop.xlane.xlu1 %2877 }
 0x9c9   : > { %v2879_v35 = vsub.f32 %v5893_v37, %v2878_v25 }
 0x9ca   : > { %v5908_v27 = vpop.eup %4678 }
 0x9cb   : > { %v2648_v30 = vsel %vm1169_vm4, %v5908_v27, 0.0  ;;  %v2880_v16 = vmul.f32 1.442695, %v2879_v35 }
 0x9cc   : > { %2649 = vadd.xlane.f32.xlu1 %v2648_v30 }
 0x9d0   : > { %v2991_v36 = vpop.xlane.xlu0 %2990 }
 0x9d1   : > { %v2992_v39 = vsub.f32 %v2988_v50, %v2991_v36  ;;  %v2356_v50 = vpop.f32.mrf.mxu1 }
 0x9d2   : > { %v5912_v12 = vpop.eup %4680  ;;  %v2357_v51 = vadd.f32 %v2356_v50, %v5806_v28 }
 0x9d3   : > { %v2764_v22 = vsel %vm1169_vm4, %v5912_v12, 0.0  ;;  %v2993_v41 = vmul.f32 1.442695, %v2992_v39 }
 0x9d4   : > { %2765 = vadd.xlane.f32.xlu0 %v2764_v22  ;;  %v2888_v52 = vpack.c.bf16 %v2357_v51, %v2357_v51 }
 0x9d6   : > { %v2893_v6 = vsel %vm1186_vm7, %v2888_v52, 0 }
 0x9d8   : > { %v3108_v31 = vpop.xlane.xlu1 %3107 }
 0x9d9   : > { %v3109_v40 = vsub.f32 %v3105_v45, %v3108_v31 }
 0x9db   : > { %v3110_v18 = vmul.f32 1.442695, %v3109_v40 }
 0x9dc   : > { %v2420_v32 = vpop.xlane.xlu1 %2419 }
 0x9dd   : > { %2654 = vrot.lane.b32.xlu1 %v5809_v34, %s5062_s12  ;;  %4682 = vrcp.f32 %v2420_v32 }
 0x9de   : > { %4684 = vpow2.f32 %v2880_v16 }
 0x9df   : > { %4686 = vpow2.f32 %v2993_v41 }
 0x9e0   : > { %v3224_v29 = vpop.xlane.xlu0 %3223  ;;  %4688 = vpow2.f32 %v3110_v18 }
 0x9e1   : > { %2770 = vrot.lane.b32.xlu1 %v5809_v34, %s5064_s20  ;;  %v3225_v0 = vsub.f32 %v3221_v63, %v3224_v29 }
 0x9ea   : > { %2538 = vrot.lane.b32.xlu0 %v5809_v34, %s5063_s23  ;;  %v4683_v33 = vpop.eup %4682  ;;  %v3226_v34 = vmul.f32 1.442695, %v3225_v0 }
 0x9eb   : > { %v2422_v17 = vmul.f32 %v4683_v33, %v4675_v58  ;;  %v4685_v37 = vpop.eup %4684 }
 0x9ec   : > { %4690 = vpow2.f32 %v3226_v34  ;;  %v5926_v42 = vpop.eup %4686  ;;  %v2882_v43 = vsel %vm1169_vm4, %v4685_v37, 0.0 }
 0x9ed   : > { %v2423_v38 = vpack.c.bf16 %v2422_v17, %v2422_v17  ;;  %v5929_v44 = vpop.eup %4688  ;;  %v2995_v46 = vsel %vm1169_vm4, %v5926_v42, 0.0 }
 0x9ee   : > { %v3112_v47 = vsel %vm1169_vm4, %v5929_v44, 0.0 }
 0x9ef   : > { %4319 = vmatmul.mubr.msk.bf16.vlgmr.msra.gmra.mxu1 %vm1169_vm4, %v2423_v38 }
 0x9f0   : > { %4330 = vmatprep.mubr.msk.bf16.mxu1 %vm5061_vm0, %v5060_v20 }
 0x9f9   : > { %v5935_v48 = vpop.eup %4690 }
 0x9fa   : > { %v3228_v49 = vsel %vm1169_vm4, %v5935_v48, 0.0 }
 0xa05   : > { %2883 = vadd.xlane.f32.xlu1 %v2882_v43 }
 0xa09   : > { %2996 = vadd.xlane.f32.xlu1 %v2995_v46  ;;  %3113 = vadd.xlane.f32.xlu0 %v3112_v47 }
 0xa0d   : > { %3229 = vadd.xlane.f32.xlu1 %v3228_v49 }
 0xa1e   : > { %3118 = vrot.lane.b32.xlu1 %v2888_v52, %s5062_s12 }
 0xa1f   : > { %3002 = vrot.lane.b32.xlu0 %v2888_v52, %s5063_s23 }
 0xa23   : > { %3234 = vrot.lane.b32.xlu0 %v2888_v52, %s5064_s20 }
 0xa4d   : > { %v2533_v53 = vpop.xlane.xlu0 %2532 }
 0xa4e   : > { %4692 = vrcp.f32 %v2533_v53 }
 0xa55   : > { %v2650_v55 = vpop.xlane.xlu1 %2649 }
 0xa56   : > { %4694 = vrcp.f32 %v2650_v55 }
 0xa59   : > { %v2655_v59 = vpop.permute.xlu1 %2654 }
 0xa5a   : > { %v2660_v61 = vsel %vm1186_vm7, %v2655_v59, 0 }
 0xa5b   : > { %v4693_v56 = vpop.eup %4692 }
 0xa5c   : > { %v2535_v57 = vmul.f32 %v4693_v56, %v4677_v14 }
 0xa5d   : > { %v2766_v45 = vpop.xlane.xlu0 %2765  ;;  %v2771_v63 = vpop.permute.xlu1 %2770 }
 0xa5e   : > { %4696 = vrcp.f32 %v2766_v45  ;;  %v2536_v28 = vpack.c.bf16 %v2535_v57, %v2535_v57  ;;  %v2776_v3 = vsel %vm1186_vm7, %v2771_v63, 0 }
 0xa61   : > { %v2539_v54 = vpop.permute.xlu0 %2538 }
 0xa62   : > { %v2544_v58 = vsel %vm1186_vm7, %v2539_v54, 0 }
 0xa63   : > { %4329 = vmatpush3.bf16.msra.mxu1 %v2544_v58  ;;  %v4695_v60 = vpop.eup %4694 }
 0xa64   : > { %4340 = vmatprep.subr.bf16.mxu1 %v5060_v20  ;;  %v2652_v62 = vmul.f32 %v4695_v60, %v5908_v27 }
 0xa66   : > { %4331 = vmatmul.mubr.msk.bf16.vlgmr.msra.gmra.mxu1 %vm1169_vm4, %v2536_v28  ;;  %v2653_v1 = vpack.c.bf16 %v2652_v62, %v2652_v62 }
 0xa67   : > { %4341 = vmatpush3.bf16.msra.mxu1 %v2660_v61  ;;  %4342 = vmatprep.mubr.msk.bf16.mxu1 %vm5061_vm0, %v5060_v20 }
 0xa68   : > { %4352 = vmatprep.subr.bf16.mxu1 %v5060_v20 }
 0xa6b   : > { %v4697_v2 = vpop.eup %4696 }
 0xa6c   : > { %v2768_v4 = vmul.f32 %v4697_v2, %v5912_v12 }
 0xa6e   : > { %4343 = vmatmul.mubr.msk.bf16.vlgmr.msra.gmra.mxu1 %vm1169_vm4, %v2653_v1  ;;  %v2769_v5 = vpack.c.bf16 %v2768_v4, %v2768_v4 }
 0xa6f   : > { %4353 = vmatpush3.bf16.msra.mxu1 %v2776_v3  ;;  %4354 = vmatprep.mubr.msk.bf16.mxu1 %vm5061_vm0, %v5060_v20 }
 0xa70   : > { %4364 = vmatprep.subr.bf16.mxu1 %v5060_v20 }
 0xa76   : > { %4355 = vmatmul.mubr.msk.bf16.vlgmr.msra.gmra.mxu1 %vm1169_vm4, %v2769_v5 }
 0xa77   : > { %4365 = vmatpush3.bf16.msra.mxu1 %v2893_v6  ;;  %4366 = vmatprep.mubr.msk.bf16.mxu1 %vm5061_vm0, %v5060_v20 }
 0xa78   : > { %4376 = vmatprep.subr.bf16.mxu1 %v5060_v20 }
 0xa8e   : > { %v2884_v7 = vpop.xlane.xlu1 %2883 }
 0xa8f   : > { %4698 = vrcp.f32 %v2884_v7 }
 0xa92   : > { %v2997_v8 = vpop.xlane.xlu1 %2996  ;;  %v3114_v9 = vpop.xlane.xlu0 %3113 }
 0xa93   : > { %4700 = vrcp.f32 %v2997_v8 }
 0xa94   : > { %4702 = vrcp.f32 %v3114_v9 }
 0xa96   : > { %v3003_v13 = vpop.permute.xlu0 %3002  ;;  %v3230_v26 = vpop.xlane.xlu1 %3229 }
 0xa97   : > { %v3008_v27 = vsel %vm1186_vm7, %v3003_v13, 0  ;;  %4704 = vrcp.f32 %v3230_v26  ;;  %v4600_v26 = vld [vmem:[#allocation15 + $0x74] ss:$8 sps:$4 sm:$0xff]  }
 0xa98   : > { %3440 = vmatprep.subr.bf16.mxu0 %v4600_v26 }
 0xa9a   : > { %v3119_v12 = vpop.permute.xlu1 %3118  ;;  %v3235_v33 = vpop.permute.xlu0 %3234 }
 0xa9b   : > { %v3124_v31 = vsel %vm1186_vm7, %v3119_v12, 0  ;;  %v3240_v38 = vsel %vm1186_vm7, %v3235_v33, 0  ;;  %v4607_v33 = vld [vmem:[#allocation15 + $0x40] ss:$8 sps:$4 sm:$0xff]  }
 0xa9c   : > { %v4699_v10 = vpop.eup %4698 }
 0xa9d   : > { %v2886_v11 = vmul.f32 %v4699_v10, %v4685_v37 }
 0xa9f   : > { %v2887_v14 = vpack.c.bf16 %v2886_v11, %v2886_v11 }
 0xaa0   : > { %v4701_v15 = vpop.eup %4700 }
 0xaa1   : > { %4367 = vmatmul.mubr.msk.bf16.vlgmr.msra.gmra.mxu1 %vm1169_vm4, %v2887_v14  ;;  %v2999_v30 = vmul.f32 %v4701_v15, %v5926_v42  ;;  %v4703_v25 = vpop.eup %4702  ;;  %v4598_v15 = vld [vmem:[#allocation15 + $0x70] ss:$8 sps:$4 sm:$0xff]  }
 0xaa2   : > { %4377 = vmatpush3.bf16.msra.mxu1 %v3008_v27  ;;  %4378 = vmatprep.mubr.msk.bf16.mxu1 %vm5061_vm0, %v5060_v20  ;;  %v3116_v32 = vmul.f32 %v4703_v25, %v5929_v44  ;;  %v4603_v27 = vld [vmem:[#allocation15 + $0x64] ss:$8 sps:$4 sm:$0xff]  }
 0xaa3   : > { %4388 = vmatprep.subr.bf16.mxu1 %v5060_v20  ;;  %v3000_v22 = vpack.c.bf16 %v2999_v30, %v2999_v30  ;;  %3441 = vmatpush1.bf16.msra.mxu0 %v4598_v15  ;;  %v4601_v30 = vld [vmem:[#allocation15 + $0x60] ss:$8 sps:$4 sm:$0xff]  }
 0xaa4   : > { %v3117_v35 = vpack.c.bf16 %v3116_v32, %v3116_v32  ;;  %v4705_v36 = vpop.eup %4704  ;;  %3442 = vmatprep.subr.bf16.mxu0 %v4603_v27  ;;  %v4604_v32 = vld [vmem:[#allocation15 + $0x50] ss:$8 sps:$4 sm:$0xff]  }
 0xaa5   : > { %v3232_v16 = vmul.f32 %v4705_v36, %v5935_v48  ;;  %v4612_v36 = vld [vmem:[#allocation15 + $0x34] ss:$8 sps:$4 sm:$0xff]  }
 0xaa7   : > { %v3233_v41 = vpack.c.bf16 %v3232_v16, %v3232_v16  ;;  %3443 = vmatpush1.bf16.msra.mxu0 %v4601_v30  ;;  %v4618_v16 = vld [vmem:[#allocation15 + $0x14] ss:$8 sps:$4 sm:$0xff]  }
 0xaa9   : > { %4379 = vmatmul.mubr.msk.bf16.vlgmr.msra.gmra.mxu1 %vm1169_vm4, %v3000_v22 }
 0xaaa   : > { %4389 = vmatpush3.bf16.msra.mxu1 %v3124_v31  ;;  %4390 = vmatprep.mubr.msk.bf16.mxu1 %vm5061_vm0, %v5060_v20  ;;  %v4606_v31 = vld [vmem:[#allocation15 + $0x54] ss:$8 sps:$4 sm:$0xff]  }
 0xaab   : > { %4400 = vmatprep.subr.bf16.mxu1 %v5060_v20  ;;  %3444 = vmatprep.subr.bf16.mxu0 %v4606_v31 }
 0xaac   : > { %3445 = vmatpush1.bf16.msra.mxu0 %v4604_v32 }
 0xaaf   : > { %v2465_v17 = vpop.f32.mrf.mxu1 }
 0xab0   : > { %2471 = vst.msk [vmem:[#allocation2] sm:$0xff] %vm1118_vm1, %v2465_v17  ;;  %v4610_v17 = vld [vmem:[#allocation15 + $0x30] ss:$8 sps:$4 sm:$0xff]  }
 0xab1   : > { %4391 = vmatmul.mubr.msk.bf16.vlgmr.msra.gmra.mxu1 %vm1169_vm4, %v3117_v35  ;;  %v4320_v39 = vpop.f32.mrf.mxu1  ;;  %v4609_v35 = vld [vmem:[#allocation15 + $0x44] ss:$8 sps:$4 sm:$0xff]  }
 0xab2   : > { %4401 = vmatpush3.bf16.msra.mxu1 %v3240_v38  ;;  %4402 = vmatprep.mubr.msk.bf16.mxu1 %vm5061_vm0, %v5060_v20  ;;  %v4615_v38 = vld [vmem:[#allocation15 + $0x24] ss:$8 sps:$4 sm:$0xff]   ;;  %v4613_v39 = vld [vmem:[#allocation15 + $0x20] ss:$8 sps:$4 sm:$0xff]  }
 0xab3   : > { %v2468_v40 = vpop.f32.mrf.mxu1  ;;  %3446 = vmatprep.subr.bf16.mxu0 %v4609_v35 }
 0xab4   : > { %3447 = vmatpush1.bf16.msra.mxu0 %v4607_v33  ;;  %v4616_v40 = vld [vmem:[#allocation15 + $0x10] ss:$8 sps:$4 sm:$0xff]  }
 0xab5   : > { %v4321_v29 = vpop.f32.mrf.mxu1  ;;  %3448 = vmatprep.subr.bf16.mxu0 %v4612_v36 }
 0xab6   : > { %v4621_v29 = vld [vmem:[#allocation15 + $0x4] ss:$8 sps:$4 sm:$0xff]  }
 0xab8   : > { %3449 = vmatpush1.bf16.msra.mxu0 %v4610_v17 }
 0xab9   : > { %4403 = vmatmul.mubr.msk.bf16.vlgmr.msra.gmra.mxu1 %vm1169_vm4, %v3233_v41  ;;  %3450 = vmatprep.subr.bf16.mxu0 %v4615_v38  ;;  %v4619_v41 = vld [vmem:[#allocation15] ss:$8 sps:$4 sm:$0xff]  }
 0xabc   : > { %3451 = vmatpush1.bf16.msra.mxu0 %v4613_v39 }
 0xabd   : > { %3452 = vmatprep.subr.bf16.mxu0 %v4618_v16 }
 0xac0   : > { %3453 = vmatpush1.bf16.msra.mxu0 %v4616_v40 }
 0xac1   : > { %3454 = vmatprep.subr.bf16.mxu0 %v4621_v29 }
 0xac4   : > { %3455 = vmatpush1.bf16.msra.mxu0 %v4619_v41 }
 0xb26   : > { %v2580_v18 = vpop.f32.mrf.mxu1 }
 0xb27   : > { %2587 = vrot.lane.b32.xlu0 %v2580_v18, %s5064_s20  ;;  %v4622_v18 = vld [vmem:[#allocation17 + $0x78] sm:$0xff]  }
 0xb28   : > { %v4332_v0 = vpop.f32.mrf.mxu1  ;;  %4152 = vmatprep.subr.bf16.mxu1 %v4622_v18 }
 0xb29   : > { %v4623_v0 = vld [vmem:[#allocation17 + $0x38] sm:$0xff]  }
 0xb2a   : > { %v2583_v34 = vpop.f32.mrf.mxu1  ;;  %4153 = vmatpush3.bf16.msra.mxu1 %v4623_v0 }
 0xb2b   : > { %v4624_v34 = vld [vmem:[#allocation17 + $0x70] sm:$0xff]  }
 0xb2c   : > { %v4333_v37 = vpop.f32.mrf.mxu1  ;;  %4154 = vmatprep.subr.bf16.mxu1 %v4624_v34 }
 0xb2d   : > { %v4625_v37 = vld [vmem:[#allocation17 + $0x30] sm:$0xff]  }
 0xb2e   : > { %v2696_v42 = vpop.f32.mrf.mxu1  ;;  %4155 = vmatpush3.bf16.msra.mxu1 %v4625_v37 }
 0xb2f   : > { %2703 = vrot.lane.b32.xlu0 %v2696_v42, %s5062_s12  ;;  %v4626_v42 = vld [vmem:[#allocation17 + $0x68] sm:$0xff]  }
 0xb30   : > { %v4344_v43 = vpop.f32.mrf.mxu1  ;;  %4156 = vmatprep.subr.bf16.mxu1 %v4626_v42 }
 0xb31   : > { %v4627_v43 = vld [vmem:[#allocation17 + $0x28] sm:$0xff]  }
 0xb32   : > { %v2699_v44 = vpop.f32.mrf.mxu1  ;;  %4157 = vmatpush3.bf16.msra.mxu1 %v4627_v43 }
 0xb33   : > { %v4628_v44 = vld [vmem:[#allocation17 + $0x60] sm:$0xff]  }
 0xb34   : > { %v4345_v46 = vpop.f32.mrf.mxu1  ;;  %4158 = vmatprep.subr.bf16.mxu1 %v4628_v44 }
 0xb35   : > { %v4629_v46 = vld [vmem:[#allocation17 + $0x20] sm:$0xff]  }
 0xb36   : > { %v2812_v20 = vpop.f32.mrf.mxu1  ;;  %4159 = vmatpush3.bf16.msra.mxu1 %v4629_v46 }
 0xb37   : > { %2819 = vrot.lane.b32.xlu0 %v2812_v20, %s5063_s23  ;;  %v4630_v20 = vld [vmem:[#allocation17 + $0x58] sm:$0xff]  }
 0xb38   : > { %v4356_v47 = vpop.f32.mrf.mxu1  ;;  %4160 = vmatprep.subr.bf16.mxu1 %v4630_v20 }
 0xb39   : > { %v4631_v47 = vld [vmem:[#allocation17 + $0x18] sm:$0xff]  }
 0xb3a   : > { %v2815_v48 = vpop.f32.mrf.mxu1  ;;  %4161 = vmatpush3.bf16.msra.mxu1 %v4631_v47 }
 0xb3c   : > { %v4357_v49 = vpop.f32.mrf.mxu1 }
 0xb61   : > { %v2929_v50 = vpop.f32.mrf.mxu1 }
 0xb62   : > { %2935 = vst.msk [vmem:[#allocation2 + $0x8] sm:$0xff] %vm1118_vm1, %v2929_v50 }
 0xb63   : > { %v4368_v51 = vpop.f32.mrf.mxu1 }
 0xb65   : > { %v2932_v52 = vpop.f32.mrf.mxu1 }
 0xb67   : > { %v4369_v53 = vpop.f32.mrf.mxu1 }
 0xb69   : > { %v3044_v55 = vpop.f32.mrf.mxu1 }
 0xb6a   : > { %3051 = vrot.lane.b32.xlu1 %v3044_v55, %s5064_s20 }
 0xb6b   : > { %v4380_v56 = vpop.f32.mrf.mxu1 }
 0xb6d   : > { %v3047_v45 = vpop.f32.mrf.mxu1 }
 0xb6e   : > { %v4023_v45 = vld [vmem:[%s6186_s25] ss:$0 sm:$0xff]  ;;  %s836_s25 = scalar_lea.vmem [#allocation18], %s5474_s17  ;;  %s4960_s17 = sshll.u32 %s5065_s3, 4  ;;  %s4961_s17 = int_to_ptr.vmem [resolvable:$false] %s4960_s17 }
 0xb6f   : > { %v4381_v57 = vpop.f32.mrf.mxu1  ;;  %s3723_s10 = sshll.u32 %s836_s25, 4  ;;  %s4962_s15 = scalar_lea.vmem %s4961_s17, 512  ;;  %s6028_s10 = int_to_ptr.vmem [resolvable:$true] %s3723_s10 }
 0xb70   : > { %s4956_s20 = scalar_lea.vmem %s6028_s10, 256  ;;  %p4963_p10 = scmp.lt.s32.totalorder %s6028_s10, %s4961_s17 }
 0xb71   : > { %v3160_v54 = vpop.f32.mrf.mxu1  ;;  %p4957_p4 = scmp.ne.s32.totalorder %s6028_s10, %s4956_s20  ;;  %p4964_p13 = scmp.lt.s32.totalorder %s4962_s15, %s4956_s20 }
 0xb72   : > { %3167 = vrot.lane.b32.xlu1 %v3160_v54, %s5062_s12  ;;  %s6026_s12 = scalar_lea.hbm %s6193_s0, %s4069_s8 }
 0xb73   : > { %v4392_v58 = vpop.f32.mrf.mxu1  ;;  %p4958_p0 = pnand %p4957_p4, %p6194_p12  ;;  %p4965_p5 = por %p4964_p13, %p4963_p10 }
 0xb75   : > { %v3163_v59 = vpop.f32.mrf.mxu1  ;;  %p4959_p9 = pneg %p4958_p0 }
 0xb76   : > { %v4024_v59 = vld [vmem:[%s6187_s21] ss:$0 sm:$0xff] }
 0xb77   : > { %v4393_v28 = vpop.f32.mrf.mxu1  ;;  %p4966_p2 = pnand %p4965_p5, %p4959_p9 }
 0xb79   : > { %v3276_v60 = vpop.f32.mrf.mxu1 }
 0xb7a   : > { %3283 = vrot.lane.b32.xlu1 %v3276_v60, %s5063_s23  ;;  %s6188_s23 = sld [smem:[#allocation42_spill]] }
 0xb7b   : > { %v4404_v61 = vpop.f32.mrf.mxu1 }
 0xb7d   : > { %v3279_v62 = vpop.f32.mrf.mxu1 }
 0xb7f   : > { %v4405_v63 = vpop.f32.mrf.mxu1 }
 0xb80   : > { %v4632_v63 = vld [vmem:[#allocation17 + $0x50] sm:$0xff]  }
 0xb81   : > { %4162 = vmatprep.subr.bf16.mxu1 %v4632_v63 }
 0xb99   : > { %v2588_v1 = vpop.permute.xlu0 %2587 }
 0xb9a   : > { %2590 = vst.msk [vmem:[#allocation2] sm:$0xff] %vm1349_vm8, %v2588_v1  ;;  %v4633_v1 = vld [vmem:[#allocation17 + $0x10] sm:$0xff]  }
 0xb9b   : > { %4163 = vmatpush3.bf16.msra.mxu1 %v4633_v1 }
 0xba1   : > { %v2704_v2 = vpop.permute.xlu0 %2703 }
 0xba2   : > { %2706 = vst.msk [vmem:[#allocation2] sm:$0xff] %vm1466_vm9, %v2704_v2  ;;  %v4634_v2 = vld [vmem:[#allocation17 + $0x48] sm:$0xff]  }
 0xba3   : > { %4164 = vmatprep.subr.bf16.mxu1 %v4634_v2 }
 0xba9   : > { %v2820_v3 = vpop.permute.xlu0 %2819 }
 0xbaa   : > { %2822 = vst.msk [vmem:[#allocation2] sm:$0xff] %vm1583_vm10, %v2820_v3  ;;  %v4635_v3 = vld [vmem:[#allocation17 + $0x8] sm:$0xff]  }
 0xbab   : > { %4165 = vmatpush3.bf16.msra.mxu1 %v4635_v3 }
 0xbb1   : > { %v3287_v4 = vld [vmem:[#allocation2] sm:$0xff] }
 0xbb2   : > { %v3289_v5 = vadd.f32 %v3287_v4, %v5793_v19  ;;  %v4636_v4 = vld [vmem:[#allocation17 + $0x40] sm:$0xff]  }
 0xbb3   : > { %4166 = vmatprep.subr.bf16.mxu1 %v4636_v4 }
 0xbb4   : > { %3291 = vadd.xlane.f32.xlu0 %v3289_v5 }
 0xbdc   : > { %v3052_v6 = vpop.permute.xlu1 %3051 }
 0xbdd   : > { %3054 = vst.msk [vmem:[#allocation2 + $0x8] sm:$0xff] %vm1349_vm8, %v3052_v6  ;;  %v3348_v6 = vld [vmem:[%s6188_s23] sm:$0x3]  ;;  %s3710_s23 = scalar_lea.sflag [#allocation5], %s5471_s16 }
 0xbe4   : > { %v3168_v7 = vpop.permute.xlu1 %3167 }
 0xbe5   : > { %3170 = vst.msk [vmem:[#allocation2 + $0x8] sm:$0xff] %vm1466_vm9, %v3168_v7 }
 0xbec   : > { %v3284_v8 = vpop.permute.xlu1 %3283 }
 0xbed   : > { %3286 = vst.msk [vmem:[#allocation2 + $0x8] sm:$0xff] %vm1583_vm10, %v3284_v8  ;;  %v3357_v8 = vrot.slane %v3348_v6, %v5532_v23  ;;  %v4041_v23 = vld [vmem:[%s6189_s2] ss:$0 sm:$0xff] }
 0xbf4   : > { %v3288_v9 = vld [vmem:[#allocation2 + $0x8] sm:$0xff] }
 0xbf5   : > { %v3290_v10 = vadd.f32 %v3288_v9, %v5795_v21  ;;  %v3353_v9 = vrot.slane %v3348_v6, %v5535_v24 }
 0xbf7   : > { %3293 = vadd.xlane.f32.xlu1 %v3290_v10 }
 0xc3d   : > { %v3292_v11 = vpop.xlane.xlu0 %3291 }
 0xc3e   : > { %v3295_v13 = vmul.f32 0.0078125, %v3292_v11 }
 0xc40   : > { %v5996_v14 = vsub.f32 %v3289_v5, %v3295_v13  ;;  %v4637_v5 = vld [vmem:[#allocation17] sm:$0xff]  }
 0xc41   : > { %4167 = vmatpush3.bf16.msra.mxu1 %v4637_v5 }
 0xc42   : > { %v3299_v19 = vmul.f32 %v5996_v14, %v5996_v14 }
 0xc44   : > { %3301 = vadd.xlane.f32.xlu0 %v3299_v19 }
 0xc80   : > { %v3294_v12 = vpop.xlane.xlu1 %3293 }
 0xc81   : > { %v3296_v22 = vmul.f32 0.0078125, %v3294_v12 }
 0xc83   : > { %v3298_v21 = vsub.f32 %v3290_v10, %v3296_v22 }
 0xc85   : > { %v3300_v25 = vmul.f32 %v3298_v21, %v3298_v21 }
 0xc87   : > { %3303 = vadd.xlane.f32.xlu0 %v3300_v25 }
 0xccd   : > { %v3302_v48 = vpop.xlane.xlu0 %3301 }
 0xcce   : > { %v3305_v49 = vmul.f32 0.0078125, %v3302_v48 }
 0xcd0   : > { %v3307_v50 = vadd.f32 1e-05, %v3305_v49 }
 0xcd2   : > { %4706 = vrsqrt.f32 %v3307_v50  ;;  %v4058_v50 = vld [vmem:[%s6190_s19] ss:$0 sm:$0xff] }
 0xcdf   : > { %v4707_v55 = vpop.eup %4706 }
 0xce0   : > { %v3311_v56 = vmul.f32 %v4707_v55, %v5996_v14 }
 0xce2   : > { %v3320_v58 = vmul.f32 %v4023_v45, %v3311_v56 }
 0xce4   : > { %v3329_v60 = vadd.f32 %v4024_v59, %v3320_v58 }
 0xd10   : > { %v3304_v51 = vpop.xlane.xlu0 %3303 }
 0xd11   : > { %v3306_v52 = vmul.f32 0.0078125, %v3304_v51 }
 0xd13   : > { %v3308_v53 = vadd.f32 1e-05, %v3306_v52  ;;  %v4059_v52 = vld [vmem:[%s6191_s4] ss:$0 sm:$0xff] }
 0xd15   : > { %4708 = vrsqrt.f32 %v3308_v53 }
 0xd22   : > { %v4709_v57 = vpop.eup %4708 }
 0xd23   : > { %v3312_v54 = vmul.f32 %v4709_v57, %v3298_v21 }
 0xd25   : > { %v3321_v28 = vmul.f32 %v4023_v45, %v3312_v54 }
 0xd27   : > { %v3330_v61 = vadd.f32 %v4024_v59, %v3321_v28 }
 0xd29   : > { %v3347_v62 = vpack.c.bf16 %v3330_v61, %v3329_v60 }
 0xd2b   : > { %3473 = vmatmul.mubr.bf16.vlgmr.msra.gmra.mxu0 %v3347_v62 }
 0xdeb   : > { %v3474_v7 = vpop.f32.mrf.mxu0 }
 0xdec   : > { %v3475_v19 = vadd.f32 %v3474_v7, %v3353_v9 }
 0xded   : > { %v3476_v10 = vpop.f32.mrf.mxu0 }
 0xdee   : > { %v3477_v13 = vadd.f32 %v3476_v10, %v3357_v8  ;;  %v3483_v22 = vmax.f32 %v3475_v19, 0.0 }
 0xdef   : > { %v3478_v11 = vpop.f32.mrf.mxu0 }
 0xdf0   : > { %v3479_v14 = vadd.f32 %v3478_v11, %v3353_v9  ;;  %v3484_v30 = vmax.f32 %v3477_v13, 0.0 }
 0xdf1   : > { %v3480_v15 = vpop.f32.mrf.mxu0 }
 0xdf2   : > { %v3481_v26 = vadd.f32 %v3480_v15, %v3357_v8  ;;  %v3485_v27 = vmax.f32 %v3479_v14, 0.0 }
 0xdf4   : > { %v3486_v12 = vmax.f32 %v3481_v26, 0.0  ;;  %v3519_v25 = vpack.c.bf16 %v3485_v27, %v3483_v22 }
 0xdf6   : > { %v3520_v21 = vpack.c.bf16 %v3486_v12, %v3484_v30 }
 0xdf8   : > { %3656 = vmatprep.mubr.bf16.mxu1 %v3520_v21 }
 0xdf9   : > { %3657 = vmatmul.mubr.bf16.vlgmr.msra.gmra.mxu1 %v3519_v25 }
 0xeb9   : > { %v4168_v31 = vpop.f32.mrf.mxu1 }
 0xebb   : > { %v4169_v24 = vpop.f32.mrf.mxu1 }
 0xebc   : > { %v4170_v32 = vadd.f32 %v4169_v24, %v4168_v31 }
 0xebd   : > { %v4171_v33 = vpop.f32.mrf.mxu1 }
 0xebe   : > { %v3659_v35 = vadd.f32 %v4170_v32, %v4041_v23 }
 0xebf   : > { %v4172_v36 = vpop.f32.mrf.mxu1 }
 0xec0   : > { %v4173_v17 = vadd.f32 %v4172_v36, %v4171_v33  ;;  %v3665_v38 = vadd.f32 %v3659_v35, %v3329_v60 }
 0xec2   : > { %v3662_v39 = vadd.f32 %v4173_v17, %v4041_v23  ;;  %3667 = vadd.xlane.f32.xlu1 %v3665_v38 }
 0xec4   : > { %v3666_v16 = vadd.f32 %v3662_v39, %v3330_v61 }
 0xec6   : > { %3669 = vadd.xlane.f32.xlu0 %v3666_v16 }
 0xf4b   : > { %v3668_v40 = vpop.xlane.xlu1 %3667 }
 0xf4c   : > { %v3671_v29 = vmul.f32 0.0078125, %v3668_v40 }
 0xf4e   : > { %v3673_v41 = vsub.f32 %v3665_v38, %v3671_v29 }
 0xf4f   : > { %v3670_v18 = vpop.xlane.xlu0 %3669 }
 0xf50   : > { %v3672_v0 = vmul.f32 0.0078125, %v3670_v18  ;;  %v3675_v34 = vmul.f32 %v3673_v41, %v3673_v41 }
 0xf52   : > { %v3674_v37 = vsub.f32 %v3666_v16, %v3672_v0  ;;  %3677 = vadd.xlane.f32.xlu1 %v3675_v34 }
 0xf54   : > { %v3676_v42 = vmul.f32 %v3674_v37, %v3674_v37 }
 0xf56   : > { %3679 = vadd.xlane.f32.xlu0 %v3676_v42 }
 0xfdb   : > { %v3678_v43 = vpop.xlane.xlu1 %3677 }
 0xfdc   : > { %v3681_v44 = vmul.f32 0.0078125, %v3678_v43 }
 0xfde   : > { %v3683_v46 = vadd.f32 1e-05, %v3681_v44 }
 0xfdf   : > { %v3680_v20 = vpop.xlane.xlu0 %3679 }
 0xfe0   : > { %4710 = vrsqrt.f32 %v3683_v46  ;;  %v3682_v47 = vmul.f32 0.0078125, %v3680_v20 }
 0xfe2   : > { %v3684_v48 = vadd.f32 1e-05, %v3682_v47 }
 0xfe4   : > { %4712 = vrsqrt.f32 %v3684_v48 }
 0xfed   : > { %v4711_v49 = vpop.eup %4710 }
 0xfee   : > { %v3687_v51 = vmul.f32 %v4711_v49, %v3673_v41 }
 0xff0   : > { %v3696_v53 = vmul.f32 %v4058_v50, %v3687_v51 }
 0xff1   : > { %v4713_v55 = vpop.eup %4712 }
 0xff2   : > { %v3705_v56 = vadd.f32 %v4059_v52, %v3696_v53  ;;  %v3688_v45 = vmul.f32 %v4713_v55, %v3674_v37 }
 0xff4   : > { %v3697_v57 = vmul.f32 %v4058_v50, %v3688_v45  ;;  %3707 = vst [vmem:[%s836_s25] sm:$0xff] %v3705_v56 }
 0xff6   : > { %v3706_v54 = vadd.f32 %v4059_v52, %v3697_v57 }
 0xff8   : > { %3708 = vst [vmem:[%s836_s25 + $0x8] sm:$0xff] %v3706_v54 }
 0xff9   : > { %4969 = shalt.err (!%p4966_p2)
}
 0xffa   : > { %s4970_s2 = scalar_lea.hbm %s6026_s12, 256  ;;  %s4974_s19 = scalar_lea.hbm %s6193_s0, 512 }
 0xffb   : > { %p4971_p6 = scmp.ne.s32.totalorder %s6026_s12, %s4970_s2  ;;  %p4975_p7 = scmp.lt.s32.totalorder %s6026_s12, %s6193_s0 }
 0xffc   : > { %p4976_p11 = scmp.lt.s32.totalorder %s4974_s19, %s4970_s2 }
 0xffd   : > { %p4972_p3 = pnand %p4971_p6, %p6194_p12 }
 0xffe   : > { %p4977_p8 = por %p4976_p11, %p4975_p7 }
 0xfff   : > { %p4973_p1 = pneg %p4972_p3 }
0x1001   : > { %p4978_p4 = pnand %p4977_p8, %p4973_p1 }
0x1003   : > { %4981 = shalt.err (!%p4978_p4)
}
0x1004   : > { %s5066_s4 = smov 128   ;;  %s5067_s8 = smov 8  }
0x1005   : > { %4434 = dma.vmem_to_hbm [thread:$0]  (%p6194_p12), %s6028_s10, 256, %s6026_s12, %s3710_s23, %s5066_s4, %s5066_s4, %s5067_s8  }
0x1006 PF: > { %s6195_s25 = sld [smem:[#allocation26_spill]]  ;;  %p6198_p9 = scmp.ge.s32.totalorder %s5040_s24, 2 }
0x1007   : > { %s6196_s1 = sld [smem:[#allocation31_spill]] }
0x100c   : > { %s3738_s21 = sand.u32 1, %s6195_s25  }
0x100d   : > { %p6197_p0 = scmp.ne.s32.totalorder %s6196_s1, 0  ;;  %s3739_s20 = scalar_lea.sflag [#allocation5], %s3738_s21 }
0x100f   : > { %p4466_p10 = pnand %p6198_p9, %p6197_p0 }
0x1011   : > { %p4467_p13 = pneg %p4466_p10 }
0x1013   : > { %5023 = dma.done.wait (%p4467_p13), %s3739_s20, 256  }
0x1014   : > { %5025 = vsyncadd (%p4467_p13), %s3739_s20, 4294967040  ;;  %s6199_s24 = sld [smem:[#allocation28_spill]]  ;;  %s6202_s1 = smov %s5032_s22 }
0x1015   : > { %s6200_s3 = sld [smem:[#allocation27_spill]] }
0x1016   : > { %s6201_s23 = sld [smem:[#allocation29_spill]] }
0x101a   : > { %p41_p5 = scmp.ge.s32.totalorder %s6199_s24, 4  }
0x101b   : > { %s6203_s22 = smov %s6200_s3 }
0x101c   :  { %43 = sbr.rel (!%p41_p5) target bundleno = 28 (0x1c), region = 202 }
0x1021   :  { %3744 = vsyncpa [#allocation4], 1 }
0x1022   :  { %3746 = vsyncpa [#allocation4 + $0x1], 1 }
0x1023   :  { %3747 = vsyncpa [#allocation7], 1 }
0x1024   :  { %3749 = vsyncpa [#allocation7 + $0x1], 1 }
0x1025   :  { %3750 = vsyncpa [#allocation10], 1 }
0x1026   :  { %3752 = vsyncpa [#allocation10 + $0x1], 1 }
0x1027   :  { %3753 = vsyncpa [#allocation13], 1 }
0x1028   :  { %3754 = vsyncpa [#allocation16], 1 }
0x1029   :  { %3755 = vsyncpa [#allocation5], 1 }
0x102a   :  { %3757 = vsyncpa [#allocation5 + $0x1], 1 }

</bundles_post_ra>
